<compile_context>
chip_gen: v7x
topology: tpu7x:2x2x1
jax: 0.10.0
libtpu: 0.0.40
codegen_flags: <defaults>
</compile_context>

<pallas_src>
import functools

import jax
import jax.numpy as jnp
from jax.experimental import pallas as pl
from jax.experimental.pallas import tpu as pltpu

IN_FEATURES = 784
HIDDEN = 2000


def _round_up(x, m):
    return (x + m - 1) // m * m


def _cdiv(a, b):
    return (a + b - 1) // b


def dis_mlp_kernel(x_ref, w1_ref, b1_ref, w2_ref, b2_ref, o_ref):
    # x_ref:  (TM, 784)  f32        w1_ref: (784, 2000) f32/bf16 (resident, 1 buffer)
    # b1_ref: (1, 2000)  f32        w2_ref: (1, 2000)   f32 (row vector)
    # b2_ref: (1, 1)     f32        o_ref:  (TM, 1)     f32
    x = x_ref[...].astype(w1_ref.dtype)
    h = jnp.dot(x, w1_ref[...], preferred_element_type=jnp.float32) + b1_ref[...]
    # LeakyReLU (PyTorch default negative_slope = 0.01): max(h, 0.01*h) == lrelu(h)
    h = jnp.maximum(h, 0.01 * h)
    # Layer 2 (2000 -> 1): VPU multiply + cross-lane reduce instead of a degenerate
    # zero-padded MXU matmul.
    out = jnp.sum(h * w2_ref[...], axis=-1, keepdims=True) + b2_ref[...]
    o_ref[...] = out.astype(o_ref.dtype)


def prepare_params(w1, b1, w2, b2, *, w1_dtype=jnp.bfloat16):
    """One-time layout prep (outside the per-call path).

    w1: (784, 2000), b1: (2000,), w2: (2000, 1), b2: (1,)  stored so forward is
    x @ W1 + b1  (== PyTorch x @ W1.T + b1 with W1 stored transposed).

    w1_dtype defaults to bfloat16 (valid on v5e/v6e/v7x MXUs); it halves the
    dominant W1 HBM stream.  Pass jnp.float32 for exact-parity checks.
    """
    w1k = w1.astype(w1_dtype)                       # (784, 2000)
    b1k = b1.reshape(1, -1).astype(jnp.float32)     # (1, 2000)
    w2k = w2.reshape(1, -1).astype(jnp.float32)     # (1, 2000) row vector
    b2k = b2.reshape(1, 1).astype(jnp.float32)      # (1, 1)
    return w1k, b1k, w2k, b2k


def _choose_tile(B):
    """Tile-count-aware tm: pads at most 7 rows of the last (partial) block."""
    cap = 512
    n_tiles = _cdiv(B, cap)
    # v7x: once compute dominates (large batch), an even tile count lets the
    # ("parallel",) axis feed both TensorCores.  Small batches stay single-tile
    # so the two TCs don't each pull their own copy of W1 over the shared bus.
    if B > 1024 and n_tiles % 2 == 1:
        n_tiles += 1
    return _round_up(_cdiv(B, n_tiles), 8)


@functools.partial(jax.jit, static_argnames=("tm",))
def dis_model_forward(x, w1k, b1k, w2k, b2k, *, tm=None):
    """x: [B, 784] float32. Returns [B, 1] float32 (same as Dis_Model.forward)."""
    B, K = x.shape
    H = w1k.shape[1]

    if tm is None:
        tm = _choose_tile(B)
    grid = (_cdiv(B, tm),)

    # VMEM budget from the actual buffers of this configuration (+50% headroom and
    # a 2 MiB margin for compiler scratch / the f32 hidden intermediate), clamped
    # to [16 MiB, 48 MiB] so it is comfortable on v5e/v6e and never crowds v7x's
    # 64 MiB physical VMEM.
    w1_bytes = K * H * jnp.dtype(w1k.dtype).itemsize          # single-buffered
    const_bytes = (2 * H + 1) * 4                             # b1, w2, b2
    x_tile_bytes = tm * K * x.dtype.itemsize                  # double-buffered
    out_tile_bytes = tm * 4                                   # double-buffered
    h_bytes = tm * H * 4                                      # f32 hidden activations
    vmem_limit = int(
        1.5 * (w1_bytes + const_bytes + 2 * (x_tile_bytes + out_tile_bytes) + h_bytes)
    ) + (2 << 20)
    vmem_limit = max(16 << 20, min(vmem_limit, 48 << 20))

    # NOTE: no host-side padding of x.  The last grid block may extend past B;
    # its extra input rows are don't-care (each output row depends only on its own
    # input row) and the out-of-bounds output rows are dropped by the truncated
    # writeback DMA, so out has exactly shape (B, 1).
    out = pl.pallas_call(
        dis_mlp_kernel,
        out_shape=jax.ShapeDtypeStruct((B, 1), jnp.float32),
        grid_spec=pltpu.PrefetchScalarGridSpec(
            num_scalar_prefetch=0,
            grid=grid,
            in_specs=[
                pl.BlockSpec((tm, K), lambda i: (i, 0)),                 # x tile
                pl.BlockSpec((K, H), lambda i: (0, 0),
                             pipeline_mode=pl.Buffered(1)),              # W1 resident
                pl.BlockSpec((1, H), lambda i: (0, 0),
                             pipeline_mode=pl.Buffered(1)),              # b1
                pl.BlockSpec((1, H), lambda i: (0, 0),
                             pipeline_mode=pl.Buffered(1)),              # w2 row
                pl.BlockSpec((1, 1), lambda i: (0, 0),
                             pipeline_mode=pl.Buffered(1)),              # b2
            ],
            out_specs=pl.BlockSpec((tm, 1), lambda i: (i, 0)),
        ),
        compiler_params=pltpu.CompilerParams(
            dimension_semantics=("parallel",),   # batch tiles are independent
            vmem_limit_bytes=vmem_limit,
        ),
    )(x, w1k, b1k, w2k, b2k)

    return out


def init_params(key):
    """Deterministic init mimicking nn.Linear defaults: U(-1/sqrt(fan_in), +...)."""
    k1, k2, k3, k4 = jax.random.split(key, 4)
    in1, out1 = IN_FEATURES, HIDDEN
    in2, out2 = HIDDEN, 1
    bound1 = 1.0 / jnp.sqrt(jnp.float32(in1))
    bound2 = 1.0 / jnp.sqrt(jnp.float32(in2))
    # stored as [in, out] so forward computes x @ W + b (== PyTorch x @ W.T + b)
    w1 = jax.random.uniform(k1, (in1, out1), jnp.float32, -bound1, bound1)
    b1 = jax.random.uniform(k2, (out1,), jnp.float32, -bound1, bound1)
    w2 = jax.random.uniform(k3, (in2, out2), jnp.float32, -bound2, bound2)
    b2 = jax.random.uniform(k4, (out2,), jnp.float32, -bound2, bound2)
    return w1, b1, w2, b2


def reference_forward(x, w1, b1, w2, b2):
    h = x @ w1 + b1
    h = jnp.where(h >= 0, h, 0.01 * h)
    return h @ w2 + b2


if __name__ == "__main__":
    key = jax.random.PRNGKey(0)
    kp, kx = jax.random.split(key)
    w1, b1, w2, b2 = init_params(kp)

    params_bf16 = prepare_params(w1, b1, w2, b2)                          # perf default
    params_f32 = prepare_params(w1, b1, w2, b2, w1_dtype=jnp.float32)     # parity mode

    # Small batch (single tiny tile, partial block without any host padding)
    batch = 2
    x = jax.random.normal(kx, (batch, IN_FEATURES), jnp.float32)
    ref = reference_forward(x, w1, b1, w2, b2)

    out_f32 = jax.block_until_ready(dis_model_forward(x, *params_f32))
    assert out_f32.shape == (batch, 1), out_f32.shape
    assert jnp.allclose(out_f32, ref, atol=1e-3, rtol=1e-3)

    out_bf16 = jax.block_until_ready(dis_model_forward(x, *params_bf16))
    assert out_bf16.shape == (batch, 1), out_bf16.shape
    assert jnp.allclose(out_bf16, ref, atol=5e-2, rtol=5e-2)   # bf16 W1 tolerance

    # Larger batch: exercises the multi-tile grid + a partial final block
    kx2 = jax.random.fold_in(kx, 1)
    xb = jax.random.normal(kx2, (600, IN_FEATURES), jnp.float32)
    refb = reference_forward(xb, w1, b1, w2, b2)
    outb = jax.block_until_ready(dis_model_forward(xb, *params_bf16))
    assert outb.shape == (600, 1), outb.shape
    assert jnp.allclose(outb, refb, atol=5e-2, rtol=5e-2)

    print("KERNEL_OK")
</pallas_src>

<mosaic_0001>
module attributes {stable_mosaic.version = 11 : i64} {
  func.func @dis_mlp_kernel(%arg0: i32, %arg1: memref<8x784xf32, #tpu.memory_space<vmem>>, %arg2: memref<784x2000xf32, #tpu.memory_space<vmem>>, %arg3: memref<1x2000xf32, #tpu.memory_space<vmem>>, %arg4: memref<1x2000xf32, #tpu.memory_space<vmem>>, %arg5: memref<1x1xf32, #tpu.memory_space<vmem>>, %arg6: memref<8x1xf32, #tpu.memory_space<vmem>>) attributes {dimension_semantics = [#tpu.dimension_semantics<parallel>], iteration_bounds = array<i64: 1>, scalar_prefetch = 0 : i64, scratch_operands = 0 : i64, tpu.core_type = #tpu.core_type<tc>, window_params = [{transform_indices = @transform_0, window_bounds = array<i64: 8, 784>}, {pipeline_mode = #tpu.pipeline_mode<synchronous>, transform_indices = @transform_1, window_bounds = array<i64: 784, 2000>}, {pipeline_mode = #tpu.pipeline_mode<synchronous>, transform_indices = @transform_2, window_bounds = array<i64: 1, 2000>}, {pipeline_mode = #tpu.pipeline_mode<synchronous>, transform_indices = @transform_3, window_bounds = array<i64: 1, 2000>}, {pipeline_mode = #tpu.pipeline_mode<synchronous>, transform_indices = @transform_4, window_bounds = array<i64: 1, 1>}, {transform_indices = @transform_5, window_bounds = array<i64: 8, 1>}]} {
    %c0 = arith.constant 0 : index
    %c0_0 = arith.constant 0 : index
    %0 = vector.load %arg1[%c0, %c0_0] : memref<8x784xf32, #tpu.memory_space<vmem>>, vector<8x784xf32>
    %c0_1 = arith.constant 0 : index
    %c0_2 = arith.constant 0 : index
    %1 = vector.load %arg2[%c0_1, %c0_2] : memref<784x2000xf32, #tpu.memory_space<vmem>>, vector<784x2000xf32>
    %cst = arith.constant dense<0.000000e+00> : vector<8x2000xf32>
    %2 = tpu.matmul %0, %1, %cst {dimension_numbers = #tpu.dot_dimension_numbers<[1], [0], [0], [1], [0, 0, 1, 1], [], []>} : vector<8x784xf32>, vector<784x2000xf32>, vector<8x2000xf32> -> vector<8x2000xf32>
    %c0_3 = arith.constant 0 : index
    %c0_4 = arith.constant 0 : index
    %3 = vector.load %arg3[%c0_3, %c0_4] : memref<1x2000xf32, #tpu.memory_space<vmem>>, vector<1x2000xf32>
    %4 = vector.broadcast %3 : vector<1x2000xf32> to vector<8x2000xf32>
    %5 = arith.addf %2, %4 : vector<8x2000xf32>
    %cst_5 = arith.constant 0.00999999977 : f32
    %6 = vector.broadcast %cst_5 : f32 to vector<8x2000xf32>
    %7 = arith.mulf %6, %5 : vector<8x2000xf32>
    %8 = arith.maximumf %5, %7 : vector<8x2000xf32>
    %c0_6 = arith.constant 0 : index
    %c0_7 = arith.constant 0 : index
    %9 = vector.load %arg4[%c0_6, %c0_7] : memref<1x2000xf32, #tpu.memory_space<vmem>>, vector<1x2000xf32>
    %10 = vector.broadcast %9 : vector<1x2000xf32> to vector<8x2000xf32>
    %11 = arith.mulf %8, %10 : vector<8x2000xf32>
    %cst_8 = arith.constant dense<0.000000e+00> : vector<8xf32>
    %12 = vector.multi_reduction <add>, %11, %cst_8 [1] : vector<8x2000xf32> to vector<8xf32>
    %13 = vector.shape_cast %12 : vector<8xf32> to vector<8x1xf32>
    %c0_9 = arith.constant 0 : index
    %c0_10 = arith.constant 0 : index
    %14 = vector.load %arg5[%c0_9, %c0_10] : memref<1x1xf32, #tpu.memory_space<vmem>>, vector<1x1xf32>
    %15 = vector.broadcast %14 : vector<1x1xf32> to vector<8x1xf32>
    %16 = arith.addf %13, %15 : vector<8x1xf32>
    %c0_11 = arith.constant 0 : index
    %c0_12 = arith.constant 0 : index
    %17 = vector.load %arg6[%c0_11, %c0_12] : memref<8x1xf32, #tpu.memory_space<vmem>>, vector<8x1xf32>
    tpu.vector_store %arg6[%c0_11, %c0_12], %16 {strides = array<i32>} : memref<8x1xf32, #tpu.memory_space<vmem>>, vector<8x1xf32>,
    return
  }
  func.func @transform_0(%arg0: i32) -> (i32, i32) {
    %c0_i32 = arith.constant 0 : i32
    %c0_i32_0 = arith.constant 0 : i32
    return %arg0, %c0_i32 : i32, i32
  }
  func.func @transform_1(%arg0: i32) -> (i32, i32) {
    %c0_i32 = arith.constant 0 : i32
    %c0_i32_0 = arith.constant 0 : i32
    %c0_i32_1 = arith.constant 0 : i32
    return %c0_i32, %c0_i32_0 : i32, i32
  }
  func.func @transform_2(%arg0: i32) -> (i32, i32) {
    %c0_i32 = arith.constant 0 : i32
    %c0_i32_0 = arith.constant 0 : i32
    %c0_i32_1 = arith.constant 0 : i32
    return %c0_i32, %c0_i32_0 : i32, i32
  }
  func.func @transform_3(%arg0: i32) -> (i32, i32) {
    %c0_i32 = arith.constant 0 : i32
    %c0_i32_0 = arith.constant 0 : i32
    %c0_i32_1 = arith.constant 0 : i32
    return %c0_i32, %c0_i32_0 : i32, i32
  }
  func.func @transform_4(%arg0: i32) -> (i32, i32) {
    %c0_i32 = arith.constant 0 : i32
    %c0_i32_0 = arith.constant 0 : i32
    %c0_i32_1 = arith.constant 0 : i32
    return %c0_i32, %c0_i32_0 : i32, i32
  }
  func.func @transform_5(%arg0: i32) -> (i32, i32) {
    %c0_i32 = arith.constant 0 : i32
    %c0_i32_0 = arith.constant 0 : i32
    return %arg0, %c0_i32 : i32, i32
  }
}

</mosaic_0001>

<bundles_post_ra>
// kernel: dis_model_forward.1
= control target key start
LH: loop header
LB: loop body
LE: loop exit
PB: predicated region body
PF: predicated region fallthrough
CT: control target
= control target key end

     0   :  { %s6346_s0 = inlined_call_operand.hbm [shape: f32[2,784], index: 0, kind: input, shape index: {}]   ;;  %s6347_s1 = inlined_call_operand.hbm [shape: f32[784,2000], index: 1, kind: input, shape index: {}]   ;;  %s6348_s2 = inlined_call_operand.hbm [shape: f32[1,2000], index: 2, kind: input, shape index: {}]   ;;  %s6349_s3 = inlined_call_operand.hbm [shape: f32[1,2000], index: 3, kind: input, shape index: {}]   ;;  %s6350_s4 = inlined_call_operand.<no memory space> [shape: f32[1,1], index: 4, kind: input, shape index: {}]   ;;  %s6351_s5 = inlined_call_operand.vmem [shape: f32[2,1], index: 5, kind: output, shape index: {}]  }
   0x1   :  { %v10_v0 = vstv %s6350_s4 }
   0x2   :  { %11 = vst [vmem:[#allocation2] sm:$0x1] %v10_v0 }
   0x3   :  { %12 = vsyncpa [#allocation4], 0 }
   0x4   :  { %13 = vsyncpa [#allocation6], 0 }
   0x5   :  { %14 = vsyncpa [#allocation9], 0 }
   0x6   :  { %19 = vsyncadd [#allocation4], 672  ;;  %s6055_s20 = smov [#allocation5]   ;;  %s5961_s24 = scalar_lea.hbm %s6347_s1, 200704 }
   0x7   :  { %s32_s21 = sshll.u32 %s6055_s20, 4  ;;  %p5962_p0 = scmp.ne.s32.totalorder %s6347_s1, %s5961_s24  ;;  %s33_s21 = int_to_ptr.vmem [resolvable:$true] %s32_s21 }
   0x8   :  { %p5965_p1 = scmp.lt.u32.totalorder %s5961_s24, %s6347_s1 }
   0xa   :  { %p5967_p2 = pnand %p5965_p1, %p5962_p0 }
   0xc   :  { %5970 = shalt.err (!%p5967_p2)
}
   0xd   :  { %s5971_s4 = scalar_lea.vmem %s33_s21, 200704  ;;  %p5976_p4 = scmp.lt.s32.totalorder %s33_s21, %s33_s21 }
   0xe   :  { %p5972_p3 = scmp.ne.s32.totalorder %s33_s21, %s5971_s4  ;;  %p5977_p5 = scmp.lt.s32.totalorder %s5971_s4, %s5971_s4 }
  0x10   :  { %p5978_p6 = por %p5977_p5, %p5976_p4 }
  0x12   :  { %p5979_p7 = pnand %p5978_p6, %p5972_p3 }
  0x14   :  { %5982 = shalt.err (!%p5979_p7)
}
  0x15   :  { %s6056_s29 = smov 2048   ;;  %s6057_s30 = smov 128  }
  0x16   :  { %38 = dma.hbm_to_vmem [thread:$0]  %s6347_s1, 200704, %s33_s21, [#allocation6], %s6056_s29, %s6056_s29, %s6057_s30  }
  0x17   :  { %s6058_s8 = smov [#allocation3]   ;;  %s5983_s12 = scalar_lea.hbm %s6346_s0, 224 }
  0x18   :  { %s20_s9 = sshll.u32 %s6058_s8, 4  ;;  %p5984_p8 = scmp.ne.s32.totalorder %s6346_s0, %s5983_s12  ;;  %s21_s9 = int_to_ptr.vmem [resolvable:$true] %s20_s9 }
  0x19   :  { %p5987_p9 = scmp.lt.u32.totalorder %s5983_s12, %s6346_s0 }
  0x1b   :  { %p5989_p10 = pnand %p5987_p9, %p5984_p8 }
  0x1d   :  { %5992 = shalt.err (!%p5989_p10)
}
  0x1e   :  { %s5993_s17 = scalar_lea.vmem %s21_s9, 224  ;;  %s5997_s1 = scalar_lea.vmem %s21_s9, 896 }
  0x1f   :  { %p5994_p11 = scmp.ne.s32.totalorder %s21_s9, %s5993_s17  ;;  %p5998_p12 = scmp.lt.s32.totalorder %s21_s9, %s21_s9 }
  0x20   :  { %p5999_p13 = scmp.lt.s32.totalorder %s5997_s1, %s5993_s17 }
  0x22   :  { %p6000_p0 = por %p5999_p13, %p5998_p12 }
  0x24   :  { %p6001_p1 = pnand %p6000_p0, %p5994_p11 }
  0x26   :  { %6004 = shalt.err (!%p6001_p1)
}
  0x27   :  { %s6059_s18 = smov 224   ;;  %s6060_s19 = smov 14  }
  0x28   :  { %26 = dma.hbm_to_vmem [thread:$0]  %s6346_s0, 224, %s21_s9, [#allocation4], %s6059_s18, %s6059_s18, %s6060_s19  }
  0x29   :  { %s6061_s22 = smov [#allocation7]   ;;  %s6062_s24 = smov [#allocation8]  }
  0x2a   :  { %s45_s23 = sshll.u32 %s6061_s22, 4  ;;  %s55_s25 = sshll.u32 %s6062_s24, 4  ;;  %s46_s23 = int_to_ptr.vmem [resolvable:$true] %s45_s23  ;;  %s56_s25 = int_to_ptr.vmem [resolvable:$true] %s55_s25 }
  0x2b   :  { %s6005_s28 = scalar_lea.hbm %s6348_s2, 256 }
  0x2c   :  { %p6006_p2 = scmp.ne.s32.totalorder %s6348_s2, %s6005_s28  ;;  %p6009_p3 = scmp.lt.u32.totalorder %s6005_s28, %s6348_s2 }
  0x2e   :  { %p6011_p4 = pnand %p6009_p3, %p6006_p2 }
  0x30   :  { %6014 = shalt.err (!%p6011_p4)
}
  0x31   :  { %s6015_s0 = scalar_lea.vmem %s46_s23, 256  ;;  %p6020_p6 = scmp.lt.s32.totalorder %s46_s23, %s46_s23 }
  0x32   :  { %p6016_p5 = scmp.ne.s32.totalorder %s46_s23, %s6015_s0  ;;  %p6021_p7 = scmp.lt.s32.totalorder %s6015_s0, %s6015_s0 }
  0x34   :  { %p6022_p8 = por %p6021_p7, %p6020_p6 }
  0x36   :  { %p6023_p9 = pnand %p6022_p8, %p6016_p5 }
  0x38   :  { %6026 = shalt.err (!%p6023_p9)
}
  0x39   :  { %48 = dma.hbm_to_vmem [thread:$0]  %s6348_s2, 256, %s46_s23, [#allocation6]  }
  0x3a   :  { %s6027_s11 = scalar_lea.hbm %s6349_s3, 256 }
  0x3b   :  { %p6028_p10 = scmp.ne.s32.totalorder %s6349_s3, %s6027_s11  ;;  %p6031_p11 = scmp.lt.u32.totalorder %s6027_s11, %s6349_s3 }
  0x3d   :  { %p6033_p12 = pnand %p6031_p11, %p6028_p10 }
  0x3f   :  { %6036 = shalt.err (!%p6033_p12)
}
  0x40   :  { %s6037_s16 = scalar_lea.vmem %s56_s25, 256  ;;  %p6042_p0 = scmp.lt.s32.totalorder %s56_s25, %s56_s25 }
  0x41   :  { %p6038_p13 = scmp.ne.s32.totalorder %s56_s25, %s6037_s16  ;;  %p6043_p1 = scmp.lt.s32.totalorder %s6037_s16, %s6037_s16 }
  0x43   :  { %p6044_p2 = por %p6043_p1, %p6042_p0 }
  0x45   :  { %p6045_p3 = pnand %p6044_p2, %p6038_p13 }
  0x47   :  { %6048 = shalt.err (!%p6045_p3)
}
  0x48   :  { %58 = dma.hbm_to_vmem [thread:$0]  %s6349_s3, 256, %s56_s25, [#allocation9]  }
  0x49   :  { %6049 = dma.done.wait [#allocation4], 896  }
  0x4a   :  { %6050 = vsyncadd [#allocation4], 4294966400 }
  0x4b   :  { %6051 = dma.done.wait [#allocation6], 200960  }
  0x4c   :  { %6052 = vsyncadd [#allocation6], 4294766336 }
  0x4d   :  { %6053 = dma.done.wait [#allocation9], 256  }
  0x4e   :  { %6054 = vsyncadd [#allocation9], 4294967040  ;;  %v82_v1 = vld [vmem:[#allocation5 + $0x8] sm:$0xff]  ;;  %v84_v3 = vld [vmem:[#allocation5 + $0x18] sm:$0xff]  ;;  %vm1818_vm0 = vcmask 130048   ;;  %vm4239_vm1 = vcmask 654336  }
  0x4f   :  { %v98_v2 = vld [vmem:[#allocation5 + $0x88] sm:$0xff]  ;;  %v100_v5 = vld [vmem:[#allocation5 + $0x98] sm:$0xff]  ;;  %v81_v6 = vld [vmem:[#allocation5] sm:$0xff]  ;;  %vm4252_vm2 = vcmask 7168  }
  0x50   :  { %v4305_v4 = vpack.c.bf16 %v98_v2, %v82_v1  ;;  %v97_v7 = vld [vmem:[#allocation5 + $0x80] sm:$0xff]  ;;  %v4501_v8 = vpack.c.bf16 %v100_v5, %v84_v3  ;;  %v83_v10 = vld [vmem:[#allocation5 + $0x10] sm:$0xff]  ;;  %v114_v12 = vld [vmem:[#allocation5 + $0x108] sm:$0xff] }
  0x51   :  { %v4307_v9 = vpack.c.bf16 %v97_v7, %v81_v6  ;;  %v99_v11 = vld [vmem:[#allocation5 + $0x90] sm:$0xff]  ;;  %v130_v14 = vld [vmem:[#allocation5 + $0x188] sm:$0xff]  ;;  %v116_v15 = vld [vmem:[#allocation5 + $0x118] sm:$0xff] }
  0x52   :  { %4306 = vmatprep.subr.bf16.mxu0 %v4305_v4  ;;  %v4503_v13 = vpack.c.bf16 %v99_v11, %v83_v10  ;;  %v132_v16 = vld [vmem:[#allocation5 + $0x198] sm:$0xff]  ;;  %4502 = vmatprep.subr.bf16.mxu1 %v4501_v8  ;;  %v4309_v17 = vpack.c.bf16 %v130_v14, %v114_v12  ;;  %v113_v19 = vld [vmem:[#allocation5 + $0x100] sm:$0xff]  ;;  %v115_v21 = vld [vmem:[#allocation5 + $0x110] sm:$0xff] }
  0x53   :  { %4308 = vmatpush1.bf16.msra.mxu0 %v4307_v9  ;;  %v4505_v18 = vpack.c.bf16 %v132_v16, %v116_v15  ;;  %v129_v20 = vld [vmem:[#allocation5 + $0x180] sm:$0xff]  ;;  %v131_v23 = vld [vmem:[#allocation5 + $0x190] sm:$0xff]  ;;  %v146_v24 = vld [vmem:[#allocation5 + $0x208] sm:$0xff] }
  0x54   :  { %4504 = vmatpush1.bf16.msra.mxu1 %v4503_v13  ;;  %v4311_v22 = vpack.c.bf16 %v129_v20, %v113_v19  ;;  %v162_v25 = vld [vmem:[#allocation5 + $0x288] sm:$0xff]  ;;  %4310 = vmatprep.subr.bf16.mxu0 %v4309_v17  ;;  %v4507_v26 = vpack.c.bf16 %v131_v23, %v115_v21  ;;  %v148_v28 = vld [vmem:[#allocation5 + $0x218] sm:$0xff]  ;;  %v145_v30 = vld [vmem:[#allocation5 + $0x200] sm:$0xff] }
  0x55   :  { %4506 = vmatprep.subr.bf16.mxu1 %v4505_v18  ;;  %v4313_v27 = vpack.c.bf16 %v162_v25, %v146_v24  ;;  %v164_v29 = vld [vmem:[#allocation5 + $0x298] sm:$0xff]  ;;  %v161_v32 = vld [vmem:[#allocation5 + $0x280] sm:$0xff]  ;;  %v147_v33 = vld [vmem:[#allocation5 + $0x210] sm:$0xff] }
  0x56   :  { %v4509_v31 = vpack.c.bf16 %v164_v29, %v148_v28  ;;  %v163_v34 = vld [vmem:[#allocation5 + $0x290] sm:$0xff]  ;;  %v4315_v35 = vpack.c.bf16 %v161_v32, %v145_v30  ;;  %v178_v36 = vld [vmem:[#allocation5 + $0x308] sm:$0xff]  ;;  %v180_v38 = vld [vmem:[#allocation5 + $0x318] sm:$0xff] }
  0x57   :  { %4312 = vmatpush1.bf16.msra.mxu0 %v4311_v22  ;;  %v194_v37 = vld [vmem:[#allocation5 + $0x388] sm:$0xff]  ;;  %v4511_v39 = vpack.c.bf16 %v163_v34, %v147_v33  ;;  %v196_v41 = vld [vmem:[#allocation5 + $0x398] sm:$0xff]  ;;  %v177_v42 = vld [vmem:[#allocation5 + $0x300] sm:$0xff] }
  0x58   :  { %4508 = vmatpush1.bf16.msra.mxu1 %v4507_v26  ;;  %4314 = vmatprep.subr.bf16.mxu0 %v4313_v27  ;;  %v4317_v40 = vpack.c.bf16 %v194_v37, %v178_v36  ;;  %v193_v43 = vld [vmem:[#allocation5 + $0x380] sm:$0xff]  ;;  %v4513_v44 = vpack.c.bf16 %v196_v41, %v180_v38  ;;  %v179_v45 = vld [vmem:[#allocation5 + $0x310] sm:$0xff]  ;;  %v210_v47 = vld [vmem:[#allocation5 + $0x408] sm:$0xff] }
  0x59   :  { %4510 = vmatprep.subr.bf16.mxu1 %v4509_v31  ;;  %v195_v46 = vld [vmem:[#allocation5 + $0x390] sm:$0xff]  ;;  %v226_v48 = vld [vmem:[#allocation5 + $0x488] sm:$0xff]  ;;  %v212_v49 = vld [vmem:[#allocation5 + $0x418] sm:$0xff]  ;;  %v4319_v51 = vpack.c.bf16 %v193_v43, %v177_v42 }
  0x5a   :  { %v228_v50 = vld [vmem:[#allocation5 + $0x498] sm:$0xff]  ;;  %v4515_v52 = vpack.c.bf16 %v195_v46, %v179_v45  ;;  %v4321_v53 = vpack.c.bf16 %v226_v48, %v210_v47  ;;  %v209_v54 = vld [vmem:[#allocation5 + $0x400] sm:$0xff]  ;;  %v211_v56 = vld [vmem:[#allocation5 + $0x410] sm:$0xff] }
  0x5b   :  { %4316 = vmatpush1.bf16.msra.mxu0 %v4315_v35  ;;  %v225_v55 = vld [vmem:[#allocation5 + $0x480] sm:$0xff]  ;;  %v4517_v57 = vpack.c.bf16 %v228_v50, %v212_v49  ;;  %v227_v58 = vld [vmem:[#allocation5 + $0x490] sm:$0xff]  ;;  %v242_v59 = vld [vmem:[#allocation5 + $0x508] sm:$0xff] }
  0x5c   :  { %4512 = vmatpush1.bf16.msra.mxu1 %v4511_v39  ;;  %4318 = vmatprep.subr.bf16.mxu0 %v4317_v40  ;;  %v258_v60 = vld [vmem:[#allocation5 + $0x588] sm:$0xff]  ;;  %v244_v61 = vld [vmem:[#allocation5 + $0x518] sm:$0xff]  ;;  %v4323_v63 = vpack.c.bf16 %v225_v55, %v209_v54  ;;  %v4519_v0 = vpack.c.bf16 %v227_v58, %v211_v56  ;;  %v241_v2 = vld [vmem:[#allocation5 + $0x500] sm:$0xff]  ;;  %v6063_v58 = vmov 1983009808  }
  0x5d   :  { %4514 = vmatprep.subr.bf16.mxu1 %v4513_v44  ;;  %v260_v62 = vld [vmem:[#allocation5 + $0x598] sm:$0xff]  ;;  %v4325_v1 = vpack.c.bf16 %v258_v60, %v242_v59  ;;  %v257_v3 = vld [vmem:[#allocation5 + $0x580] sm:$0xff]  ;;  %v243_v4 = vld [vmem:[#allocation5 + $0x510] sm:$0xff]  ;;  %v1746_v59 = vunpack.c.l.s4 %v6063_v58 }
  0x5e   :  { %v4521_v5 = vpack.c.bf16 %v260_v62, %v244_v61  ;;  %v259_v6 = vld [vmem:[#allocation5 + $0x590] sm:$0xff]  ;;  %v274_v7 = vld [vmem:[#allocation5 + $0x608] sm:$0xff]  ;;  %v276_v9 = vld [vmem:[#allocation5 + $0x618] sm:$0xff]  ;;  %v4327_v11 = vpack.c.bf16 %v257_v3, %v241_v2 }
  0x5f   :  { %4320 = vmatpush1.bf16.msra.mxu0 %v4319_v51  ;;  %v290_v8 = vld [vmem:[#allocation5 + $0x688] sm:$0xff]  ;;  %v292_v10 = vld [vmem:[#allocation5 + $0x698] sm:$0xff]  ;;  %v4523_v12 = vpack.c.bf16 %v259_v6, %v243_v4  ;;  %v273_v14 = vld [vmem:[#allocation5 + $0x600] sm:$0xff] }
  0x60   :  { %4516 = vmatpush1.bf16.msra.mxu1 %v4515_v52  ;;  %4322 = vmatprep.subr.bf16.mxu0 %v4321_v53  ;;  %v4329_v13 = vpack.c.bf16 %v290_v8, %v274_v7  ;;  %v289_v15 = vld [vmem:[#allocation5 + $0x680] sm:$0xff]  ;;  %v275_v16 = vld [vmem:[#allocation5 + $0x610] sm:$0xff]  ;;  %v4525_v17 = vpack.c.bf16 %v292_v10, %v276_v9  ;;  %v306_v19 = vld [vmem:[#allocation5 + $0x708] sm:$0xff]  ;;  %v1747_v9 = vunpack.c.0.s8 %v1746_v59 }
  0x61   :  { %4518 = vmatprep.subr.bf16.mxu1 %v4517_v57  ;;  %v291_v18 = vld [vmem:[#allocation5 + $0x690] sm:$0xff]  ;;  %v322_v20 = vld [vmem:[#allocation5 + $0x788] sm:$0xff]  ;;  %v308_v21 = vld [vmem:[#allocation5 + $0x718] sm:$0xff]  ;;  %v4331_v23 = vpack.c.bf16 %v289_v15, %v273_v14  ;;  %v1653_v57 = vlaneseq }
  0x62   :  { %v324_v22 = vld [vmem:[#allocation5 + $0x798] sm:$0xff]  ;;  %v4527_v24 = vpack.c.bf16 %v291_v18, %v275_v16  ;;  %v4333_v25 = vpack.c.bf16 %v322_v20, %v306_v19  ;;  %v305_v26 = vld [vmem:[#allocation5 + $0x700] sm:$0xff]  ;;  %v307_v28 = vld [vmem:[#allocation5 + $0x710] sm:$0xff] }
  0x63   :  { %4324 = vmatpush1.bf16.msra.mxu0 %v4323_v63  ;;  %v321_v27 = vld [vmem:[#allocation5 + $0x780] sm:$0xff]  ;;  %v4529_v29 = vpack.c.bf16 %v324_v22, %v308_v21  ;;  %v323_v30 = vld [vmem:[#allocation5 + $0x790] sm:$0xff]  ;;  %v338_v31 = vld [vmem:[#allocation5 + $0x808] sm:$0xff]  ;;  %v6146_v8 = vshrl.u32 %v1653_v57, 7 }
  0x64   :  { %4520 = vmatpush1.bf16.msra.mxu1 %v4519_v0  ;;  %4326 = vmatprep.subr.bf16.mxu0 %v4325_v1  ;;  %v354_v32 = vld [vmem:[#allocation5 + $0x888] sm:$0xff]  ;;  %v340_v33 = vld [vmem:[#allocation5 + $0x818] sm:$0xff]  ;;  %v4335_v35 = vpack.c.bf16 %v321_v27, %v305_v26  ;;  %v4531_v36 = vpack.c.bf16 %v323_v30, %v307_v28  ;;  %v337_v38 = vld [vmem:[#allocation5 + $0x800] sm:$0xff] }
  0x65   :  { %4522 = vmatprep.subr.bf16.mxu1 %v4521_v5  ;;  %v356_v34 = vld [vmem:[#allocation5 + $0x898] sm:$0xff]  ;;  %v4337_v37 = vpack.c.bf16 %v354_v32, %v338_v31  ;;  %v353_v39 = vld [vmem:[#allocation5 + $0x880] sm:$0xff]  ;;  %v339_v40 = vld [vmem:[#allocation5 + $0x810] sm:$0xff] }
  0x66   :  { %v4533_v41 = vpack.c.bf16 %v356_v34, %v340_v33  ;;  %v355_v42 = vld [vmem:[#allocation5 + $0x890] sm:$0xff]  ;;  %v370_v43 = vld [vmem:[#allocation5 + $0x908] sm:$0xff]  ;;  %v372_v45 = vld [vmem:[#allocation5 + $0x918] sm:$0xff]  ;;  %v4339_v47 = vpack.c.bf16 %v353_v39, %v337_v38 }
  0x67   :  { %4328 = vmatpush1.bf16.msra.mxu0 %v4327_v11  ;;  %v386_v44 = vld [vmem:[#allocation5 + $0x988] sm:$0xff]  ;;  %v388_v46 = vld [vmem:[#allocation5 + $0x998] sm:$0xff]  ;;  %v4535_v48 = vpack.c.bf16 %v355_v42, %v339_v40  ;;  %v369_v50 = vld [vmem:[#allocation5 + $0x900] sm:$0xff] }
  0x68   :  { %4524 = vmatpush1.bf16.msra.mxu1 %v4523_v12  ;;  %4330 = vmatprep.subr.bf16.mxu0 %v4329_v13  ;;  %v4341_v49 = vpack.c.bf16 %v386_v44, %v370_v43  ;;  %v385_v51 = vld [vmem:[#allocation5 + $0x980] sm:$0xff]  ;;  %v371_v52 = vld [vmem:[#allocation5 + $0x910] sm:$0xff]  ;;  %v4537_v53 = vpack.c.bf16 %v388_v46, %v372_v45  ;;  %v402_v55 = vld [vmem:[#allocation5 + $0xa08] sm:$0xff] }
  0x69   :  { %4526 = vmatprep.subr.bf16.mxu1 %v4525_v17  ;;  %v387_v54 = vld [vmem:[#allocation5 + $0x990] sm:$0xff]  ;;  %v418_v56 = vld [vmem:[#allocation5 + $0xa88] sm:$0xff]  ;;  %v404_v60 = vld [vmem:[#allocation5 + $0xa18] sm:$0xff]  ;;  %v4343_v62 = vpack.c.bf16 %v385_v51, %v369_v50 }
  0x6a   :  { %v420_v61 = vld [vmem:[#allocation5 + $0xa98] sm:$0xff]  ;;  %v4539_v63 = vpack.c.bf16 %v387_v54, %v371_v52  ;;  %v4345_v0 = vpack.c.bf16 %v418_v56, %v402_v55  ;;  %v401_v1 = vld [vmem:[#allocation5 + $0xa00] sm:$0xff]  ;;  %v403_v3 = vld [vmem:[#allocation5 + $0xa10] sm:$0xff] }
  0x6b   :  { %4332 = vmatpush1.bf16.msra.mxu0 %v4331_v23  ;;  %v417_v2 = vld [vmem:[#allocation5 + $0xa80] sm:$0xff]  ;;  %v4541_v4 = vpack.c.bf16 %v420_v61, %v404_v60  ;;  %v419_v5 = vld [vmem:[#allocation5 + $0xa90] sm:$0xff]  ;;  %v434_v6 = vld [vmem:[#allocation5 + $0xb08] sm:$0xff] }
  0x6c   :  { %4528 = vmatpush1.bf16.msra.mxu1 %v4527_v24  ;;  %4334 = vmatprep.subr.bf16.mxu0 %v4333_v25  ;;  %v450_v7 = vld [vmem:[#allocation5 + $0xb88] sm:$0xff]  ;;  %v436_v10 = vld [vmem:[#allocation5 + $0xb18] sm:$0xff]  ;;  %v4347_v12 = vpack.c.bf16 %v417_v2, %v401_v1  ;;  %v433_v13 = vld [vmem:[#allocation5 + $0xb00] sm:$0xff]  ;;  %v4543_v16 = vpack.c.bf16 %v419_v5, %v403_v3  ;;  %v6149_v24 = vsub.s32 %v1747_v9, %v6146_v8 }
  0x6d   :  { %4530 = vmatprep.subr.bf16.mxu1 %v4529_v29  ;;  %v452_v11 = vld [vmem:[#allocation5 + $0xb98] sm:$0xff]  ;;  %v449_v14 = vld [vmem:[#allocation5 + $0xb80] sm:$0xff]  ;;  %v435_v15 = vld [vmem:[#allocation5 + $0xb10] sm:$0xff]  ;;  %v4349_v17 = vpack.c.bf16 %v450_v7, %v434_v6 }
  0x6e   :  { %v451_v18 = vld [vmem:[#allocation5 + $0xb90] sm:$0xff]  ;;  %v466_v19 = vld [vmem:[#allocation5 + $0xc08] sm:$0xff]  ;;  %v4545_v21 = vpack.c.bf16 %v452_v11, %v436_v10  ;;  %v468_v22 = vld [vmem:[#allocation5 + $0xc18] sm:$0xff]  ;;  %v4351_v25 = vpack.c.bf16 %v449_v14, %v433_v13 }
  0x6f   :  { %4336 = vmatpush1.bf16.msra.mxu0 %v4335_v35  ;;  %v482_v20 = vld [vmem:[#allocation5 + $0xc88] sm:$0xff]  ;;  %v484_v23 = vld [vmem:[#allocation5 + $0xc98] sm:$0xff]  ;;  %v5949_v27 = vld [vmem:[#allocation3 + $0x1c] ss:$14 sps:$4 sm:$0xff]   ;;  %v4547_v28 = vpack.c.bf16 %v451_v18, %v435_v15 }
  0x70   :  { %4532 = vmatpush1.bf16.msra.mxu1 %v4531_v36  ;;  %4338 = vmatprep.subr.bf16.mxu0 %v4337_v37  ;;  %v5947_v26 = vld [vmem:[#allocation3] ss:$14 sps:$4 sm:$0xff]   ;;  %v4353_v29 = vpack.c.bf16 %v482_v20, %v466_v19  ;;  %v465_v30 = vld [vmem:[#allocation5 + $0xc00] sm:$0xff]  ;;  %v4549_v33 = vpack.c.bf16 %v484_v23, %v468_v22  ;;  %v6155_v38 = vrot.slane %v5949_v27, %v6149_v24 }
  0x71   :  { %4534 = vmatprep.subr.bf16.mxu1 %v4533_v41  ;;  %v481_v31 = vld [vmem:[#allocation5 + $0xc80] sm:$0xff]  ;;  %v467_v32 = vld [vmem:[#allocation5 + $0xc10] sm:$0xff]  ;;  %v498_v35 = vld [vmem:[#allocation5 + $0xd08] sm:$0xff]  ;;  %v6152_v37 = vrot.slane %v5947_v26, %v6149_v24 }
  0x72   :  { %v483_v34 = vld [vmem:[#allocation5 + $0xc90] sm:$0xff]  ;;  %v514_v36 = vld [vmem:[#allocation5 + $0xd88] sm:$0xff]  ;;  %v500_v39 = vld [vmem:[#allocation5 + $0xd18] sm:$0xff]  ;;  %v4355_v41 = vpack.c.bf16 %v481_v31, %v465_v30 }
  0x73   :  { %4340 = vmatpush1.bf16.msra.mxu0 %v4339_v47  ;;  %v516_v40 = vld [vmem:[#allocation5 + $0xd98] sm:$0xff]  ;;  %v6159_v42 = vcombine.high %v6152_v37, %v6155_v38  ;;  %v4551_v43 = vpack.c.bf16 %v483_v34, %v467_v32  ;;  %v4357_v44 = vpack.c.bf16 %v514_v36, %v498_v35  ;;  %v497_v45 = vld [vmem:[#allocation5 + $0xd00] sm:$0xff]  ;;  %v499_v47 = vld [vmem:[#allocation5 + $0xd10] sm:$0xff]  ;;  %v6165_v26 = vcombine.low %v6152_v37, %v6155_v38 }
  0x74   :  { %4536 = vmatpush1.bf16.msra.mxu1 %v4535_v48  ;;  %4342 = vmatprep.subr.bf16.mxu0 %v4341_v49  ;;  %v513_v46 = vld [vmem:[#allocation5 + $0xd80] sm:$0xff]  ;;  %v4553_v48 = vpack.c.bf16 %v516_v40, %v500_v39  ;;  %v515_v49 = vld [vmem:[#allocation5 + $0xd90] sm:$0xff]  ;;  %v530_v50 = vld [vmem:[#allocation5 + $0xe08] sm:$0xff] }
  0x75   :  { %4538 = vmatprep.subr.bf16.mxu1 %v4537_v53  ;;  %v546_v51 = vld [vmem:[#allocation5 + $0xe88] sm:$0xff]  ;;  %1885 = vmatprep.mubr.f32.mxu0 %v6159_v42  ;;  %v532_v52 = vld [vmem:[#allocation5 + $0xe18] sm:$0xff]  ;;  %v4359_v54 = vpack.c.bf16 %v513_v46, %v497_v45  ;;  %v4555_v55 = vpack.c.bf16 %v515_v49, %v499_v47  ;;  %v529_v57 = vld [vmem:[#allocation5 + $0xe00] sm:$0xff] }
  0x76   :  { %v548_v53 = vld [vmem:[#allocation5 + $0xe98] sm:$0xff]  ;;  %2169 = vmatprep.mubr.f32.mxu1 %v6159_v42  ;;  %v4361_v56 = vpack.c.bf16 %v546_v51, %v530_v50  ;;  %v545_v58 = vld [vmem:[#allocation5 + $0xe80] sm:$0xff]  ;;  %v531_v59 = vld [vmem:[#allocation5 + $0xe10] sm:$0xff] }
  0x77   :  { %4344 = vmatpush1.bf16.msra.mxu0 %v4343_v62  ;;  %v4557_v60 = vpack.c.bf16 %v548_v53, %v532_v52  ;;  %v547_v61 = vld [vmem:[#allocation5 + $0xe90] sm:$0xff]  ;;  %v562_v62 = vld [vmem:[#allocation5 + $0xf08] sm:$0xff]  ;;  %v580_v1 = vld [vmem:[#allocation5 + $0xf98] sm:$0xff]  ;;  %v4363_v2 = vpack.c.bf16 %v545_v58, %v529_v57 }
  0x78   :  { %4540 = vmatpush1.bf16.msra.mxu1 %v4539_v63  ;;  %4346 = vmatprep.subr.bf16.mxu0 %v4345_v0  ;;  %v578_v63 = vld [vmem:[#allocation5 + $0xf88] sm:$0xff]  ;;  %v564_v0 = vld [vmem:[#allocation5 + $0xf18] sm:$0xff]  ;;  %v4559_v3 = vpack.c.bf16 %v547_v61, %v531_v59  ;;  %v561_v5 = vld [vmem:[#allocation5 + $0xf00] sm:$0xff] }
  0x79   :  { %4542 = vmatprep.subr.bf16.mxu1 %v4541_v4  ;;  %v4365_v4 = vpack.c.bf16 %v578_v63, %v562_v62  ;;  %v577_v6 = vld [vmem:[#allocation5 + $0xf80] sm:$0xff]  ;;  %v563_v7 = vld [vmem:[#allocation5 + $0xf10] sm:$0xff]  ;;  %v4561_v9 = vpack.c.bf16 %v580_v1, %v564_v0  ;;  %v594_v11 = vld [vmem:[#allocation5 + $0x1008] sm:$0xff] }
  0x7a   :  { %v579_v10 = vld [vmem:[#allocation5 + $0xf90] sm:$0xff]  ;;  %v596_v13 = vld [vmem:[#allocation5 + $0x1018] sm:$0xff]  ;;  %v4367_v15 = vpack.c.bf16 %v577_v6, %v561_v5  ;;  %v593_v18 = vld [vmem:[#allocation5 + $0x1000] sm:$0xff] }
  0x7b   :  { %4348 = vmatpush1.bf16.msra.mxu0 %v4347_v12  ;;  %v610_v12 = vld [vmem:[#allocation5 + $0x1088] sm:$0xff]  ;;  %v612_v14 = vld [vmem:[#allocation5 + $0x1098] sm:$0xff]  ;;  %v609_v19 = vld [vmem:[#allocation5 + $0x1080] sm:$0xff] }
  0x7c   :  { %4544 = vmatpush1.bf16.msra.mxu1 %v4543_v16  ;;  %4350 = vmatprep.subr.bf16.mxu0 %v4349_v17  ;;  %v4563_v16 = vpack.c.bf16 %v579_v10, %v563_v7  ;;  %v4369_v17 = vpack.c.bf16 %v610_v12, %v594_v11  ;;  %v595_v20 = vld [vmem:[#allocation5 + $0x1010] sm:$0xff]  ;;  %v626_v23 = vld [vmem:[#allocation5 + $0x1108] sm:$0xff]  ;;  %v628_v27 = vld [vmem:[#allocation5 + $0x1118] sm:$0xff] }
  0x7d   :  { %4546 = vmatprep.subr.bf16.mxu1 %v4545_v21  ;;  %v4565_v21 = vpack.c.bf16 %v612_v14, %v596_v13  ;;  %v611_v22 = vld [vmem:[#allocation5 + $0x1090] sm:$0xff]  ;;  %v625_v32 = vld [vmem:[#allocation5 + $0x1100] sm:$0xff]  ;;  %v658_v39 = vld [vmem:[#allocation5 + $0x1208] sm:$0xff] }
  0x7e   :  { %v4567_v30 = vpack.c.bf16 %v611_v22, %v595_v20  ;;  %v627_v34 = vld [vmem:[#allocation5 + $0x1110] sm:$0xff]  ;;  %v674_v40 = vld [vmem:[#allocation5 + $0x1288] sm:$0xff]  ;;  %v660_v37 = vld [vmem:[#allocation5 + $0x1218] sm:$0xff] }
  0x7f   :  { %4352 = vmatpush1.bf16.msra.mxu0 %v4351_v25  ;;  %v642_v25 = vld [vmem:[#allocation5 + $0x1188] sm:$0xff]  ;;  %v643_v36 = vld [vmem:[#allocation5 + $0x1190] sm:$0xff]  ;;  %v676_v38 = vld [vmem:[#allocation5 + $0x1298] sm:$0xff] }
  0x80   :  { %4548 = vmatpush1.bf16.msra.mxu1 %v4547_v28  ;;  %4354 = vmatprep.subr.bf16.mxu0 %v4353_v29  ;;  %v644_v28 = vld [vmem:[#allocation5 + $0x1198] sm:$0xff]  ;;  %v4371_v29 = vpack.c.bf16 %v609_v19, %v593_v18  ;;  %v4373_v31 = vpack.c.bf16 %v642_v25, %v626_v23  ;;  %v657_v45 = vld [vmem:[#allocation5 + $0x1200] sm:$0xff]  ;;  %v659_v47 = vld [vmem:[#allocation5 + $0x1210] sm:$0xff] }
  0x81   :  { %4550 = vmatprep.subr.bf16.mxu1 %v4549_v33  ;;  %v641_v33 = vld [vmem:[#allocation5 + $0x1180] sm:$0xff]  ;;  %v4569_v35 = vpack.c.bf16 %v644_v28, %v628_v27  ;;  %v675_v49 = vld [vmem:[#allocation5 + $0x1290] sm:$0xff]  ;;  %v690_v50 = vld [vmem:[#allocation5 + $0x1308] sm:$0xff] }
  0x82   :  { %v673_v46 = vld [vmem:[#allocation5 + $0x1280] sm:$0xff]  ;;  %v706_v51 = vld [vmem:[#allocation5 + $0x1388] sm:$0xff]  ;;  %v692_v52 = vld [vmem:[#allocation5 + $0x1318] sm:$0xff] }
  0x83   :  { %4356 = vmatpush1.bf16.msra.mxu0 %v4355_v41  ;;  %v4375_v41 = vpack.c.bf16 %v641_v33, %v625_v32  ;;  %v708_v53 = vld [vmem:[#allocation5 + $0x1398] sm:$0xff]  ;;  %v689_v57 = vld [vmem:[#allocation5 + $0x1300] sm:$0xff]  ;;  %v691_v59 = vld [vmem:[#allocation5 + $0x1310] sm:$0xff] }
  0x84   :  { %4552 = vmatpush1.bf16.msra.mxu1 %v4551_v43  ;;  %4358 = vmatprep.subr.bf16.mxu0 %v4357_v44  ;;  %v4571_v43 = vpack.c.bf16 %v643_v36, %v627_v34  ;;  %v4377_v44 = vpack.c.bf16 %v674_v40, %v658_v39  ;;  %v705_v58 = vld [vmem:[#allocation5 + $0x1380] sm:$0xff]  ;;  %v707_v61 = vld [vmem:[#allocation5 + $0x1390] sm:$0xff]  ;;  %v722_v62 = vld [vmem:[#allocation5 + $0x1408] sm:$0xff] }
  0x85   :  { %4554 = vmatprep.subr.bf16.mxu1 %v4553_v48  ;;  %v4573_v48 = vpack.c.bf16 %v676_v38, %v660_v37  ;;  %v738_v63 = vld [vmem:[#allocation5 + $0x1488] sm:$0xff]  ;;  %v724_v0 = vld [vmem:[#allocation5 + $0x1418] sm:$0xff]  ;;  %v721_v5 = vld [vmem:[#allocation5 + $0x1400] sm:$0xff] }
  0x86   :  { %v740_v1 = vld [vmem:[#allocation5 + $0x1498] sm:$0xff]  ;;  %v737_v6 = vld [vmem:[#allocation5 + $0x1480] sm:$0xff]  ;;  %v723_v7 = vld [vmem:[#allocation5 + $0x1410] sm:$0xff] }
  0x87   :  { %4360 = vmatpush1.bf16.msra.mxu0 %v4359_v54  ;;  %v4379_v54 = vpack.c.bf16 %v673_v46, %v657_v45  ;;  %v739_v10 = vld [vmem:[#allocation5 + $0x1490] sm:$0xff]  ;;  %v754_v11 = vld [vmem:[#allocation5 + $0x1508] sm:$0xff]  ;;  %v756_v13 = vld [vmem:[#allocation5 + $0x1518] sm:$0xff] }
  0x88   :  { %4556 = vmatpush1.bf16.msra.mxu1 %v4555_v55  ;;  %4362 = vmatprep.subr.bf16.mxu0 %v4361_v56  ;;  %v4575_v55 = vpack.c.bf16 %v675_v49, %v659_v47  ;;  %v4381_v56 = vpack.c.bf16 %v706_v51, %v690_v50  ;;  %v770_v12 = vld [vmem:[#allocation5 + $0x1588] sm:$0xff]  ;;  %v772_v14 = vld [vmem:[#allocation5 + $0x1598] sm:$0xff]  ;;  %v753_v18 = vld [vmem:[#allocation5 + $0x1500] sm:$0xff] }
  0x89   :  { %4558 = vmatprep.subr.bf16.mxu1 %v4557_v60  ;;  %v4577_v60 = vpack.c.bf16 %v708_v53, %v692_v52  ;;  %v769_v19 = vld [vmem:[#allocation5 + $0x1580] sm:$0xff]  ;;  %v755_v20 = vld [vmem:[#allocation5 + $0x1510] sm:$0xff]  ;;  %v786_v23 = vld [vmem:[#allocation5 + $0x1608] sm:$0xff] }
  0x8a   :  { %v771_v22 = vld [vmem:[#allocation5 + $0x1590] sm:$0xff]  ;;  %v802_v25 = vld [vmem:[#allocation5 + $0x1688] sm:$0xff]  ;;  %v788_v27 = vld [vmem:[#allocation5 + $0x1618] sm:$0xff] }
  0x8b   :  { %4364 = vmatpush1.bf16.msra.mxu0 %v4363_v2  ;;  %v4383_v2 = vpack.c.bf16 %v705_v58, %v689_v57  ;;  %v804_v28 = vld [vmem:[#allocation5 + $0x1698] sm:$0xff]  ;;  %v4393_v32 = vpack.c.bf16 %v802_v25, %v786_v23  ;;  %v801_v33 = vld [vmem:[#allocation5 + $0x1680] sm:$0xff]  ;;  %v787_v34 = vld [vmem:[#allocation5 + $0x1610] sm:$0xff] }
  0x8c   :  { %4560 = vmatpush1.bf16.msra.mxu1 %v4559_v3  ;;  %4366 = vmatprep.subr.bf16.mxu0 %v4365_v4  ;;  %v4579_v3 = vpack.c.bf16 %v707_v61, %v691_v59  ;;  %v4385_v4 = vpack.c.bf16 %v738_v63, %v722_v62  ;;  %v4589_v36 = vpack.c.bf16 %v804_v28, %v788_v27  ;;  %v818_v39 = vld [vmem:[#allocation5 + $0x1708] sm:$0xff]  ;;  %v820_v37 = vld [vmem:[#allocation5 + $0x1718] sm:$0xff]  ;;  %v817_v47 = vld [vmem:[#allocation5 + $0x1700] sm:$0xff] }
  0x8d   :  { %4562 = vmatprep.subr.bf16.mxu1 %v4561_v9  ;;  %v4581_v9 = vpack.c.bf16 %v740_v1, %v724_v0  ;;  %v834_v40 = vld [vmem:[#allocation5 + $0x1788] sm:$0xff]  ;;  %v836_v38 = vld [vmem:[#allocation5 + $0x1798] sm:$0xff]  ;;  %v819_v49 = vld [vmem:[#allocation5 + $0x1710] sm:$0xff] }
  0x8e   :  { %v4397_v46 = vpack.c.bf16 %v834_v40, %v818_v39  ;;  %v4593_v52 = vpack.c.bf16 %v836_v38, %v820_v37  ;;  %v835_v53 = vld [vmem:[#allocation5 + $0x1790] sm:$0xff]  ;;  %v868_v57 = vld [vmem:[#allocation5 + $0x1898] sm:$0xff]  ;;  %v849_v62 = vld [vmem:[#allocation5 + $0x1800] sm:$0xff] }
  0x8f   :  { %4368 = vmatpush1.bf16.msra.mxu0 %v4367_v15  ;;  %v4387_v15 = vpack.c.bf16 %v737_v6, %v721_v5  ;;  %v865_v63 = vld [vmem:[#allocation5 + $0x1880] sm:$0xff]  ;;  %v851_v0 = vld [vmem:[#allocation5 + $0x1810] sm:$0xff]  ;;  %v884_v5 = vld [vmem:[#allocation5 + $0x1918] sm:$0xff] }
  0x90   :  { %4564 = vmatpush1.bf16.msra.mxu1 %v4563_v16  ;;  %4370 = vmatprep.subr.bf16.mxu0 %v4369_v17  ;;  %v4583_v16 = vpack.c.bf16 %v739_v10, %v723_v7  ;;  %v4389_v17 = vpack.c.bf16 %v770_v12, %v754_v11  ;;  %v900_v6 = vld [vmem:[#allocation5 + $0x1998] sm:$0xff]  ;;  %v4403_v7 = vpack.c.bf16 %v865_v63, %v849_v62  ;;  %v881_v11 = vld [vmem:[#allocation5 + $0x1900] sm:$0xff]  ;;  %v915_v27 = vld [vmem:[#allocation5 + $0x1a10] sm:$0xff] }
  0x91   :  { %4566 = vmatprep.subr.bf16.mxu1 %v4565_v21  ;;  %v4585_v21 = vpack.c.bf16 %v772_v14, %v756_v13  ;;  %v897_v12 = vld [vmem:[#allocation5 + $0x1980] sm:$0xff]  ;;  %v883_v13 = vld [vmem:[#allocation5 + $0x1910] sm:$0xff]  ;;  %v4601_v14 = vpack.c.bf16 %v900_v6, %v884_v5  ;;  %v1042_v6 = vld [vmem:[#allocation5 + $0x1e08] sm:$0xff] }
  0x92   :  { %1886 = vmatmul.mubr.f32.vlgmr.msra.gmra.mrb[0].mxu0 %v6165_v26  ;;  %v913_v23 = vld [vmem:[#allocation5 + $0x1a00] sm:$0xff]  ;;  %v947_v37 = vld [vmem:[#allocation5 + $0x1b10] sm:$0xff] }
  0x93   :  { %4372 = vmatpush1.bf16.msra.mxu0 %v4371_v29  ;;  %2170 = vmatmul.mubr.f32.vlgmr.msra.gmra.mrb[0].mxu1 %v6165_v26  ;;  %v4391_v29 = vpack.c.bf16 %v769_v19, %v753_v18  ;;  %v916_v18 = vld [vmem:[#allocation5 + $0x1a18] sm:$0xff]  ;;  %v929_v25 = vld [vmem:[#allocation5 + $0x1a80] sm:$0xff]  ;;  %v1027_v5 = vld [vmem:[#allocation5 + $0x1d90] sm:$0xff] }
  0x94   :  { %4568 = vmatpush1.bf16.msra.mxu1 %v4567_v30  ;;  %4374 = vmatprep.subr.bf16.mxu0 %v4373_v31  ;;  %v785_v30 = vld [vmem:[#allocation5 + $0x1600] sm:$0xff]  ;;  %v4587_v31 = vpack.c.bf16 %v771_v22, %v755_v20  ;;  %v932_v19 = vld [vmem:[#allocation5 + $0x1a98] sm:$0xff]  ;;  %v4407_v20 = vpack.c.bf16 %v897_v12, %v881_v11 }
  0x95   :  { %4570 = vmatprep.subr.bf16.mxu1 %v4569_v35  ;;  %v803_v35 = vld [vmem:[#allocation5 + $0x1690] sm:$0xff]  ;;  %v4605_v28 = vpack.c.bf16 %v932_v19, %v916_v18  ;;  %v945_v39 = vld [vmem:[#allocation5 + $0x1b00] sm:$0xff]  ;;  %v1074_v19 = vld [vmem:[#allocation5 + $0x1f08] sm:$0xff] }
  0x96   :  { %v4591_v45 = vpack.c.bf16 %v803_v35, %v787_v34  ;;  %v4411_v34 = vpack.c.bf16 %v929_v25, %v913_v23  ;;  %v961_v40 = vld [vmem:[#allocation5 + $0x1b80] sm:$0xff]  ;;  %v1059_v18 = vld [vmem:[#allocation5 + $0x1e90] sm:$0xff] }
  0x97   :  { %4376 = vmatpush1.bf16.msra.mxu0 %v4375_v41  ;;  %v5951_v41 = vld [vmem:[#allocation3 + $0x4] ss:$14 sps:$4 sm:$0xff]  }
  0x98   :  { %4572 = vmatpush1.bf16.msra.mxu1 %v4571_v43  ;;  %4378 = vmatprep.subr.bf16.mxu0 %v4377_v44  ;;  %v5952_v43 = vld [vmem:[#allocation3 + $0x20] ss:$14 sps:$4 sm:$0xff]   ;;  %v4395_v44 = vpack.c.bf16 %v801_v33, %v785_v30  ;;  %v6170_v50 = vrot.slane %v5951_v41, %v6149_v24 }
  0x99   :  { %4574 = vmatprep.subr.bf16.mxu1 %v4573_v48  ;;  %v833_v48 = vld [vmem:[#allocation5 + $0x1780] sm:$0xff]  ;;  %v6173_v51 = vrot.slane %v5952_v43, %v6149_v24  ;;  %v946_v30 = vld [vmem:[#allocation5 + $0x1b08] sm:$0xff]  ;;  %v964_v33 = vld [vmem:[#allocation5 + $0x1b98] sm:$0xff] }
  0x9a   :  { %v4399_v59 = vpack.c.bf16 %v833_v48, %v817_v47  ;;  %v963_v41 = vld [vmem:[#allocation5 + $0x1b90] sm:$0xff]  ;;  %v978_v43 = vld [vmem:[#allocation5 + $0x1c08] sm:$0xff]  ;;  %v4415_v47 = vpack.c.bf16 %v961_v40, %v945_v39 }
  0x9b   :  { %4380 = vmatpush1.bf16.msra.mxu0 %v4379_v54  ;;  %v850_v54 = vld [vmem:[#allocation5 + $0x1808] sm:$0xff]  ;;  %v6177_v58 = vcombine.high %v6170_v50, %v6173_v51  ;;  %v4611_v48 = vpack.c.bf16 %v963_v41, %v947_v37  ;;  %v1121_v41 = vld [vmem:[#allocation5 + $0x2080] sm:$0xff] }
  0x9c   :  { %4576 = vmatpush1.bf16.msra.mxu1 %v4575_v55  ;;  %4382 = vmatprep.subr.bf16.mxu0 %v4381_v56  ;;  %v866_v55 = vld [vmem:[#allocation5 + $0x1888] sm:$0xff]  ;;  %v852_v56 = vld [vmem:[#allocation5 + $0x1818] sm:$0xff] }
  0x9d   :  { %4578 = vmatprep.subr.bf16.mxu1 %v4577_v60  ;;  %v4595_v60 = vpack.c.bf16 %v835_v53, %v819_v49  ;;  %v4401_v61 = vpack.c.bf16 %v866_v55, %v850_v54  ;;  %v4597_v1 = vpack.c.bf16 %v868_v57, %v852_v56  ;;  %1956 = vmatprep.mubr.f32.mxu0 %v6177_v58  ;;  %v993_v53 = vld [vmem:[#allocation5 + $0x1c80] sm:$0xff]  ;;  %v979_v54 = vld [vmem:[#allocation5 + $0x1c10] sm:$0xff]  ;;  %v1010_v57 = vld [vmem:[#allocation5 + $0x1d08] sm:$0xff] }
  0x9e   :  { %2240 = vmatprep.mubr.f32.mxu1 %v6177_v58  ;;  %v995_v56 = vld [vmem:[#allocation5 + $0x1c90] sm:$0xff] }
  0x9f   :  { %4384 = vmatpush1.bf16.msra.mxu0 %v4383_v2  ;;  %v867_v2 = vld [vmem:[#allocation5 + $0x1890] sm:$0xff]  ;;  %v4615_v63 = vpack.c.bf16 %v995_v56, %v979_v54  ;;  %v1137_v54 = vld [vmem:[#allocation5 + $0x2100] sm:$0xff] }
  0xa0   :  { %4580 = vmatpush1.bf16.msra.mxu1 %v4579_v3  ;;  %4386 = vmatprep.subr.bf16.mxu0 %v4385_v4  ;;  %v882_v3 = vld [vmem:[#allocation5 + $0x1908] sm:$0xff]  ;;  %v1139_v56 = vld [vmem:[#allocation5 + $0x2110] sm:$0xff] }
  0xa1   :  { %4582 = vmatprep.subr.bf16.mxu1 %v4581_v9  ;;  %v898_v4 = vld [vmem:[#allocation5 + $0x1988] sm:$0xff]  ;;  %v4599_v9 = vpack.c.bf16 %v867_v2, %v851_v0  ;;  %v1025_v2 = vld [vmem:[#allocation5 + $0x1d80] sm:$0xff] }
  0xa2   :  { %v4405_v10 = vpack.c.bf16 %v898_v4, %v882_v3  ;;  %v1011_v3 = vld [vmem:[#allocation5 + $0x1d10] sm:$0xff] }
  0xa3   :  { %4388 = vmatpush1.bf16.msra.mxu0 %v4387_v15  ;;  %v899_v15 = vld [vmem:[#allocation5 + $0x1990] sm:$0xff]  ;;  %v4619_v12 = vpack.c.bf16 %v1027_v5, %v1011_v3  ;;  %v1169_v5 = vld [vmem:[#allocation5 + $0x2200] sm:$0xff] }
  0xa4   :  { %4584 = vmatpush1.bf16.msra.mxu1 %v4583_v16  ;;  %4390 = vmatprep.subr.bf16.mxu0 %v4389_v17  ;;  %v914_v16 = vld [vmem:[#allocation5 + $0x1a08] sm:$0xff] }
  0xa5   :  { %4586 = vmatprep.subr.bf16.mxu1 %v4585_v21  ;;  %v930_v17 = vld [vmem:[#allocation5 + $0x1a88] sm:$0xff]  ;;  %v4603_v21 = vpack.c.bf16 %v899_v15, %v883_v13  ;;  %v1057_v15 = vld [vmem:[#allocation5 + $0x1e80] sm:$0xff] }
  0xa6   :  { %v4409_v22 = vpack.c.bf16 %v930_v17, %v914_v16  ;;  %v1043_v16 = vld [vmem:[#allocation5 + $0x1e10] sm:$0xff] }
  0xa7   :  { %4392 = vmatpush1.bf16.msra.mxu0 %v4391_v29  ;;  %v931_v29 = vld [vmem:[#allocation5 + $0x1a90] sm:$0xff]  ;;  %v4623_v25 = vpack.c.bf16 %v1059_v18, %v1043_v16  ;;  %v1220_v16 = vld [vmem:[#allocation5 + $0x2398] sm:$0xff] }
  0xa8   :  { %4588 = vmatpush1.bf16.msra.mxu1 %v4587_v31  ;;  %4394 = vmatprep.subr.bf16.mxu0 %v4393_v32  ;;  %v962_v31 = vld [vmem:[#allocation5 + $0x1b88] sm:$0xff]  ;;  %v948_v32 = vld [vmem:[#allocation5 + $0x1b18] sm:$0xff]  ;;  %v4607_v35 = vpack.c.bf16 %v931_v29, %v915_v27  ;;  %v1089_v29 = vld [vmem:[#allocation5 + $0x1f80] sm:$0xff] }
  0xa9   :  { %4590 = vmatprep.subr.bf16.mxu1 %v4589_v36  ;;  %v4413_v36 = vpack.c.bf16 %v962_v31, %v946_v30  ;;  %v4609_v38 = vpack.c.bf16 %v964_v33, %v948_v32  ;;  %v1075_v30 = vld [vmem:[#allocation5 + $0x1f10] sm:$0xff]  ;;  %v1106_v33 = vld [vmem:[#allocation5 + $0x2008] sm:$0xff] }
  0xaa   :  { %v1091_v32 = vld [vmem:[#allocation5 + $0x1f90] sm:$0xff] }
  0xab   :  { %4396 = vmatpush1.bf16.msra.mxu0 %v4395_v44  ;;  %v994_v44 = vld [vmem:[#allocation5 + $0x1c88] sm:$0xff]  ;;  %v4627_v40 = vpack.c.bf16 %v1091_v32, %v1075_v30  ;;  %v1236_v30 = vld [vmem:[#allocation5 + $0x2418] sm:$0xff] }
  0xac   :  { %4592 = vmatpush1.bf16.msra.mxu1 %v4591_v45  ;;  %4398 = vmatprep.subr.bf16.mxu0 %v4397_v46  ;;  %v980_v45 = vld [vmem:[#allocation5 + $0x1c18] sm:$0xff]  ;;  %v4417_v49 = vpack.c.bf16 %v994_v44, %v978_v43  ;;  %v1107_v43 = vld [vmem:[#allocation5 + $0x2010] sm:$0xff] }
  0xad   :  { %4594 = vmatprep.subr.bf16.mxu1 %v4593_v52  ;;  %v996_v46 = vld [vmem:[#allocation5 + $0x1c98] sm:$0xff]  ;;  %v977_v52 = vld [vmem:[#allocation5 + $0x1c00] sm:$0xff] }
  0xae   :  { %v4613_v55 = vpack.c.bf16 %v996_v46, %v980_v45  ;;  %v4419_v62 = vpack.c.bf16 %v993_v53, %v977_v52  ;;  %v1123_v45 = vld [vmem:[#allocation5 + $0x2090] sm:$0xff]  ;;  %v1138_v46 = vld [vmem:[#allocation5 + $0x2108] sm:$0xff]  ;;  %v1156_v52 = vld [vmem:[#allocation5 + $0x2198] sm:$0xff] }
  0xaf   :  { %4400 = vmatpush1.bf16.msra.mxu0 %v4399_v59  ;;  %v1026_v59 = vld [vmem:[#allocation5 + $0x1d88] sm:$0xff] }
  0xb0   :  { %4596 = vmatpush1.bf16.msra.mxu1 %v4595_v60  ;;  %4402 = vmatprep.subr.bf16.mxu0 %v4401_v61  ;;  %v1012_v60 = vld [vmem:[#allocation5 + $0x1d18] sm:$0xff]  ;;  %v4421_v0 = vpack.c.bf16 %v1026_v59, %v1010_v57  ;;  %v4631_v57 = vpack.c.bf16 %v1123_v45, %v1107_v43 }
  0xb1   :  { %4598 = vmatprep.subr.bf16.mxu1 %v4597_v1  ;;  %v1028_v61 = vld [vmem:[#allocation5 + $0x1d98] sm:$0xff]  ;;  %v1009_v1 = vld [vmem:[#allocation5 + $0x1d00] sm:$0xff] }
  0xb2   :  { %v4617_v4 = vpack.c.bf16 %v1028_v61, %v1012_v60  ;;  %v4423_v11 = vpack.c.bf16 %v1025_v2, %v1009_v1  ;;  %v1155_v60 = vld [vmem:[#allocation5 + $0x2190] sm:$0xff]  ;;  %v1170_v61 = vld [vmem:[#allocation5 + $0x2208] sm:$0xff]  ;;  %v1188_v1 = vld [vmem:[#allocation5 + $0x2298] sm:$0xff] }
  0xb3   :  { %4404 = vmatpush1.bf16.msra.mxu0 %v4403_v7  ;;  %v1058_v7 = vld [vmem:[#allocation5 + $0x1e88] sm:$0xff]  ;;  %v4635_v3 = vpack.c.bf16 %v1155_v60, %v1139_v56  ;;  %v1268_v43 = vld [vmem:[#allocation5 + $0x2518] sm:$0xff] }
  0xb4   :  { %4600 = vmatpush1.bf16.msra.mxu1 %v4599_v9  ;;  %4406 = vmatprep.subr.bf16.mxu0 %v4405_v10  ;;  %v1044_v9 = vld [vmem:[#allocation5 + $0x1e18] sm:$0xff]  ;;  %v4425_v13 = vpack.c.bf16 %v1058_v7, %v1042_v6  ;;  %v1185_v6 = vld [vmem:[#allocation5 + $0x2280] sm:$0xff]  ;;  %v1171_v7 = vld [vmem:[#allocation5 + $0x2210] sm:$0xff] }
  0xb5   :  { %4602 = vmatprep.subr.bf16.mxu1 %v4601_v14  ;;  %v1060_v10 = vld [vmem:[#allocation5 + $0x1e98] sm:$0xff]  ;;  %v1041_v14 = vld [vmem:[#allocation5 + $0x1e00] sm:$0xff]  ;;  %v1298_v56 = vld [vmem:[#allocation5 + $0x2608] sm:$0xff] }
  0xb6   :  { %v4621_v17 = vpack.c.bf16 %v1060_v10, %v1044_v9  ;;  %v4427_v23 = vpack.c.bf16 %v1057_v15, %v1041_v14  ;;  %v5955_v2 = vld [vmem:[#allocation3 + $0x24] ss:$14 sps:$4 sm:$0xff]   ;;  %v1187_v10 = vld [vmem:[#allocation5 + $0x2290] sm:$0xff] }
  0xb7   :  { %4408 = vmatpush1.bf16.msra.mxu0 %v4407_v20  ;;  %v1090_v20 = vld [vmem:[#allocation5 + $0x1f88] sm:$0xff]  ;;  %v6191_v14 = vrot.slane %v5955_v2, %v6149_v24  ;;  %v1204_v15 = vld [vmem:[#allocation5 + $0x2318] sm:$0xff]  ;;  %v1315_v2 = vld [vmem:[#allocation5 + $0x2690] sm:$0xff] }
  0xb8   :  { %4604 = vmatpush1.bf16.msra.mxu1 %v4603_v21  ;;  %4410 = vmatprep.subr.bf16.mxu0 %v4409_v22  ;;  %v1076_v21 = vld [vmem:[#allocation5 + $0x1f18] sm:$0xff]  ;;  %v4429_v27 = vpack.c.bf16 %v1090_v20, %v1074_v19  ;;  %v4639_v19 = vpack.c.bf16 %v1187_v10, %v1171_v7 }
  0xb9   :  { %4606 = vmatprep.subr.bf16.mxu1 %v4605_v28  ;;  %v1092_v22 = vld [vmem:[#allocation5 + $0x1f98] sm:$0xff]  ;;  %v1073_v28 = vld [vmem:[#allocation5 + $0x1f00] sm:$0xff] }
  0xba   :  { %v4625_v31 = vpack.c.bf16 %v1092_v22, %v1076_v21  ;;  %v4431_v39 = vpack.c.bf16 %v1089_v29, %v1073_v28  ;;  %v1201_v21 = vld [vmem:[#allocation5 + $0x2300] sm:$0xff]  ;;  %v1234_v28 = vld [vmem:[#allocation5 + $0x2408] sm:$0xff]  ;;  %v1316_v60 = vld [vmem:[#allocation5 + $0x2698] sm:$0xff] }
  0xbb   :  { %4412 = vmatpush1.bf16.msra.mxu0 %v4411_v34  ;;  %v1122_v34 = vld [vmem:[#allocation5 + $0x2088] sm:$0xff]  ;;  %v1217_v22 = vld [vmem:[#allocation5 + $0x2380] sm:$0xff] }
  0xbc   :  { %4608 = vmatpush1.bf16.msra.mxu1 %v4607_v35  ;;  %4414 = vmatprep.subr.bf16.mxu0 %v4413_v36  ;;  %v1108_v35 = vld [vmem:[#allocation5 + $0x2018] sm:$0xff]  ;;  %v4433_v37 = vpack.c.bf16 %v1122_v34, %v1106_v33  ;;  %v1250_v29 = vld [vmem:[#allocation5 + $0x2488] sm:$0xff]  ;;  %v4447_v32 = vpack.c.bf16 %v1217_v22, %v1201_v21 }
  0xbd   :  { %4610 = vmatprep.subr.bf16.mxu1 %v4609_v38  ;;  %v1124_v36 = vld [vmem:[#allocation5 + $0x2098] sm:$0xff]  ;;  %v1105_v38 = vld [vmem:[#allocation5 + $0x2000] sm:$0xff]  ;;  %v4449_v34 = vpack.c.bf16 %v1250_v29, %v1234_v28 }
  0xbe   :  { %v4629_v44 = vpack.c.bf16 %v1124_v36, %v1108_v35  ;;  %v4435_v53 = vpack.c.bf16 %v1121_v41, %v1105_v38  ;;  %v1233_v35 = vld [vmem:[#allocation5 + $0x2400] sm:$0xff]  ;;  %v1266_v38 = vld [vmem:[#allocation5 + $0x2508] sm:$0xff]  ;;  %v1364_v21 = vld [vmem:[#allocation5 + $0x2818] sm:$0xff] }
  0xbf   :  { %4416 = vmatpush1.bf16.msra.mxu0 %v4415_v47  ;;  %v1154_v47 = vld [vmem:[#allocation5 + $0x2188] sm:$0xff]  ;;  %v1249_v36 = vld [vmem:[#allocation5 + $0x2480] sm:$0xff]  ;;  %v1380_v22 = vld [vmem:[#allocation5 + $0x2898] sm:$0xff] }
  0xc0   :  { %4612 = vmatpush1.bf16.msra.mxu1 %v4611_v48  ;;  %4418 = vmatprep.subr.bf16.mxu0 %v4417_v49  ;;  %v6183_v48 = vcombine.low %v6170_v50, %v6173_v51  ;;  %v1140_v49 = vld [vmem:[#allocation5 + $0x2118] sm:$0xff]  ;;  %v4437_v59 = vpack.c.bf16 %v1154_v47, %v1138_v46  ;;  %v1282_v41 = vld [vmem:[#allocation5 + $0x2588] sm:$0xff]  ;;  %v4451_v45 = vpack.c.bf16 %v1249_v36, %v1233_v35  ;;  %v1361_v28 = vld [vmem:[#allocation5 + $0x2800] sm:$0xff] }
  0xc1   :  { %4614 = vmatprep.subr.bf16.mxu1 %v4613_v55  ;;  %v1153_v55 = vld [vmem:[#allocation5 + $0x2180] sm:$0xff]  ;;  %v4453_v47 = vpack.c.bf16 %v1282_v41, %v1266_v38  ;;  %v1396_v35 = vld [vmem:[#allocation5 + $0x2918] sm:$0xff] }
  0xc2   :  { %v4439_v50 = vpack.c.bf16 %v1153_v55, %v1137_v54  ;;  %v5953_v51 = vld [vmem:[#allocation3 + $0x8] ss:$14 sps:$4 sm:$0xff]  }
  0xc3   :  { %4420 = vmatpush1.bf16.msra.mxu0 %v4419_v62  ;;  %v1186_v62 = vld [vmem:[#allocation5 + $0x2288] sm:$0xff]  ;;  %v1283_v55 = vld [vmem:[#allocation5 + $0x2590] sm:$0xff]  ;;  %v1377_v29 = vld [vmem:[#allocation5 + $0x2880] sm:$0xff] }
  0xc4   :  { %4616 = vmatpush1.bf16.msra.mxu1 %v4615_v63  ;;  %4422 = vmatprep.subr.bf16.mxu0 %v4421_v0  ;;  %v4633_v63 = vpack.c.bf16 %v1156_v52, %v1140_v49  ;;  %v1172_v0 = vld [vmem:[#allocation5 + $0x2218] sm:$0xff]  ;;  %v1265_v49 = vld [vmem:[#allocation5 + $0x2500] sm:$0xff] }
  0xc5   :  { %4618 = vmatprep.subr.bf16.mxu1 %v4617_v4  ;;  %v4441_v4 = vpack.c.bf16 %v1186_v62, %v1170_v61  ;;  %v4637_v9 = vpack.c.bf16 %v1188_v1, %v1172_v0  ;;  %v1281_v52 = vld [vmem:[#allocation5 + $0x2580] sm:$0xff]  ;;  %v1412_v36 = vld [vmem:[#allocation5 + $0x2998] sm:$0xff] }
  0xc6   :  { %v4455_v61 = vpack.c.bf16 %v1281_v52, %v1265_v49  ;;  %v1297_v0 = vld [vmem:[#allocation5 + $0x2600] sm:$0xff]  ;;  %v1428_v49 = vld [vmem:[#allocation5 + $0x2a18] sm:$0xff] }
  0xc7   :  { %4424 = vmatpush1.bf16.msra.mxu0 %v4423_v11  ;;  %v1202_v11 = vld [vmem:[#allocation5 + $0x2308] sm:$0xff]  ;;  %v1313_v1 = vld [vmem:[#allocation5 + $0x2680] sm:$0xff]  ;;  %v1444_v52 = vld [vmem:[#allocation5 + $0x2a98] sm:$0xff] }
  0xc8   :  { %4620 = vmatpush1.bf16.msra.mxu1 %v4619_v12  ;;  %4426 = vmatprep.subr.bf16.mxu0 %v4425_v13  ;;  %v1218_v12 = vld [vmem:[#allocation5 + $0x2388] sm:$0xff]  ;;  %v6188_v13 = vrot.slane %v5953_v51, %v6149_v24  ;;  %v4459_v7 = vpack.c.bf16 %v1313_v1, %v1297_v0  ;;  %v1393_v38 = vld [vmem:[#allocation5 + $0x2900] sm:$0xff]  ;;  %v1460_v0 = vld [vmem:[#allocation5 + $0x2b18] sm:$0xff] }
  0xc9   :  { %4622 = vmatprep.subr.bf16.mxu1 %v4621_v17  ;;  %v4443_v17 = vpack.c.bf16 %v1185_v6, %v1169_v5  ;;  %v4445_v20 = vpack.c.bf16 %v1218_v12, %v1202_v11  ;;  %v1332_v5 = vld [vmem:[#allocation5 + $0x2718] sm:$0xff]  ;;  %v1329_v11 = vld [vmem:[#allocation5 + $0x2700] sm:$0xff] }
  0xca   :  { %v6195_v18 = vcombine.high %v6188_v13, %v6191_v14  ;;  %v1348_v6 = vld [vmem:[#allocation5 + $0x2798] sm:$0xff]  ;;  %v1345_v12 = vld [vmem:[#allocation5 + $0x2780] sm:$0xff] }
  0xcb   :  { %4428 = vmatpush1.bf16.msra.mxu0 %v4427_v23  ;;  %v1203_v23 = vld [vmem:[#allocation5 + $0x2310] sm:$0xff]  ;;  %v1409_v41 = vld [vmem:[#allocation5 + $0x2980] sm:$0xff]  ;;  %v1476_v1 = vld [vmem:[#allocation5 + $0x2b98] sm:$0xff] }
  0xcc   :  { %4624 = vmatpush1.bf16.msra.mxu1 %v4623_v25  ;;  %4430 = vmatprep.subr.bf16.mxu0 %v4429_v27  ;;  %v4641_v25 = vpack.c.bf16 %v1220_v16, %v1204_v15  ;;  %v1219_v27 = vld [vmem:[#allocation5 + $0x2390] sm:$0xff]  ;;  %v4657_v16 = vpack.c.bf16 %v1348_v6, %v1332_v5  ;;  %v4673_v6 = vpack.c.bf16 %v1476_v1, %v1460_v0 }
  0xcd   :  { %4626 = vmatprep.subr.bf16.mxu1 %v4625_v31  ;;  %v1252_v31 = vld [vmem:[#allocation5 + $0x2498] sm:$0xff]  ;;  %v4643_v33 = vpack.c.bf16 %v1219_v27, %v1203_v23  ;;  %v1331_v15 = vld [vmem:[#allocation5 + $0x2710] sm:$0xff]  ;;  %v4463_v23 = vpack.c.bf16 %v1345_v12, %v1329_v11 }
  0xce   :  { %v1459_v5 = vld [vmem:[#allocation5 + $0x2b10] sm:$0xff]  ;;  %v1492_v11 = vld [vmem:[#allocation5 + $0x2c18] sm:$0xff] }
  0xcf   :  { %4432 = vmatpush1.bf16.msra.mxu0 %v4431_v39  ;;  %v1235_v39 = vld [vmem:[#allocation5 + $0x2410] sm:$0xff]  ;;  %v1508_v12 = vld [vmem:[#allocation5 + $0x2c98] sm:$0xff] }
  0xd0   :  { %4628 = vmatpush1.bf16.msra.mxu1 %v4627_v40  ;;  %4434 = vmatprep.subr.bf16.mxu0 %v4433_v37  ;;  %v4645_v40 = vpack.c.bf16 %v1252_v31, %v1236_v30  ;;  %v1251_v37 = vld [vmem:[#allocation5 + $0x2490] sm:$0xff]  ;;  %v4661_v31 = vpack.c.bf16 %v1380_v22, %v1364_v21  ;;  %v4677_v22 = vpack.c.bf16 %v1508_v12, %v1492_v11 }
  0xd1   :  { %4630 = vmatprep.subr.bf16.mxu1 %v4629_v44  ;;  %v1284_v44 = vld [vmem:[#allocation5 + $0x2598] sm:$0xff]  ;;  %v4647_v46 = vpack.c.bf16 %v1251_v37, %v1235_v39  ;;  %v1363_v30 = vld [vmem:[#allocation5 + $0x2810] sm:$0xff]  ;;  %v4467_v39 = vpack.c.bf16 %v1377_v29, %v1361_v28 }
  0xd2   :  { %1957 = vmatmul.mubr.f32.vlgmr.msra.gmra.mrb[0].mxu0 %v6183_v48  ;;  %v4649_v54 = vpack.c.bf16 %v1284_v44, %v1268_v43  ;;  %v1395_v43 = vld [vmem:[#allocation5 + $0x2910] sm:$0xff]  ;;  %v4665_v44 = vpack.c.bf16 %v1412_v36, %v1396_v35  ;;  %v1524_v28 = vld [vmem:[#allocation5 + $0x2d18] sm:$0xff] }
  0xd3   :  { %4436 = vmatpush1.bf16.msra.mxu0 %v4435_v53  ;;  %2241 = vmatmul.mubr.f32.vlgmr.msra.gmra.mrb[0].mxu1 %v6183_v48  ;;  %v1267_v53 = vld [vmem:[#allocation5 + $0x2510] sm:$0xff]  ;;  %v1540_v29 = vld [vmem:[#allocation5 + $0x2d98] sm:$0xff] }
  0xd4   :  { %4632 = vmatpush1.bf16.msra.mxu1 %v4631_v57  ;;  %4438 = vmatprep.subr.bf16.mxu0 %v4437_v59  ;;  %v1314_v57 = vld [vmem:[#allocation5 + $0x2688] sm:$0xff]  ;;  %v1300_v59 = vld [vmem:[#allocation5 + $0x2618] sm:$0xff]  ;;  %v4651_v62 = vpack.c.bf16 %v1283_v55, %v1267_v53  ;;  %v4471_v53 = vpack.c.bf16 %v1409_v41, %v1393_v38  ;;  %v1491_v21 = vld [vmem:[#allocation5 + $0x2c10] sm:$0xff]  ;;  %v4681_v36 = vpack.c.bf16 %v1540_v29, %v1524_v28 }
  0xd5   :  { %4634 = vmatprep.subr.bf16.mxu1 %v4633_v63  ;;  %2027 = vmatprep.mubr.f32.mxu0 %v6195_v18  ;;  %v4457_v63 = vpack.c.bf16 %v1314_v57, %v1298_v56  ;;  %v4653_v51 = vpack.c.bf16 %v1316_v60, %v1300_v59  ;;  %v1425_v56 = vld [vmem:[#allocation5 + $0x2a00] sm:$0xff]  ;;  %v1427_v59 = vld [vmem:[#allocation5 + $0x2a10] sm:$0xff]  ;;  %v4669_v60 = vpack.c.bf16 %v1444_v52, %v1428_v49  ;;  %v1556_v38 = vld [vmem:[#allocation5 + $0x2e18] sm:$0xff] }
  0xd6   :  { %2311 = vmatprep.mubr.f32.mxu1 %v6195_v18  ;;  %v1441_v57 = vld [vmem:[#allocation5 + $0x2a80] sm:$0xff]  ;;  %v1523_v35 = vld [vmem:[#allocation5 + $0x2d10] sm:$0xff]  ;;  %v1572_v41 = vld [vmem:[#allocation5 + $0x2e98] sm:$0xff] }
  0xd7   :  { %4440 = vmatpush1.bf16.msra.mxu0 %v4439_v50  ;;  %v1299_v50 = vld [vmem:[#allocation5 + $0x2610] sm:$0xff]  ;;  %v4685_v52 = vpack.c.bf16 %v1572_v41, %v1556_v38 }
  0xd8   :  { %4636 = vmatpush1.bf16.msra.mxu1 %v4635_v3  ;;  %4442 = vmatprep.subr.bf16.mxu0 %v4441_v4  ;;  %v1330_v3 = vld [vmem:[#allocation5 + $0x2708] sm:$0xff]  ;;  %v1555_v49 = vld [vmem:[#allocation5 + $0x2e10] sm:$0xff] }
  0xd9   :  { %4638 = vmatprep.subr.bf16.mxu1 %v4637_v9  ;;  %v1346_v4 = vld [vmem:[#allocation5 + $0x2788] sm:$0xff]  ;;  %v4655_v9 = vpack.c.bf16 %v1315_v2, %v1299_v50  ;;  %v4475_v50 = vpack.c.bf16 %v1441_v57, %v1425_v56  ;;  %v1588_v56 = vld [vmem:[#allocation5 + $0x2f18] sm:$0xff]  ;;  %v1587_v0 = vld [vmem:[#allocation5 + $0x2f10] sm:$0xff] }
  0xda   :  { %v4461_v10 = vpack.c.bf16 %v1346_v4, %v1330_v3  ;;  %v1457_v3 = vld [vmem:[#allocation5 + $0x2b00] sm:$0xff]  ;;  %v1604_v57 = vld [vmem:[#allocation5 + $0x2f98] sm:$0xff]  ;;  %v1619_v11 = vld [vmem:[#allocation5 + $0x3010] sm:$0xff] }
  0xdb   :  { %4444 = vmatpush1.bf16.msra.mxu0 %v4443_v17  ;;  %v1347_v17 = vld [vmem:[#allocation5 + $0x2790] sm:$0xff]  ;;  %v1473_v4 = vld [vmem:[#allocation5 + $0x2b80] sm:$0xff]  ;;  %v4689_v1 = vpack.c.bf16 %v1604_v57, %v1588_v56 }
  0xdc   :  { %4640 = vmatpush1.bf16.msra.mxu1 %v4639_v19  ;;  %4446 = vmatprep.subr.bf16.mxu0 %v4445_v20  ;;  %v1362_v19 = vld [vmem:[#allocation5 + $0x2808] sm:$0xff] }
  0xdd   :  { %4642 = vmatprep.subr.bf16.mxu1 %v4641_v25  ;;  %v1378_v20 = vld [vmem:[#allocation5 + $0x2888] sm:$0xff]  ;;  %v4659_v25 = vpack.c.bf16 %v1347_v17, %v1331_v15  ;;  %v4479_v15 = vpack.c.bf16 %v1473_v4, %v1457_v3  ;;  %v1620_v3 = vld [vmem:[#allocation5 + $0x3018] sm:$0xff] }
  0xde   :  { %v4465_v27 = vpack.c.bf16 %v1378_v20, %v1362_v19  ;;  %v1489_v19 = vld [vmem:[#allocation5 + $0x2c00] sm:$0xff]  ;;  %v1636_v4 = vld [vmem:[#allocation5 + $0x3098] sm:$0xff] }
  0xdf   :  { %4448 = vmatpush1.bf16.msra.mxu0 %v4447_v32  ;;  %v1379_v32 = vld [vmem:[#allocation5 + $0x2890] sm:$0xff]  ;;  %v1505_v20 = vld [vmem:[#allocation5 + $0x2c80] sm:$0xff]  ;;  %v4693_v12 = vpack.c.bf16 %v1636_v4, %v1620_v3 }
  0xe0   :  { %4644 = vmatpush1.bf16.msra.mxu1 %v4643_v33  ;;  %4450 = vmatprep.subr.bf16.mxu0 %v4449_v34  ;;  %v1394_v33 = vld [vmem:[#allocation5 + $0x2908] sm:$0xff] }
  0xe1   :  { %4646 = vmatprep.subr.bf16.mxu1 %v4645_v40  ;;  %v1410_v34 = vld [vmem:[#allocation5 + $0x2988] sm:$0xff]  ;;  %v4663_v40 = vpack.c.bf16 %v1379_v32, %v1363_v30  ;;  %v4483_v30 = vpack.c.bf16 %v1505_v20, %v1489_v19  ;;  %v6201_v19 = vcombine.low %v6188_v13, %v6191_v14  ;;  %v5957_v20 = vld [vmem:[#allocation3 + $0xc] ss:$14 sps:$4 sm:$0x33]   ;;  %v6064_v13 = vmov 0.0  }
  0xe2   :  { %v4469_v37 = vpack.c.bf16 %v1410_v34, %v1394_v33  ;;  %v1521_v33 = vld [vmem:[#allocation5 + $0x2d00] sm:$0xff] }
  0xe3   :  { %4452 = vmatpush1.bf16.msra.mxu0 %v4451_v45  ;;  %v1411_v45 = vld [vmem:[#allocation5 + $0x2990] sm:$0xff]  ;;  %v1537_v34 = vld [vmem:[#allocation5 + $0x2d80] sm:$0xff] }
  0xe4   :  { %4648 = vmatpush1.bf16.msra.mxu1 %v4647_v46  ;;  %4454 = vmatprep.subr.bf16.mxu0 %v4453_v47  ;;  %v1426_v46 = vld [vmem:[#allocation5 + $0x2a08] sm:$0xff]  ;;  %v85_v14 = vld [vmem:[#allocation5 + $0x20] sm:$0xff] }
  0xe5   :  { %4650 = vmatprep.subr.bf16.mxu1 %v4649_v54  ;;  %v1442_v47 = vld [vmem:[#allocation5 + $0x2a88] sm:$0xff]  ;;  %v4667_v54 = vpack.c.bf16 %v1411_v45, %v1395_v43  ;;  %v4487_v43 = vpack.c.bf16 %v1537_v34, %v1521_v33  ;;  %v87_v33 = vld [vmem:[#allocation5 + $0x30] sm:$0xff] }
  0xe6   :  { %v4473_v55 = vpack.c.bf16 %v1442_v47, %v1426_v46  ;;  %v1553_v46 = vld [vmem:[#allocation5 + $0x2e00] sm:$0xff]  ;;  %v103_v34 = vld [vmem:[#allocation5 + $0xb0] sm:$0xff] }
  0xe7   :  { %4456 = vmatpush1.bf16.msra.mxu0 %v4455_v61  ;;  %v1443_v61 = vld [vmem:[#allocation5 + $0x2a90] sm:$0xff]  ;;  %v1569_v47 = vld [vmem:[#allocation5 + $0x2e80] sm:$0xff]  ;;  %v4895_v38 = vpack.c.bf16 %v103_v34, %v87_v33 }
  0xe8   :  { %4652 = vmatpush1.bf16.msra.mxu1 %v4651_v62  ;;  %4458 = vmatprep.subr.bf16.mxu0 %v4457_v63  ;;  %v1458_v62 = vld [vmem:[#allocation5 + $0x2b08] sm:$0xff] }
  0xe9   :  { %4654 = vmatprep.subr.bf16.mxu1 %v4653_v51  ;;  %v1474_v63 = vld [vmem:[#allocation5 + $0x2b88] sm:$0xff]  ;;  %v4671_v51 = vpack.c.bf16 %v1443_v61, %v1427_v59  ;;  %v4491_v59 = vpack.c.bf16 %v1569_v47, %v1553_v46  ;;  %v135_v47 = vld [vmem:[#allocation5 + $0x1b0] sm:$0xff] }
  0xea   :  { %v4477_v2 = vpack.c.bf16 %v1474_v63, %v1458_v62  ;;  %v1585_v62 = vld [vmem:[#allocation5 + $0x2f00] sm:$0xff] }
  0xeb   :  { %4460 = vmatpush1.bf16.msra.mxu0 %v4459_v7  ;;  %v1475_v7 = vld [vmem:[#allocation5 + $0x2b90] sm:$0xff]  ;;  %v1601_v63 = vld [vmem:[#allocation5 + $0x2f80] sm:$0xff] }
  0xec   :  { %4656 = vmatpush1.bf16.msra.mxu1 %v4655_v9  ;;  %4462 = vmatprep.subr.bf16.mxu0 %v4461_v10  ;;  %v1490_v9 = vld [vmem:[#allocation5 + $0x2c08] sm:$0xff] }
  0xed   :  { %4658 = vmatprep.subr.bf16.mxu1 %v4657_v16  ;;  %v1506_v10 = vld [vmem:[#allocation5 + $0x2c88] sm:$0xff]  ;;  %v4675_v16 = vpack.c.bf16 %v1475_v7, %v1459_v5  ;;  %v4495_v5 = vpack.c.bf16 %v1601_v63, %v1585_v62  ;;  %v167_v63 = vld [vmem:[#allocation5 + $0x2b0] sm:$0xff] }
  0xee   :  { %v4481_v17 = vpack.c.bf16 %v1506_v10, %v1490_v9  ;;  %v1617_v9 = vld [vmem:[#allocation5 + $0x3000] sm:$0xff] }
  0xef   :  { %4464 = vmatpush1.bf16.msra.mxu0 %v4463_v23  ;;  %v1507_v23 = vld [vmem:[#allocation5 + $0x2c90] sm:$0xff]  ;;  %v1633_v10 = vld [vmem:[#allocation5 + $0x3080] sm:$0xff] }
  0xf0   :  { %4660 = vmatpush1.bf16.msra.mxu1 %v4659_v25  ;;  %4466 = vmatprep.subr.bf16.mxu0 %v4465_v27  ;;  %v1522_v25 = vld [vmem:[#allocation5 + $0x2d08] sm:$0xff] }
  0xf1   :  { %4662 = vmatprep.subr.bf16.mxu1 %v4661_v31  ;;  %v1538_v27 = vld [vmem:[#allocation5 + $0x2d88] sm:$0xff]  ;;  %v4679_v31 = vpack.c.bf16 %v1507_v23, %v1491_v21  ;;  %v5958_v21 = vld [vmem:[#allocation3 + $0x28] ss:$14 sps:$4 sm:$0x33]  }
  0xf2   :  { %v4485_v32 = vpack.c.bf16 %v1538_v27, %v1522_v25  ;;  %v88_v23 = vld [vmem:[#allocation5 + $0x38] sm:$0xff] }
  0xf3   :  { %4468 = vmatpush1.bf16.msra.mxu0 %v4467_v39  ;;  %v1539_v39 = vld [vmem:[#allocation5 + $0x2d90] sm:$0xff]  ;;  %v104_v25 = vld [vmem:[#allocation5 + $0xb8] sm:$0xff] }
  0xf4   :  { %4664 = vmatpush1.bf16.msra.mxu1 %v4663_v40  ;;  %4470 = vmatprep.subr.bf16.mxu0 %v4469_v37  ;;  %v1554_v40 = vld [vmem:[#allocation5 + $0x2e08] sm:$0xff]  ;;  %v4893_v29 = vpack.c.bf16 %v104_v25, %v88_v23  ;;  %v229_v23 = vld [vmem:[#allocation5 + $0x4a0] sm:$0xff]  ;;  %v215_v25 = vld [vmem:[#allocation5 + $0x430] sm:$0xff] }
  0xf5   :  { %4666 = vmatprep.subr.bf16.mxu1 %v4665_v44  ;;  %v1570_v37 = vld [vmem:[#allocation5 + $0x2e88] sm:$0xff]  ;;  %v4683_v44 = vpack.c.bf16 %v1539_v39, %v1523_v35 }
  0xf6   :  { %v4489_v45 = vpack.c.bf16 %v1570_v37, %v1554_v40  ;;  %v118_v35 = vld [vmem:[#allocation5 + $0x128] sm:$0xff]  ;;  %v136_v40 = vld [vmem:[#allocation5 + $0x1b8] sm:$0xff] }
  0xf7   :  { %4472 = vmatpush1.bf16.msra.mxu0 %v4471_v53  ;;  %v1571_v53 = vld [vmem:[#allocation5 + $0x2e90] sm:$0xff] }
  0xf8   :  { %4668 = vmatpush1.bf16.msra.mxu1 %v4667_v54  ;;  %4474 = vmatprep.subr.bf16.mxu0 %v4473_v55  ;;  %v1586_v54 = vld [vmem:[#allocation5 + $0x2f08] sm:$0xff] }
  0xf9   :  { %4670 = vmatprep.subr.bf16.mxu1 %v4669_v60  ;;  %v1602_v55 = vld [vmem:[#allocation5 + $0x2f88] sm:$0xff]  ;;  %v4687_v60 = vpack.c.bf16 %v1571_v53, %v1555_v49  ;;  %v152_v53 = vld [vmem:[#allocation5 + $0x238] sm:$0xff] }
  0xfa   :  { %v4493_v61 = vpack.c.bf16 %v1602_v55, %v1586_v54  ;;  %v150_v49 = vld [vmem:[#allocation5 + $0x228] sm:$0xff]  ;;  %v168_v54 = vld [vmem:[#allocation5 + $0x2b8] sm:$0xff] }
  0xfb   :  { %4476 = vmatpush1.bf16.msra.mxu0 %v4475_v50  ;;  %v1603_v50 = vld [vmem:[#allocation5 + $0x2f90] sm:$0xff]  ;;  %v4901_v62 = vpack.c.bf16 %v168_v54, %v152_v53 }
  0xfc   :  { %4672 = vmatpush1.bf16.msra.mxu1 %v4671_v51  ;;  %4478 = vmatprep.subr.bf16.mxu0 %v4477_v2  ;;  %v1618_v51 = vld [vmem:[#allocation5 + $0x3008] sm:$0xff]  ;;  %v279_v53 = vld [vmem:[#allocation5 + $0x630] sm:$0xff] }
  0xfd   :  { %4674 = vmatprep.subr.bf16.mxu1 %v4673_v6  ;;  %v1634_v2 = vld [vmem:[#allocation5 + $0x3088] sm:$0xff]  ;;  %v4691_v6 = vpack.c.bf16 %v1603_v50, %v1587_v0  ;;  %v184_v50 = vld [vmem:[#allocation5 + $0x338] sm:$0xff] }
  0xfe   :  { %v4497_v7 = vpack.c.bf16 %v1634_v2, %v1618_v51  ;;  %v182_v0 = vld [vmem:[#allocation5 + $0x328] sm:$0xff]  ;;  %v200_v51 = vld [vmem:[#allocation5 + $0x3b8] sm:$0xff] }
  0xff   :  { %4480 = vmatpush1.bf16.msra.mxu0 %v4479_v15  ;;  %v1635_v15 = vld [vmem:[#allocation5 + $0x3090] sm:$0xff] }
 0x100   :  { %4676 = vmatpush1.bf16.msra.mxu1 %v4675_v16  ;;  %4482 = vmatprep.subr.bf16.mxu0 %v4481_v17  ;;  %v86_v16 = vld [vmem:[#allocation5 + $0x28] sm:$0xff]  ;;  %v4695_v27 = vpack.c.bf16 %v1635_v15, %v1619_v11  ;;  %v216_v15 = vld [vmem:[#allocation5 + $0x438] sm:$0xff] }
 0x101   :  { %4678 = vmatprep.subr.bf16.mxu1 %v4677_v22  ;;  %v102_v17 = vld [vmem:[#allocation5 + $0xa8] sm:$0xff]  ;;  %v4499_v22 = vpack.c.bf16 %v1633_v10, %v1617_v9  ;;  %v4905_v9 = vpack.c.bf16 %v200_v51, %v184_v50  ;;  %v199_v10 = vld [vmem:[#allocation5 + $0x3b0] sm:$0xff] }
 0x102   :  { %v4697_v28 = vpack.c.bf16 %v102_v17, %v86_v16  ;;  %v214_v11 = vld [vmem:[#allocation5 + $0x428] sm:$0xff]  ;;  %v232_v16 = vld [vmem:[#allocation5 + $0x4b8] sm:$0xff]  ;;  %v311_v50 = vld [vmem:[#allocation5 + $0x730] sm:$0xff] }
 0x103   :  { %4484 = vmatpush1.bf16.msra.mxu0 %v4483_v30  ;;  %v1794_v30 = vrot.slane %v5957_v20, %v6149_v24 }
 0x104   :  { %4680 = vmatpush1.bf16.msra.mxu1 %v4679_v31  ;;  %4486 = vmatprep.subr.bf16.mxu0 %v4485_v32  ;;  %v1808_v31 = vrot.slane %v5958_v21, %v6149_v24  ;;  %v101_v32 = vld [vmem:[#allocation5 + $0xa0] sm:$0xff]  ;;  %v120_v24 = vld [vmem:[#allocation5 + $0x138] sm:$0xff] }
 0x105   :  { %4682 = vmatprep.subr.bf16.mxu1 %v4681_v36  ;;  %v134_v36 = vld [vmem:[#allocation5 + $0x1a8] sm:$0xff]  ;;  %v4699_v37 = vpack.c.bf16 %v101_v32, %v85_v14  ;;  %v4897_v46 = vpack.c.bf16 %v136_v40, %v120_v24  ;;  %v264_v14 = vld [vmem:[#allocation5 + $0x5b8] sm:$0xff]  ;;  %v247_v24 = vld [vmem:[#allocation5 + $0x530] sm:$0xff] }
 0x106   :  { %v6209_v39 = vcombine.low %v1794_v30, %v1808_v31  ;;  %v4701_v41 = vpack.c.bf16 %v134_v36, %v118_v35  ;;  %v262_v30 = vld [vmem:[#allocation5 + $0x5a8] sm:$0xff]  ;;  %v248_v31 = vld [vmem:[#allocation5 + $0x538] sm:$0xff]  ;;  %v245_v35 = vld [vmem:[#allocation5 + $0x520] sm:$0xff] }
 0x107   :  { %4488 = vmatpush1.bf16.msra.mxu0 %v4487_v43  ;;  %v117_v43 = vld [vmem:[#allocation5 + $0x120] sm:$0xff]  ;;  %v4913_v40 = vpack.c.bf16 %v264_v14, %v248_v31  ;;  %v375_v31 = vld [vmem:[#allocation5 + $0x930] sm:$0xff] }
 0x108   :  { %4684 = vmatpush1.bf16.msra.mxu1 %v4683_v44  ;;  %4490 = vmatprep.subr.bf16.mxu0 %v4489_v45  ;;  %v133_v44 = vld [vmem:[#allocation5 + $0x1a0] sm:$0xff]  ;;  %v119_v45 = vld [vmem:[#allocation5 + $0x130] sm:$0xff] }
 0x109   :  { %4686 = vmatprep.subr.bf16.mxu1 %v4685_v52  ;;  %v166_v52 = vld [vmem:[#allocation5 + $0x2a8] sm:$0xff]  ;;  %v4703_v55 = vpack.c.bf16 %v133_v44, %v117_v43  ;;  %v4899_v56 = vpack.c.bf16 %v135_v47, %v119_v45  ;;  %v261_v36 = vld [vmem:[#allocation5 + $0x5a0] sm:$0xff]  ;;  %v280_v43 = vld [vmem:[#allocation5 + $0x638] sm:$0xff] }
 0x10a   :  { %v4705_v57 = vpack.c.bf16 %v166_v52, %v150_v49  ;;  %v296_v44 = vld [vmem:[#allocation5 + $0x6b8] sm:$0xff]  ;;  %v4719_v45 = vpack.c.bf16 %v261_v36, %v245_v35  ;;  %v277_v49 = vld [vmem:[#allocation5 + $0x620] sm:$0xff] }
 0x10b   :  { %4492 = vmatpush1.bf16.msra.mxu0 %v4491_v59  ;;  %v149_v59 = vld [vmem:[#allocation5 + $0x220] sm:$0xff]  ;;  %v4917_v54 = vpack.c.bf16 %v296_v44, %v280_v43  ;;  %v408_v35 = vld [vmem:[#allocation5 + $0xa38] sm:$0xff]  ;;  %v407_v43 = vld [vmem:[#allocation5 + $0xa30] sm:$0xff] }
 0x10c   :  { %4688 = vmatpush1.bf16.msra.mxu1 %v4687_v60  ;;  %4494 = vmatprep.subr.bf16.mxu0 %v4493_v61  ;;  %v165_v60 = vld [vmem:[#allocation5 + $0x2a0] sm:$0xff]  ;;  %v151_v61 = vld [vmem:[#allocation5 + $0x230] sm:$0xff]  ;;  %v424_v36 = vld [vmem:[#allocation5 + $0xab8] sm:$0xff] }
 0x10d   :  { %4690 = vmatprep.subr.bf16.mxu1 %v4689_v1  ;;  %v198_v1 = vld [vmem:[#allocation5 + $0x3a8] sm:$0xff]  ;;  %v4707_v2 = vpack.c.bf16 %v165_v60, %v149_v59  ;;  %v4903_v3 = vpack.c.bf16 %v167_v63, %v151_v61  ;;  %v293_v52 = vld [vmem:[#allocation5 + $0x6a0] sm:$0xff]  ;;  %v312_v59 = vld [vmem:[#allocation5 + $0x738] sm:$0xff]  ;;  %v4933_v44 = vpack.c.bf16 %v424_v36, %v408_v35 }
 0x10e   :  { %v4709_v4 = vpack.c.bf16 %v198_v1, %v182_v0  ;;  %v328_v60 = vld [vmem:[#allocation5 + $0x7b8] sm:$0xff]  ;;  %v4723_v61 = vpack.c.bf16 %v293_v52, %v277_v49  ;;  %v309_v0 = vld [vmem:[#allocation5 + $0x720] sm:$0xff]  ;;  %v535_v35 = vld [vmem:[#allocation5 + $0xe30] sm:$0xff] }
 0x10f   :  { %4496 = vmatpush1.bf16.msra.mxu0 %v4495_v5  ;;  %v181_v5 = vld [vmem:[#allocation5 + $0x320] sm:$0xff]  ;;  %v4921_v51 = vpack.c.bf16 %v328_v60, %v312_v59  ;;  %v440_v49 = vld [vmem:[#allocation5 + $0xb38] sm:$0xff]  ;;  %v439_v59 = vld [vmem:[#allocation5 + $0xb30] sm:$0xff] }
 0x110   :  { %4692 = vmatpush1.bf16.msra.mxu1 %v4691_v6  ;;  %4498 = vmatprep.subr.bf16.mxu0 %v4497_v7  ;;  %v197_v6 = vld [vmem:[#allocation5 + $0x3a0] sm:$0xff]  ;;  %v183_v7 = vld [vmem:[#allocation5 + $0x330] sm:$0xff]  ;;  %v456_v52 = vld [vmem:[#allocation5 + $0xbb8] sm:$0xff] }
 0x111   :  { %4694 = vmatprep.subr.bf16.mxu1 %v4693_v12  ;;  %v230_v12 = vld [vmem:[#allocation5 + $0x4a8] sm:$0xff]  ;;  %v4711_v17 = vpack.c.bf16 %v197_v6, %v181_v5  ;;  %v4907_v20 = vpack.c.bf16 %v199_v10, %v183_v7  ;;  %v325_v1 = vld [vmem:[#allocation5 + $0x7a0] sm:$0xff]  ;;  %v344_v5 = vld [vmem:[#allocation5 + $0x838] sm:$0xff]  ;;  %v4937_v60 = vpack.c.bf16 %v456_v52, %v440_v49 }
 0x112   :  { %2028 = vmatmul.mubr.f32.vlgmr.msra.gmra.mrb[0].mxu0 %v6201_v19  ;;  %v4713_v21 = vpack.c.bf16 %v230_v12, %v214_v11  ;;  %v360_v6 = vld [vmem:[#allocation5 + $0x8b8] sm:$0xff]  ;;  %v4727_v7 = vpack.c.bf16 %v325_v1, %v309_v0  ;;  %v341_v11 = vld [vmem:[#allocation5 + $0x820] sm:$0xff]  ;;  %v567_v49 = vld [vmem:[#allocation5 + $0xf30] sm:$0xff] }
 0x113   :  { %2312 = vmatmul.mubr.f32.vlgmr.msra.gmra.mrb[0].mxu1 %v6201_v19  ;;  %4500 = vmatpush1.bf16.msra.mxu0 %v4499_v22  ;;  %v213_v22 = vld [vmem:[#allocation5 + $0x420] sm:$0xff]  ;;  %v472_v0 = vld [vmem:[#allocation5 + $0xc38] sm:$0xff] }
 0x114   :  { %4696 = vmatpush1.bf16.msra.mxu1 %v4695_v27  ;;  %2098 = vmatprep.mubr.f32.mxu0 %v6064_v13  ;;  %v4909_v27 = vpack.c.bf16 %v232_v16, %v216_v15  ;;  %v4715_v32 = vpack.c.bf16 %v229_v23, %v213_v22  ;;  %v357_v12 = vld [vmem:[#allocation5 + $0x8a0] sm:$0xff]  ;;  %v343_v15 = vld [vmem:[#allocation5 + $0x830] sm:$0xff]  ;;  %v4925_v16 = vpack.c.bf16 %v360_v6, %v344_v5  ;;  %v376_v22 = vld [vmem:[#allocation5 + $0x938] sm:$0xff] }
 0x115   :  { %2382 = vmatprep.mubr.f32.mxu1 %v6064_v13  ;;  %4698 = vmatprep.subr.bf16.mxu0 %v4697_v28  ;;  %v231_v28 = vld [vmem:[#allocation5 + $0x4b0] sm:$0xff]  ;;  %v392_v23 = vld [vmem:[#allocation5 + $0x9b8] sm:$0xff] }
 0x116   :  { %4894 = vmatprep.subr.bf16.mxu1 %v4893_v29  ;;  %v246_v29 = vld [vmem:[#allocation5 + $0x528] sm:$0xff]  ;;  %v4911_v33 = vpack.c.bf16 %v231_v28, %v215_v25  ;;  %v4731_v25 = vpack.c.bf16 %v357_v12, %v341_v11  ;;  %v4929_v14 = vpack.c.bf16 %v392_v23, %v376_v22  ;;  %v488_v1 = vld [vmem:[#allocation5 + $0xcb8] sm:$0xff]  ;;  %v471_v5 = vld [vmem:[#allocation5 + $0xc30] sm:$0xff] }
 0x117   :  { %v4717_v34 = vpack.c.bf16 %v262_v30, %v246_v29  ;;  %v373_v29 = vld [vmem:[#allocation5 + $0x920] sm:$0xff]  ;;  %v4941_v6 = vpack.c.bf16 %v488_v1, %v472_v0  ;;  %v504_v11 = vld [vmem:[#allocation5 + $0xd38] sm:$0xff]  ;;  %v503_v22 = vld [vmem:[#allocation5 + $0xd30] sm:$0xff] }
 0x118   :  { %v389_v30 = vld [vmem:[#allocation5 + $0x9a0] sm:$0xff]  ;;  %v520_v12 = vld [vmem:[#allocation5 + $0xdb8] sm:$0xff]  ;;  %v599_v0 = vld [vmem:[#allocation5 + $0x1030] sm:$0xff] }
 0x119   :  { %v4945_v23 = vpack.c.bf16 %v520_v12, %v504_v11  ;;  %v631_v11 = vld [vmem:[#allocation5 + $0x1130] sm:$0xff] }
 0x11a   :  { %4296 = vmatmul.mubr.msk.f32.vlgmr.msra.gmra.mrb[0].mxu0 %vm1818_vm0, %v6209_v39 }
 0x11b   :  { %4297 = vmatmul.mubr.msk.f32.vlgmr.msra.gmra.mrb[0].mxu1 %vm1818_vm0, %v6209_v39  ;;  %4700 = vmatpush1.bf16.msra.mxu0 %v4699_v37  ;;  %v263_v37 = vld [vmem:[#allocation5 + $0x5b0] sm:$0xff] }
 0x11c   :  { %4896 = vmatpush1.bf16.msra.mxu1 %v4895_v38  ;;  %4702 = vmatprep.subr.bf16.mxu0 %v4701_v41  ;;  %v278_v38 = vld [vmem:[#allocation5 + $0x628] sm:$0xff] }
 0x11d   :  { %4898 = vmatprep.subr.bf16.mxu1 %v4897_v46  ;;  %2453 = vmatprep.mubr.f32.mxu0 %v6159_v42  ;;  %v294_v41 = vld [vmem:[#allocation5 + $0x6a8] sm:$0xff]  ;;  %v4915_v46 = vpack.c.bf16 %v263_v37, %v247_v24  ;;  %v4735_v24 = vpack.c.bf16 %v389_v30, %v373_v29  ;;  %v536_v29 = vld [vmem:[#allocation5 + $0xe38] sm:$0xff] }
 0x11e   :  { %2737 = vmatprep.mubr.f32.mxu1 %v6159_v42  ;;  %v4721_v47 = vpack.c.bf16 %v294_v41, %v278_v38  ;;  %v405_v38 = vld [vmem:[#allocation5 + $0xa20] sm:$0xff]  ;;  %v552_v30 = vld [vmem:[#allocation5 + $0xeb8] sm:$0xff] }
 0x11f   :  { %4704 = vmatpush1.bf16.msra.mxu0 %v4703_v55  ;;  %v295_v55 = vld [vmem:[#allocation5 + $0x6b0] sm:$0xff]  ;;  %v421_v41 = vld [vmem:[#allocation5 + $0xaa0] sm:$0xff]  ;;  %v4949_v36 = vpack.c.bf16 %v552_v30, %v536_v29 }
 0x120   :  { %4900 = vmatpush1.bf16.msra.mxu1 %v4899_v56  ;;  %4706 = vmatprep.subr.bf16.mxu0 %v4705_v57  ;;  %v310_v56 = vld [vmem:[#allocation5 + $0x728] sm:$0xff]  ;;  %v663_v29 = vld [vmem:[#allocation5 + $0x1230] sm:$0xff] }
 0x121   :  { %4902 = vmatprep.subr.bf16.mxu1 %v4901_v62  ;;  %v326_v57 = vld [vmem:[#allocation5 + $0x7a8] sm:$0xff]  ;;  %v4919_v62 = vpack.c.bf16 %v295_v55, %v279_v53  ;;  %v4739_v53 = vpack.c.bf16 %v421_v41, %v405_v38  ;;  %v568_v38 = vld [vmem:[#allocation5 + $0xf38] sm:$0xff] }
 0x122   :  { %v4725_v63 = vpack.c.bf16 %v326_v57, %v310_v56  ;;  %v437_v56 = vld [vmem:[#allocation5 + $0xb20] sm:$0xff]  ;;  %v584_v41 = vld [vmem:[#allocation5 + $0xfb8] sm:$0xff] }
 0x123   :  { %4708 = vmatpush1.bf16.msra.mxu0 %v4707_v2  ;;  %v327_v2 = vld [vmem:[#allocation5 + $0x7b0] sm:$0xff]  ;;  %v453_v57 = vld [vmem:[#allocation5 + $0xba0] sm:$0xff]  ;;  %v4953_v52 = vpack.c.bf16 %v584_v41, %v568_v38 }
 0x124   :  { %4904 = vmatpush1.bf16.msra.mxu1 %v4903_v3  ;;  %4710 = vmatprep.subr.bf16.mxu0 %v4709_v4  ;;  %v342_v3 = vld [vmem:[#allocation5 + $0x828] sm:$0xff]  ;;  %v695_v38 = vld [vmem:[#allocation5 + $0x1330] sm:$0xff] }
 0x125   :  { %4906 = vmatprep.subr.bf16.mxu1 %v4905_v9  ;;  %v358_v4 = vld [vmem:[#allocation5 + $0x8a8] sm:$0xff]  ;;  %v4923_v9 = vpack.c.bf16 %v327_v2, %v311_v50  ;;  %v4743_v50 = vpack.c.bf16 %v453_v57, %v437_v56  ;;  %v600_v56 = vld [vmem:[#allocation5 + $0x1038] sm:$0xff] }
 0x126   :  { %v4729_v10 = vpack.c.bf16 %v358_v4, %v342_v3  ;;  %v469_v3 = vld [vmem:[#allocation5 + $0xc20] sm:$0xff]  ;;  %v616_v57 = vld [vmem:[#allocation5 + $0x10b8] sm:$0xff] }
 0x127   :  { %4712 = vmatpush1.bf16.msra.mxu0 %v4711_v17  ;;  %v359_v17 = vld [vmem:[#allocation5 + $0x8b0] sm:$0xff]  ;;  %v485_v4 = vld [vmem:[#allocation5 + $0xca0] sm:$0xff]  ;;  %v4957_v1 = vpack.c.bf16 %v616_v57, %v600_v56 }
 0x128   :  { %4908 = vmatpush1.bf16.msra.mxu1 %v4907_v20  ;;  %4714 = vmatprep.subr.bf16.mxu0 %v4713_v21  ;;  %v374_v20 = vld [vmem:[#allocation5 + $0x928] sm:$0xff]  ;;  %v727_v56 = vld [vmem:[#allocation5 + $0x1430] sm:$0xff] }
 0x129   :  { %4910 = vmatprep.subr.bf16.mxu1 %v4909_v27  ;;  %v390_v21 = vld [vmem:[#allocation5 + $0x9a8] sm:$0xff]  ;;  %v4927_v27 = vpack.c.bf16 %v359_v17, %v343_v15  ;;  %v4747_v15 = vpack.c.bf16 %v485_v4, %v469_v3  ;;  %v632_v3 = vld [vmem:[#allocation5 + $0x1138] sm:$0xff] }
 0x12a   :  { %v4733_v28 = vpack.c.bf16 %v390_v21, %v374_v20  ;;  %v501_v20 = vld [vmem:[#allocation5 + $0xd20] sm:$0xff]  ;;  %v648_v4 = vld [vmem:[#allocation5 + $0x11b8] sm:$0xff] }
 0x12b   :  { %4716 = vmatpush1.bf16.msra.mxu0 %v4715_v32  ;;  %v391_v32 = vld [vmem:[#allocation5 + $0x9b0] sm:$0xff]  ;;  %v517_v21 = vld [vmem:[#allocation5 + $0xda0] sm:$0xff]  ;;  %v4961_v12 = vpack.c.bf16 %v648_v4, %v632_v3 }
 0x12c   :  { %4912 = vmatpush1.bf16.msra.mxu1 %v4911_v33  ;;  %4718 = vmatprep.subr.bf16.mxu0 %v4717_v34  ;;  %v406_v33 = vld [vmem:[#allocation5 + $0xa28] sm:$0xff]  ;;  %v759_v3 = vld [vmem:[#allocation5 + $0x1530] sm:$0xff] }
 0x12d   :  { %4914 = vmatprep.subr.bf16.mxu1 %v4913_v40  ;;  %v422_v34 = vld [vmem:[#allocation5 + $0xaa8] sm:$0xff]  ;;  %v4931_v40 = vpack.c.bf16 %v391_v32, %v375_v31  ;;  %v4751_v31 = vpack.c.bf16 %v517_v21, %v501_v20  ;;  %v664_v20 = vld [vmem:[#allocation5 + $0x1238] sm:$0xff] }
 0x12e   :  { %v4737_v37 = vpack.c.bf16 %v422_v34, %v406_v33  ;;  %v533_v33 = vld [vmem:[#allocation5 + $0xe20] sm:$0xff]  ;;  %v680_v21 = vld [vmem:[#allocation5 + $0x12b8] sm:$0xff] }
 0x12f   :  { %4720 = vmatpush1.bf16.msra.mxu0 %v4719_v45  ;;  %v423_v45 = vld [vmem:[#allocation5 + $0xab0] sm:$0xff]  ;;  %v549_v34 = vld [vmem:[#allocation5 + $0xea0] sm:$0xff]  ;;  %v4965_v30 = vpack.c.bf16 %v680_v21, %v664_v20 }
 0x130   :  { %4916 = vmatpush1.bf16.msra.mxu1 %v4915_v46  ;;  %4722 = vmatprep.subr.bf16.mxu0 %v4721_v47  ;;  %v438_v46 = vld [vmem:[#allocation5 + $0xb28] sm:$0xff]  ;;  %v791_v20 = vld [vmem:[#allocation5 + $0x1630] sm:$0xff] }
 0x131   :  { %4918 = vmatprep.subr.bf16.mxu1 %v4917_v54  ;;  %v454_v47 = vld [vmem:[#allocation5 + $0xba8] sm:$0xff]  ;;  %v4935_v54 = vpack.c.bf16 %v423_v45, %v407_v43  ;;  %v4755_v43 = vpack.c.bf16 %v549_v34, %v533_v33  ;;  %v696_v33 = vld [vmem:[#allocation5 + $0x1338] sm:$0xff] }
 0x132   :  { %v4741_v55 = vpack.c.bf16 %v454_v47, %v438_v46  ;;  %v565_v46 = vld [vmem:[#allocation5 + $0xf20] sm:$0xff]  ;;  %v712_v34 = vld [vmem:[#allocation5 + $0x13b8] sm:$0xff] }
 0x133   :  { %4724 = vmatpush1.bf16.msra.mxu0 %v4723_v61  ;;  %v455_v61 = vld [vmem:[#allocation5 + $0xbb0] sm:$0xff]  ;;  %v581_v47 = vld [vmem:[#allocation5 + $0xfa0] sm:$0xff]  ;;  %v4969_v41 = vpack.c.bf16 %v712_v34, %v696_v33 }
 0x134   :  { %4920 = vmatpush1.bf16.msra.mxu1 %v4919_v62  ;;  %4726 = vmatprep.subr.bf16.mxu0 %v4725_v63  ;;  %v470_v62 = vld [vmem:[#allocation5 + $0xc28] sm:$0xff]  ;;  %v823_v33 = vld [vmem:[#allocation5 + $0x1730] sm:$0xff] }
 0x135   :  { %4922 = vmatprep.subr.bf16.mxu1 %v4921_v51  ;;  %v486_v63 = vld [vmem:[#allocation5 + $0xca8] sm:$0xff]  ;;  %v4939_v51 = vpack.c.bf16 %v455_v61, %v439_v59  ;;  %v4759_v59 = vpack.c.bf16 %v581_v47, %v565_v46  ;;  %v728_v46 = vld [vmem:[#allocation5 + $0x1438] sm:$0xff] }
 0x136   :  { %v4745_v2 = vpack.c.bf16 %v486_v63, %v470_v62  ;;  %v597_v62 = vld [vmem:[#allocation5 + $0x1020] sm:$0xff]  ;;  %v744_v47 = vld [vmem:[#allocation5 + $0x14b8] sm:$0xff] }
 0x137   :  { %4728 = vmatpush1.bf16.msra.mxu0 %v4727_v7  ;;  %v487_v7 = vld [vmem:[#allocation5 + $0xcb0] sm:$0xff]  ;;  %v613_v63 = vld [vmem:[#allocation5 + $0x10a0] sm:$0xff]  ;;  %v4973_v57 = vpack.c.bf16 %v744_v47, %v728_v46 }
 0x138   :  { %4924 = vmatpush1.bf16.msra.mxu1 %v4923_v9  ;;  %4730 = vmatprep.subr.bf16.mxu0 %v4729_v10  ;;  %v502_v9 = vld [vmem:[#allocation5 + $0xd28] sm:$0xff]  ;;  %v855_v46 = vld [vmem:[#allocation5 + $0x1830] sm:$0xff] }
 0x139   :  { %4926 = vmatprep.subr.bf16.mxu1 %v4925_v16  ;;  %v518_v10 = vld [vmem:[#allocation5 + $0xda8] sm:$0xff]  ;;  %v4943_v16 = vpack.c.bf16 %v487_v7, %v471_v5  ;;  %v4763_v5 = vpack.c.bf16 %v613_v63, %v597_v62  ;;  %v760_v62 = vld [vmem:[#allocation5 + $0x1538] sm:$0xff] }
 0x13a   :  { %v4749_v17 = vpack.c.bf16 %v518_v10, %v502_v9  ;;  %v629_v9 = vld [vmem:[#allocation5 + $0x1120] sm:$0xff]  ;;  %v776_v63 = vld [vmem:[#allocation5 + $0x15b8] sm:$0xff] }
 0x13b   :  { %4732 = vmatpush1.bf16.msra.mxu0 %v4731_v25  ;;  %v519_v25 = vld [vmem:[#allocation5 + $0xdb0] sm:$0xff]  ;;  %v645_v10 = vld [vmem:[#allocation5 + $0x11a0] sm:$0xff]  ;;  %v4977_v4 = vpack.c.bf16 %v776_v63, %v760_v62 }
 0x13c   :  { %4928 = vmatpush1.bf16.msra.mxu1 %v4927_v27  ;;  %4734 = vmatprep.subr.bf16.mxu0 %v4733_v28  ;;  %v534_v27 = vld [vmem:[#allocation5 + $0xe28] sm:$0xff]  ;;  %v887_v62 = vld [vmem:[#allocation5 + $0x1930] sm:$0xff] }
 0x13d   :  { %4930 = vmatprep.subr.bf16.mxu1 %v4929_v14  ;;  %v550_v28 = vld [vmem:[#allocation5 + $0xea8] sm:$0xff]  ;;  %v4947_v14 = vpack.c.bf16 %v519_v25, %v503_v22  ;;  %v4767_v22 = vpack.c.bf16 %v645_v10, %v629_v9  ;;  %v792_v9 = vld [vmem:[#allocation5 + $0x1638] sm:$0xff] }
 0x13e   :  { %v4753_v32 = vpack.c.bf16 %v550_v28, %v534_v27  ;;  %v661_v27 = vld [vmem:[#allocation5 + $0x1220] sm:$0xff]  ;;  %v808_v10 = vld [vmem:[#allocation5 + $0x16b8] sm:$0xff] }
 0x13f   :  { %4736 = vmatpush1.bf16.msra.mxu0 %v4735_v24  ;;  %v551_v24 = vld [vmem:[#allocation5 + $0xeb0] sm:$0xff]  ;;  %v677_v28 = vld [vmem:[#allocation5 + $0x12a0] sm:$0xff]  ;;  %v4981_v21 = vpack.c.bf16 %v808_v10, %v792_v9 }
 0x140   :  { %4932 = vmatpush1.bf16.msra.mxu1 %v4931_v40  ;;  %4738 = vmatprep.subr.bf16.mxu0 %v4737_v37  ;;  %v566_v40 = vld [vmem:[#allocation5 + $0xf28] sm:$0xff]  ;;  %v919_v9 = vld [vmem:[#allocation5 + $0x1a30] sm:$0xff] }
 0x141   :  { %4934 = vmatprep.subr.bf16.mxu1 %v4933_v44  ;;  %v582_v37 = vld [vmem:[#allocation5 + $0xfa8] sm:$0xff]  ;;  %v4951_v44 = vpack.c.bf16 %v551_v24, %v535_v35  ;;  %v4771_v35 = vpack.c.bf16 %v677_v28, %v661_v27  ;;  %v824_v27 = vld [vmem:[#allocation5 + $0x1738] sm:$0xff] }
 0x142   :  { %v4757_v45 = vpack.c.bf16 %v582_v37, %v566_v40  ;;  %v693_v40 = vld [vmem:[#allocation5 + $0x1320] sm:$0xff]  ;;  %v840_v28 = vld [vmem:[#allocation5 + $0x17b8] sm:$0xff] }
 0x143   :  { %4740 = vmatpush1.bf16.msra.mxu0 %v4739_v53  ;;  %v583_v53 = vld [vmem:[#allocation5 + $0xfb0] sm:$0xff]  ;;  %v709_v37 = vld [vmem:[#allocation5 + $0x13a0] sm:$0xff]  ;;  %v4985_v34 = vpack.c.bf16 %v840_v28, %v824_v27 }
 0x144   :  { %4936 = vmatpush1.bf16.msra.mxu1 %v4935_v54  ;;  %4742 = vmatprep.subr.bf16.mxu0 %v4741_v55  ;;  %v598_v54 = vld [vmem:[#allocation5 + $0x1028] sm:$0xff]  ;;  %v951_v27 = vld [vmem:[#allocation5 + $0x1b30] sm:$0xff] }
 0x145   :  { %4938 = vmatprep.subr.bf16.mxu1 %v4937_v60  ;;  %v614_v55 = vld [vmem:[#allocation5 + $0x10a8] sm:$0xff]  ;;  %v4955_v60 = vpack.c.bf16 %v583_v53, %v567_v49  ;;  %v4775_v49 = vpack.c.bf16 %v709_v37, %v693_v40  ;;  %v856_v40 = vld [vmem:[#allocation5 + $0x1838] sm:$0xff] }
 0x146   :  { %v4761_v61 = vpack.c.bf16 %v614_v55, %v598_v54  ;;  %v725_v54 = vld [vmem:[#allocation5 + $0x1420] sm:$0xff]  ;;  %v872_v37 = vld [vmem:[#allocation5 + $0x18b8] sm:$0xff] }
 0x147   :  { %4744 = vmatpush1.bf16.msra.mxu0 %v4743_v50  ;;  %v615_v50 = vld [vmem:[#allocation5 + $0x10b0] sm:$0xff]  ;;  %v741_v55 = vld [vmem:[#allocation5 + $0x14a0] sm:$0xff]  ;;  %v4989_v47 = vpack.c.bf16 %v872_v37, %v856_v40 }
 0x148   :  { %4940 = vmatpush1.bf16.msra.mxu1 %v4939_v51  ;;  %4746 = vmatprep.subr.bf16.mxu0 %v4745_v2  ;;  %v630_v51 = vld [vmem:[#allocation5 + $0x1128] sm:$0xff]  ;;  %v983_v40 = vld [vmem:[#allocation5 + $0x1c30] sm:$0xff] }
 0x149   :  { %4942 = vmatprep.subr.bf16.mxu1 %v4941_v6  ;;  %v646_v2 = vld [vmem:[#allocation5 + $0x11a8] sm:$0xff]  ;;  %v4959_v6 = vpack.c.bf16 %v615_v50, %v599_v0  ;;  %v4779_v0 = vpack.c.bf16 %v741_v55, %v725_v54  ;;  %v888_v54 = vld [vmem:[#allocation5 + $0x1938] sm:$0xff] }
 0x14a   :  { %v4765_v7 = vpack.c.bf16 %v646_v2, %v630_v51  ;;  %v757_v51 = vld [vmem:[#allocation5 + $0x1520] sm:$0xff]  ;;  %v904_v55 = vld [vmem:[#allocation5 + $0x19b8] sm:$0xff] }
 0x14b   :  { %4748 = vmatpush1.bf16.msra.mxu0 %v4747_v15  ;;  %v647_v15 = vld [vmem:[#allocation5 + $0x11b0] sm:$0xff]  ;;  %v773_v2 = vld [vmem:[#allocation5 + $0x15a0] sm:$0xff]  ;;  %v4993_v63 = vpack.c.bf16 %v904_v55, %v888_v54 }
 0x14c   :  { %4944 = vmatpush1.bf16.msra.mxu1 %v4943_v16  ;;  %4750 = vmatprep.subr.bf16.mxu0 %v4749_v17  ;;  %v662_v16 = vld [vmem:[#allocation5 + $0x1228] sm:$0xff]  ;;  %v1015_v54 = vld [vmem:[#allocation5 + $0x1d30] sm:$0xff] }
 0x14d   :  { %4946 = vmatprep.subr.bf16.mxu1 %v4945_v23  ;;  %v678_v17 = vld [vmem:[#allocation5 + $0x12a8] sm:$0xff]  ;;  %v4963_v23 = vpack.c.bf16 %v647_v15, %v631_v11  ;;  %v4783_v11 = vpack.c.bf16 %v773_v2, %v757_v51  ;;  %v920_v51 = vld [vmem:[#allocation5 + $0x1a38] sm:$0xff] }
 0x14e   :  { %v4769_v25 = vpack.c.bf16 %v678_v17, %v662_v16  ;;  %v789_v16 = vld [vmem:[#allocation5 + $0x1620] sm:$0xff]  ;;  %v936_v2 = vld [vmem:[#allocation5 + $0x1ab8] sm:$0xff] }
 0x14f   :  { %4752 = vmatpush1.bf16.msra.mxu0 %v4751_v31  ;;  %v679_v31 = vld [vmem:[#allocation5 + $0x12b0] sm:$0xff]  ;;  %v805_v17 = vld [vmem:[#allocation5 + $0x16a0] sm:$0xff]  ;;  %v4997_v10 = vpack.c.bf16 %v936_v2, %v920_v51 }
 0x150   :  { %4948 = vmatpush1.bf16.msra.mxu1 %v4947_v14  ;;  %4754 = vmatprep.subr.bf16.mxu0 %v4753_v32  ;;  %v694_v14 = vld [vmem:[#allocation5 + $0x1328] sm:$0xff]  ;;  %v1047_v51 = vld [vmem:[#allocation5 + $0x1e30] sm:$0xff] }
 0x151   :  { %4950 = vmatprep.subr.bf16.mxu1 %v4949_v36  ;;  %v710_v32 = vld [vmem:[#allocation5 + $0x13a8] sm:$0xff]  ;;  %v4967_v36 = vpack.c.bf16 %v679_v31, %v663_v29  ;;  %v4787_v29 = vpack.c.bf16 %v805_v17, %v789_v16  ;;  %v952_v16 = vld [vmem:[#allocation5 + $0x1b38] sm:$0xff] }
 0x152   :  { %v4773_v24 = vpack.c.bf16 %v710_v32, %v694_v14  ;;  %v821_v14 = vld [vmem:[#allocation5 + $0x1720] sm:$0xff]  ;;  %v968_v17 = vld [vmem:[#allocation5 + $0x1bb8] sm:$0xff] }
 0x153   :  { %4756 = vmatpush1.bf16.msra.mxu0 %v4755_v43  ;;  %v711_v43 = vld [vmem:[#allocation5 + $0x13b0] sm:$0xff]  ;;  %v837_v32 = vld [vmem:[#allocation5 + $0x17a0] sm:$0xff]  ;;  %v5001_v28 = vpack.c.bf16 %v968_v17, %v952_v16 }
 0x154   :  { %4952 = vmatpush1.bf16.msra.mxu1 %v4951_v44  ;;  %4758 = vmatprep.subr.bf16.mxu0 %v4757_v45  ;;  %v726_v44 = vld [vmem:[#allocation5 + $0x1428] sm:$0xff]  ;;  %v1079_v16 = vld [vmem:[#allocation5 + $0x1f30] sm:$0xff] }
 0x155   :  { %4954 = vmatprep.subr.bf16.mxu1 %v4953_v52  ;;  %v742_v45 = vld [vmem:[#allocation5 + $0x14a8] sm:$0xff]  ;;  %v4971_v52 = vpack.c.bf16 %v711_v43, %v695_v38  ;;  %v4791_v38 = vpack.c.bf16 %v837_v32, %v821_v14  ;;  %v984_v14 = vld [vmem:[#allocation5 + $0x1c38] sm:$0xff] }
 0x156   :  { %v4777_v53 = vpack.c.bf16 %v742_v45, %v726_v44  ;;  %v853_v44 = vld [vmem:[#allocation5 + $0x1820] sm:$0xff]  ;;  %v1000_v32 = vld [vmem:[#allocation5 + $0x1cb8] sm:$0xff] }
 0x157   :  { %4760 = vmatpush1.bf16.msra.mxu0 %v4759_v59  ;;  %v743_v59 = vld [vmem:[#allocation5 + $0x14b0] sm:$0xff]  ;;  %v869_v45 = vld [vmem:[#allocation5 + $0x18a0] sm:$0xff]  ;;  %v5005_v37 = vpack.c.bf16 %v1000_v32, %v984_v14 }
 0x158   :  { %4956 = vmatpush1.bf16.msra.mxu1 %v4955_v60  ;;  %4762 = vmatprep.subr.bf16.mxu0 %v4761_v61  ;;  %v758_v60 = vld [vmem:[#allocation5 + $0x1528] sm:$0xff]  ;;  %v1111_v14 = vld [vmem:[#allocation5 + $0x2030] sm:$0xff] }
 0x159   :  { %4958 = vmatprep.subr.bf16.mxu1 %v4957_v1  ;;  %v774_v61 = vld [vmem:[#allocation5 + $0x15a8] sm:$0xff]  ;;  %v4975_v1 = vpack.c.bf16 %v743_v59, %v727_v56  ;;  %v4795_v56 = vpack.c.bf16 %v869_v45, %v853_v44  ;;  %v1016_v44 = vld [vmem:[#allocation5 + $0x1d38] sm:$0xff] }
 0x15a   :  { %2454 = vmatmul.mubr.f32.vlgmr.msra.gmra.mrb[2].mxu0 %v6165_v26  ;;  %v4781_v50 = vpack.c.bf16 %v774_v61, %v758_v60  ;;  %v885_v60 = vld [vmem:[#allocation5 + $0x1920] sm:$0xff]  ;;  %v1032_v45 = vld [vmem:[#allocation5 + $0x1db8] sm:$0xff] }
 0x15b   :  { %4764 = vmatpush1.bf16.msra.mxu0 %v4763_v5  ;;  %2738 = vmatmul.mubr.f32.vlgmr.msra.gmra.mrb[2].mxu1 %v6165_v26  ;;  %v775_v5 = vld [vmem:[#allocation5 + $0x15b0] sm:$0xff]  ;;  %v901_v61 = vld [vmem:[#allocation5 + $0x19a0] sm:$0xff]  ;;  %v5009_v55 = vpack.c.bf16 %v1032_v45, %v1016_v44 }
 0x15c   :  { %4960 = vmatpush1.bf16.msra.mxu1 %v4959_v6  ;;  %4766 = vmatprep.subr.bf16.mxu0 %v4765_v7  ;;  %v790_v6 = vld [vmem:[#allocation5 + $0x1628] sm:$0xff]  ;;  %v1143_v44 = vld [vmem:[#allocation5 + $0x2130] sm:$0xff] }
 0x15d   :  { %4962 = vmatprep.subr.bf16.mxu1 %v4961_v12  ;;  %2524 = vmatprep.mubr.f32.mxu0 %v6177_v58  ;;  %v806_v7 = vld [vmem:[#allocation5 + $0x16a8] sm:$0xff]  ;;  %v4979_v12 = vpack.c.bf16 %v775_v5, %v759_v3  ;;  %v4799_v3 = vpack.c.bf16 %v901_v61, %v885_v60  ;;  %v1048_v60 = vld [vmem:[#allocation5 + $0x1e38] sm:$0xff] }
 0x15e   :  { %2808 = vmatprep.mubr.f32.mxu1 %v6177_v58  ;;  %v4785_v15 = vpack.c.bf16 %v806_v7, %v790_v6  ;;  %v917_v6 = vld [vmem:[#allocation5 + $0x1a20] sm:$0xff]  ;;  %v1064_v61 = vld [vmem:[#allocation5 + $0x1eb8] sm:$0xff] }
 0x15f   :  { %4768 = vmatpush1.bf16.msra.mxu0 %v4767_v22  ;;  %v807_v22 = vld [vmem:[#allocation5 + $0x16b0] sm:$0xff]  ;;  %v933_v7 = vld [vmem:[#allocation5 + $0x1aa0] sm:$0xff]  ;;  %v5013_v2 = vpack.c.bf16 %v1064_v61, %v1048_v60 }
 0x160   :  { %4964 = vmatpush1.bf16.msra.mxu1 %v4963_v23  ;;  %4770 = vmatprep.subr.bf16.mxu0 %v4769_v25  ;;  %v822_v23 = vld [vmem:[#allocation5 + $0x1728] sm:$0xff]  ;;  %v1175_v60 = vld [vmem:[#allocation5 + $0x2230] sm:$0xff] }
 0x161   :  { %4966 = vmatprep.subr.bf16.mxu1 %v4965_v30  ;;  %v838_v25 = vld [vmem:[#allocation5 + $0x17a8] sm:$0xff]  ;;  %v4983_v30 = vpack.c.bf16 %v807_v22, %v791_v20  ;;  %v4803_v20 = vpack.c.bf16 %v933_v7, %v917_v6  ;;  %v1080_v6 = vld [vmem:[#allocation5 + $0x1f38] sm:$0xff] }
 0x162   :  { %v4789_v31 = vpack.c.bf16 %v838_v25, %v822_v23  ;;  %v949_v23 = vld [vmem:[#allocation5 + $0x1b20] sm:$0xff]  ;;  %v1096_v7 = vld [vmem:[#allocation5 + $0x1fb8] sm:$0xff] }
 0x163   :  { %4772 = vmatpush1.bf16.msra.mxu0 %v4771_v35  ;;  %v839_v35 = vld [vmem:[#allocation5 + $0x17b0] sm:$0xff]  ;;  %v965_v25 = vld [vmem:[#allocation5 + $0x1ba0] sm:$0xff]  ;;  %v5017_v17 = vpack.c.bf16 %v1096_v7, %v1080_v6 }
 0x164   :  { %4968 = vmatpush1.bf16.msra.mxu1 %v4967_v36  ;;  %4774 = vmatprep.subr.bf16.mxu0 %v4773_v24  ;;  %v854_v36 = vld [vmem:[#allocation5 + $0x1828] sm:$0xff]  ;;  %v1207_v6 = vld [vmem:[#allocation5 + $0x2330] sm:$0xff] }
 0x165   :  { %4970 = vmatprep.subr.bf16.mxu1 %v4969_v41  ;;  %v870_v24 = vld [vmem:[#allocation5 + $0x18a8] sm:$0xff]  ;;  %v4987_v41 = vpack.c.bf16 %v839_v35, %v823_v33  ;;  %v4807_v33 = vpack.c.bf16 %v965_v25, %v949_v23  ;;  %v1112_v23 = vld [vmem:[#allocation5 + $0x2038] sm:$0xff] }
 0x166   :  { %v4793_v43 = vpack.c.bf16 %v870_v24, %v854_v36  ;;  %v981_v36 = vld [vmem:[#allocation5 + $0x1c20] sm:$0xff]  ;;  %v1128_v25 = vld [vmem:[#allocation5 + $0x20b8] sm:$0xff] }
 0x167   :  { %4776 = vmatpush1.bf16.msra.mxu0 %v4775_v49  ;;  %v871_v49 = vld [vmem:[#allocation5 + $0x18b0] sm:$0xff]  ;;  %v997_v24 = vld [vmem:[#allocation5 + $0x1ca0] sm:$0xff]  ;;  %v5021_v32 = vpack.c.bf16 %v1128_v25, %v1112_v23 }
 0x168   :  { %4972 = vmatpush1.bf16.msra.mxu1 %v4971_v52  ;;  %4778 = vmatprep.subr.bf16.mxu0 %v4777_v53  ;;  %v886_v52 = vld [vmem:[#allocation5 + $0x1928] sm:$0xff]  ;;  %v1239_v23 = vld [vmem:[#allocation5 + $0x2430] sm:$0xff] }
 0x169   :  { %4974 = vmatprep.subr.bf16.mxu1 %v4973_v57  ;;  %v902_v53 = vld [vmem:[#allocation5 + $0x19a8] sm:$0xff]  ;;  %v4991_v57 = vpack.c.bf16 %v871_v49, %v855_v46  ;;  %v4811_v46 = vpack.c.bf16 %v997_v24, %v981_v36  ;;  %v1144_v36 = vld [vmem:[#allocation5 + $0x2138] sm:$0xff] }
 0x16a   :  { %v4797_v59 = vpack.c.bf16 %v902_v53, %v886_v52  ;;  %v1013_v52 = vld [vmem:[#allocation5 + $0x1d20] sm:$0xff]  ;;  %v1160_v24 = vld [vmem:[#allocation5 + $0x21b8] sm:$0xff] }
 0x16b   :  { %4780 = vmatpush1.bf16.msra.mxu0 %v4779_v0  ;;  %v903_v0 = vld [vmem:[#allocation5 + $0x19b0] sm:$0xff]  ;;  %v1029_v53 = vld [vmem:[#allocation5 + $0x1da0] sm:$0xff]  ;;  %v5025_v45 = vpack.c.bf16 %v1160_v24, %v1144_v36 }
 0x16c   :  { %4976 = vmatpush1.bf16.msra.mxu1 %v4975_v1  ;;  %4782 = vmatprep.subr.bf16.mxu0 %v4781_v50  ;;  %v918_v1 = vld [vmem:[#allocation5 + $0x1a28] sm:$0xff]  ;;  %v1271_v36 = vld [vmem:[#allocation5 + $0x2530] sm:$0xff] }
 0x16d   :  { %4978 = vmatprep.subr.bf16.mxu1 %v4977_v4  ;;  %v934_v50 = vld [vmem:[#allocation5 + $0x1aa8] sm:$0xff]  ;;  %v4995_v4 = vpack.c.bf16 %v903_v0, %v887_v62  ;;  %v4815_v62 = vpack.c.bf16 %v1029_v53, %v1013_v52  ;;  %v1176_v52 = vld [vmem:[#allocation5 + $0x2238] sm:$0xff] }
 0x16e   :  { %v4801_v5 = vpack.c.bf16 %v934_v50, %v918_v1  ;;  %v1045_v1 = vld [vmem:[#allocation5 + $0x1e20] sm:$0xff]  ;;  %v1192_v53 = vld [vmem:[#allocation5 + $0x22b8] sm:$0xff] }
 0x16f   :  { %4784 = vmatpush1.bf16.msra.mxu0 %v4783_v11  ;;  %v935_v11 = vld [vmem:[#allocation5 + $0x1ab0] sm:$0xff]  ;;  %v1061_v50 = vld [vmem:[#allocation5 + $0x1ea0] sm:$0xff]  ;;  %v5029_v61 = vpack.c.bf16 %v1192_v53, %v1176_v52 }
 0x170   :  { %4980 = vmatpush1.bf16.msra.mxu1 %v4979_v12  ;;  %4786 = vmatprep.subr.bf16.mxu0 %v4785_v15  ;;  %v950_v12 = vld [vmem:[#allocation5 + $0x1b28] sm:$0xff]  ;;  %v1303_v52 = vld [vmem:[#allocation5 + $0x2630] sm:$0xff] }
 0x171   :  { %4982 = vmatprep.subr.bf16.mxu1 %v4981_v21  ;;  %v966_v15 = vld [vmem:[#allocation5 + $0x1ba8] sm:$0xff]  ;;  %v4999_v21 = vpack.c.bf16 %v935_v11, %v919_v9  ;;  %v4819_v9 = vpack.c.bf16 %v1061_v50, %v1045_v1  ;;  %v1208_v1 = vld [vmem:[#allocation5 + $0x2338] sm:$0xff] }
 0x172   :  { %v4805_v22 = vpack.c.bf16 %v966_v15, %v950_v12  ;;  %v1077_v12 = vld [vmem:[#allocation5 + $0x1f20] sm:$0xff]  ;;  %v1224_v50 = vld [vmem:[#allocation5 + $0x23b8] sm:$0xff] }
 0x173   :  { %4788 = vmatpush1.bf16.msra.mxu0 %v4787_v29  ;;  %v967_v29 = vld [vmem:[#allocation5 + $0x1bb0] sm:$0xff]  ;;  %v1093_v15 = vld [vmem:[#allocation5 + $0x1fa0] sm:$0xff]  ;;  %v5033_v7 = vpack.c.bf16 %v1224_v50, %v1208_v1 }
 0x174   :  { %4984 = vmatpush1.bf16.msra.mxu1 %v4983_v30  ;;  %4790 = vmatprep.subr.bf16.mxu0 %v4789_v31  ;;  %v982_v30 = vld [vmem:[#allocation5 + $0x1c28] sm:$0xff]  ;;  %v1335_v1 = vld [vmem:[#allocation5 + $0x2730] sm:$0xff] }
 0x175   :  { %4986 = vmatprep.subr.bf16.mxu1 %v4985_v34  ;;  %v998_v31 = vld [vmem:[#allocation5 + $0x1ca8] sm:$0xff]  ;;  %v5003_v34 = vpack.c.bf16 %v967_v29, %v951_v27  ;;  %v4823_v27 = vpack.c.bf16 %v1093_v15, %v1077_v12  ;;  %v1240_v12 = vld [vmem:[#allocation5 + $0x2438] sm:$0xff] }
 0x176   :  { %v4809_v35 = vpack.c.bf16 %v998_v31, %v982_v30  ;;  %v1109_v30 = vld [vmem:[#allocation5 + $0x2020] sm:$0xff]  ;;  %v1256_v15 = vld [vmem:[#allocation5 + $0x24b8] sm:$0xff] }
 0x177   :  { %4792 = vmatpush1.bf16.msra.mxu0 %v4791_v38  ;;  %v999_v38 = vld [vmem:[#allocation5 + $0x1cb0] sm:$0xff]  ;;  %v1125_v31 = vld [vmem:[#allocation5 + $0x20a0] sm:$0xff]  ;;  %v5037_v25 = vpack.c.bf16 %v1256_v15, %v1240_v12 }
 0x178   :  { %4988 = vmatpush1.bf16.msra.mxu1 %v4987_v41  ;;  %4794 = vmatprep.subr.bf16.mxu0 %v4793_v43  ;;  %v1014_v41 = vld [vmem:[#allocation5 + $0x1d28] sm:$0xff]  ;;  %v1367_v12 = vld [vmem:[#allocation5 + $0x2830] sm:$0xff] }
 0x179   :  { %4990 = vmatprep.subr.bf16.mxu1 %v4989_v47  ;;  %v1030_v43 = vld [vmem:[#allocation5 + $0x1da8] sm:$0xff]  ;;  %v5007_v47 = vpack.c.bf16 %v999_v38, %v983_v40  ;;  %v4827_v40 = vpack.c.bf16 %v1125_v31, %v1109_v30  ;;  %v1272_v30 = vld [vmem:[#allocation5 + $0x2538] sm:$0xff] }
 0x17a   :  { %v4813_v49 = vpack.c.bf16 %v1030_v43, %v1014_v41  ;;  %v1141_v41 = vld [vmem:[#allocation5 + $0x2120] sm:$0xff]  ;;  %v1288_v31 = vld [vmem:[#allocation5 + $0x25b8] sm:$0xff] }
 0x17b   :  { %4796 = vmatpush1.bf16.msra.mxu0 %v4795_v56  ;;  %v1031_v56 = vld [vmem:[#allocation5 + $0x1db0] sm:$0xff]  ;;  %v1157_v43 = vld [vmem:[#allocation5 + $0x21a0] sm:$0xff]  ;;  %v5041_v24 = vpack.c.bf16 %v1288_v31, %v1272_v30 }
 0x17c   :  { %4992 = vmatpush1.bf16.msra.mxu1 %v4991_v57  ;;  %4798 = vmatprep.subr.bf16.mxu0 %v4797_v59  ;;  %v1046_v57 = vld [vmem:[#allocation5 + $0x1e28] sm:$0xff]  ;;  %v1399_v30 = vld [vmem:[#allocation5 + $0x2930] sm:$0xff] }
 0x17d   :  { %4994 = vmatprep.subr.bf16.mxu1 %v4993_v63  ;;  %v1062_v59 = vld [vmem:[#allocation5 + $0x1ea8] sm:$0xff]  ;;  %v5011_v63 = vpack.c.bf16 %v1031_v56, %v1015_v54  ;;  %v4831_v54 = vpack.c.bf16 %v1157_v43, %v1141_v41  ;;  %v1304_v41 = vld [vmem:[#allocation5 + $0x2638] sm:$0xff] }
 0x17e   :  { %v4817_v0 = vpack.c.bf16 %v1062_v59, %v1046_v57  ;;  %v1173_v57 = vld [vmem:[#allocation5 + $0x2220] sm:$0xff]  ;;  %v1320_v43 = vld [vmem:[#allocation5 + $0x26b8] sm:$0xff] }
 0x17f   :  { %4800 = vmatpush1.bf16.msra.mxu0 %v4799_v3  ;;  %v1063_v3 = vld [vmem:[#allocation5 + $0x1eb0] sm:$0xff]  ;;  %v1189_v59 = vld [vmem:[#allocation5 + $0x22a0] sm:$0xff]  ;;  %v5045_v53 = vpack.c.bf16 %v1320_v43, %v1304_v41 }
 0x180   :  { %4996 = vmatpush1.bf16.msra.mxu1 %v4995_v4  ;;  %4802 = vmatprep.subr.bf16.mxu0 %v4801_v5  ;;  %v1078_v4 = vld [vmem:[#allocation5 + $0x1f28] sm:$0xff]  ;;  %v1431_v41 = vld [vmem:[#allocation5 + $0x2a30] sm:$0xff] }
 0x181   :  { %4998 = vmatprep.subr.bf16.mxu1 %v4997_v10  ;;  %v1094_v5 = vld [vmem:[#allocation5 + $0x1fa8] sm:$0xff]  ;;  %v5015_v10 = vpack.c.bf16 %v1063_v3, %v1047_v51  ;;  %v4835_v51 = vpack.c.bf16 %v1189_v59, %v1173_v57  ;;  %v1336_v57 = vld [vmem:[#allocation5 + $0x2738] sm:$0xff] }
 0x182   :  { %v4821_v11 = vpack.c.bf16 %v1094_v5, %v1078_v4  ;;  %v1205_v4 = vld [vmem:[#allocation5 + $0x2320] sm:$0xff]  ;;  %v1352_v59 = vld [vmem:[#allocation5 + $0x27b8] sm:$0xff] }
 0x183   :  { %4804 = vmatpush1.bf16.msra.mxu0 %v4803_v20  ;;  %v1095_v20 = vld [vmem:[#allocation5 + $0x1fb0] sm:$0xff]  ;;  %v1221_v5 = vld [vmem:[#allocation5 + $0x23a0] sm:$0xff]  ;;  %v5049_v50 = vpack.c.bf16 %v1352_v59, %v1336_v57 }
 0x184   :  { %5000 = vmatpush1.bf16.msra.mxu1 %v4999_v21  ;;  %4806 = vmatprep.subr.bf16.mxu0 %v4805_v22  ;;  %v1110_v21 = vld [vmem:[#allocation5 + $0x2028] sm:$0xff]  ;;  %v1463_v57 = vld [vmem:[#allocation5 + $0x2b30] sm:$0xff] }
 0x185   :  { %5002 = vmatprep.subr.bf16.mxu1 %v5001_v28  ;;  %v1126_v22 = vld [vmem:[#allocation5 + $0x20a8] sm:$0xff]  ;;  %v5019_v28 = vpack.c.bf16 %v1095_v20, %v1079_v16  ;;  %v4839_v16 = vpack.c.bf16 %v1221_v5, %v1205_v4  ;;  %v1368_v4 = vld [vmem:[#allocation5 + $0x2838] sm:$0xff] }
 0x186   :  { %v4825_v29 = vpack.c.bf16 %v1126_v22, %v1110_v21  ;;  %v1237_v21 = vld [vmem:[#allocation5 + $0x2420] sm:$0xff]  ;;  %v1384_v5 = vld [vmem:[#allocation5 + $0x28b8] sm:$0xff] }
 0x187   :  { %4808 = vmatpush1.bf16.msra.mxu0 %v4807_v33  ;;  %v1127_v33 = vld [vmem:[#allocation5 + $0x20b0] sm:$0xff]  ;;  %v1253_v22 = vld [vmem:[#allocation5 + $0x24a0] sm:$0xff]  ;;  %v5053_v15 = vpack.c.bf16 %v1384_v5, %v1368_v4 }
 0x188   :  { %5004 = vmatpush1.bf16.msra.mxu1 %v5003_v34  ;;  %4810 = vmatprep.subr.bf16.mxu0 %v4809_v35  ;;  %v1142_v34 = vld [vmem:[#allocation5 + $0x2128] sm:$0xff]  ;;  %v1495_v4 = vld [vmem:[#allocation5 + $0x2c30] sm:$0xff] }
 0x189   :  { %5006 = vmatprep.subr.bf16.mxu1 %v5005_v37  ;;  %v1158_v35 = vld [vmem:[#allocation5 + $0x21a8] sm:$0xff]  ;;  %v5023_v37 = vpack.c.bf16 %v1127_v33, %v1111_v14  ;;  %v4843_v14 = vpack.c.bf16 %v1253_v22, %v1237_v21  ;;  %v1400_v21 = vld [vmem:[#allocation5 + $0x2938] sm:$0xff] }
 0x18a   :  { %v4829_v38 = vpack.c.bf16 %v1158_v35, %v1142_v34  ;;  %v1269_v34 = vld [vmem:[#allocation5 + $0x2520] sm:$0xff]  ;;  %v1416_v22 = vld [vmem:[#allocation5 + $0x29b8] sm:$0xff] }
 0x18b   :  { %4812 = vmatpush1.bf16.msra.mxu0 %v4811_v46  ;;  %v1159_v46 = vld [vmem:[#allocation5 + $0x21b0] sm:$0xff]  ;;  %v1285_v35 = vld [vmem:[#allocation5 + $0x25a0] sm:$0xff]  ;;  %v5057_v31 = vpack.c.bf16 %v1416_v22, %v1400_v21 }
 0x18c   :  { %5008 = vmatpush1.bf16.msra.mxu1 %v5007_v47  ;;  %4814 = vmatprep.subr.bf16.mxu0 %v4813_v49  ;;  %v1174_v47 = vld [vmem:[#allocation5 + $0x2228] sm:$0xff]  ;;  %v1527_v21 = vld [vmem:[#allocation5 + $0x2d30] sm:$0xff] }
 0x18d   :  { %5010 = vmatprep.subr.bf16.mxu1 %v5009_v55  ;;  %v1190_v49 = vld [vmem:[#allocation5 + $0x22a8] sm:$0xff]  ;;  %v5027_v55 = vpack.c.bf16 %v1159_v46, %v1143_v44  ;;  %v4847_v44 = vpack.c.bf16 %v1285_v35, %v1269_v34  ;;  %v1432_v34 = vld [vmem:[#allocation5 + $0x2a38] sm:$0xff] }
 0x18e   :  { %v4833_v56 = vpack.c.bf16 %v1190_v49, %v1174_v47  ;;  %v1301_v47 = vld [vmem:[#allocation5 + $0x2620] sm:$0xff]  ;;  %v1448_v35 = vld [vmem:[#allocation5 + $0x2ab8] sm:$0xff] }
 0x18f   :  { %4816 = vmatpush1.bf16.msra.mxu0 %v4815_v62  ;;  %v1191_v62 = vld [vmem:[#allocation5 + $0x22b0] sm:$0xff]  ;;  %v1317_v49 = vld [vmem:[#allocation5 + $0x26a0] sm:$0xff]  ;;  %v5061_v43 = vpack.c.bf16 %v1448_v35, %v1432_v34 }
 0x190   :  { %5012 = vmatpush1.bf16.msra.mxu1 %v5011_v63  ;;  %4818 = vmatprep.subr.bf16.mxu0 %v4817_v0  ;;  %v1206_v63 = vld [vmem:[#allocation5 + $0x2328] sm:$0xff]  ;;  %v1559_v34 = vld [vmem:[#allocation5 + $0x2e30] sm:$0xff] }
 0x191   :  { %5014 = vmatprep.subr.bf16.mxu1 %v5013_v2  ;;  %v1222_v0 = vld [vmem:[#allocation5 + $0x23a8] sm:$0xff]  ;;  %v5031_v2 = vpack.c.bf16 %v1191_v62, %v1175_v60  ;;  %v4851_v60 = vpack.c.bf16 %v1317_v49, %v1301_v47  ;;  %v1464_v47 = vld [vmem:[#allocation5 + $0x2b38] sm:$0xff] }
 0x192   :  { %v4837_v3 = vpack.c.bf16 %v1222_v0, %v1206_v63  ;;  %v1333_v63 = vld [vmem:[#allocation5 + $0x2720] sm:$0xff]  ;;  %v1480_v49 = vld [vmem:[#allocation5 + $0x2bb8] sm:$0xff] }
 0x193   :  { %4820 = vmatpush1.bf16.msra.mxu0 %v4819_v9  ;;  %v1223_v9 = vld [vmem:[#allocation5 + $0x23b0] sm:$0xff]  ;;  %v1349_v0 = vld [vmem:[#allocation5 + $0x27a0] sm:$0xff]  ;;  %v5065_v59 = vpack.c.bf16 %v1480_v49, %v1464_v47 }
 0x194   :  { %5016 = vmatpush1.bf16.msra.mxu1 %v5015_v10  ;;  %4822 = vmatprep.subr.bf16.mxu0 %v4821_v11  ;;  %v1238_v10 = vld [vmem:[#allocation5 + $0x2428] sm:$0xff]  ;;  %v1591_v47 = vld [vmem:[#allocation5 + $0x2f30] sm:$0xff] }
 0x195   :  { %5018 = vmatprep.subr.bf16.mxu1 %v5017_v17  ;;  %v1254_v11 = vld [vmem:[#allocation5 + $0x24a8] sm:$0xff]  ;;  %v5035_v17 = vpack.c.bf16 %v1223_v9, %v1207_v6  ;;  %v4855_v6 = vpack.c.bf16 %v1349_v0, %v1333_v63  ;;  %v1496_v63 = vld [vmem:[#allocation5 + $0x2c38] sm:$0xff] }
 0x196   :  { %v4841_v20 = vpack.c.bf16 %v1254_v11, %v1238_v10  ;;  %v1365_v10 = vld [vmem:[#allocation5 + $0x2820] sm:$0xff]  ;;  %v1512_v0 = vld [vmem:[#allocation5 + $0x2cb8] sm:$0xff] }
 0x197   :  { %4824 = vmatpush1.bf16.msra.mxu0 %v4823_v27  ;;  %v1255_v27 = vld [vmem:[#allocation5 + $0x24b0] sm:$0xff]  ;;  %v1381_v11 = vld [vmem:[#allocation5 + $0x28a0] sm:$0xff]  ;;  %v5069_v5 = vpack.c.bf16 %v1512_v0, %v1496_v63 }
 0x198   :  { %5020 = vmatpush1.bf16.msra.mxu1 %v5019_v28  ;;  %4826 = vmatprep.subr.bf16.mxu0 %v4825_v29  ;;  %v1270_v28 = vld [vmem:[#allocation5 + $0x2528] sm:$0xff]  ;;  %v1623_v0 = vld [vmem:[#allocation5 + $0x3030] sm:$0xff] }
 0x199   :  { %5022 = vmatprep.subr.bf16.mxu1 %v5021_v32  ;;  %v1286_v29 = vld [vmem:[#allocation5 + $0x25a8] sm:$0xff]  ;;  %v5039_v32 = vpack.c.bf16 %v1255_v27, %v1239_v23  ;;  %v4859_v23 = vpack.c.bf16 %v1381_v11, %v1365_v10  ;;  %v1528_v10 = vld [vmem:[#allocation5 + $0x2d38] sm:$0xff] }
 0x19a   :  { %2525 = vmatmul.mubr.f32.vlgmr.msra.gmra.mrb[2].mxu0 %v6183_v48  ;;  %v4845_v33 = vpack.c.bf16 %v1286_v29, %v1270_v28  ;;  %v1397_v28 = vld [vmem:[#allocation5 + $0x2920] sm:$0xff]  ;;  %v1544_v11 = vld [vmem:[#allocation5 + $0x2db8] sm:$0xff] }
 0x19b   :  { %4828 = vmatpush1.bf16.msra.mxu0 %v4827_v40  ;;  %2809 = vmatmul.mubr.f32.vlgmr.msra.gmra.mrb[2].mxu1 %v6183_v48  ;;  %v1287_v40 = vld [vmem:[#allocation5 + $0x25b0] sm:$0xff]  ;;  %v1413_v29 = vld [vmem:[#allocation5 + $0x29a0] sm:$0xff]  ;;  %v5073_v22 = vpack.c.bf16 %v1544_v11, %v1528_v10 }
 0x19c   :  { %5024 = vmatpush1.bf16.msra.mxu1 %v5023_v37  ;;  %4830 = vmatprep.subr.bf16.mxu0 %v4829_v38  ;;  %v1302_v37 = vld [vmem:[#allocation5 + $0x2628] sm:$0xff]  ;;  %v105_v10 = vld [vmem:[#allocation5 + $0xc0] sm:$0xff]  ;;  %v91_v11 = vld [vmem:[#allocation5 + $0x50] sm:$0xff] }
 0x19d   :  { %5026 = vmatprep.subr.bf16.mxu1 %v5025_v45  ;;  %2595 = vmatprep.mubr.f32.mxu0 %v6195_v18  ;;  %v1318_v38 = vld [vmem:[#allocation5 + $0x26a8] sm:$0xff]  ;;  %v5043_v45 = vpack.c.bf16 %v1287_v40, %v1271_v36  ;;  %v4863_v36 = vpack.c.bf16 %v1413_v29, %v1397_v28  ;;  %v1560_v28 = vld [vmem:[#allocation5 + $0x2e38] sm:$0xff] }
 0x19e   :  { %2879 = vmatprep.mubr.f32.mxu1 %v6195_v18  ;;  %v4849_v46 = vpack.c.bf16 %v1318_v38, %v1302_v37  ;;  %v1429_v37 = vld [vmem:[#allocation5 + $0x2a20] sm:$0xff]  ;;  %v1576_v29 = vld [vmem:[#allocation5 + $0x2eb8] sm:$0xff] }
 0x19f   :  { %4832 = vmatpush1.bf16.msra.mxu0 %v4831_v54  ;;  %v1319_v54 = vld [vmem:[#allocation5 + $0x26b0] sm:$0xff]  ;;  %v1445_v38 = vld [vmem:[#allocation5 + $0x2aa0] sm:$0xff]  ;;  %v5077_v35 = vpack.c.bf16 %v1576_v29, %v1560_v28 }
 0x1a0   :  { %5028 = vmatpush1.bf16.msra.mxu1 %v5027_v55  ;;  %4834 = vmatprep.subr.bf16.mxu0 %v4833_v56  ;;  %v1334_v55 = vld [vmem:[#allocation5 + $0x2728] sm:$0xff]  ;;  %v123_v28 = vld [vmem:[#allocation5 + $0x150] sm:$0xff] }
 0x1a1   :  { %5030 = vmatprep.subr.bf16.mxu1 %v5029_v61  ;;  %v1350_v56 = vld [vmem:[#allocation5 + $0x27a8] sm:$0xff]  ;;  %v5047_v61 = vpack.c.bf16 %v1319_v54, %v1303_v52  ;;  %v4867_v52 = vpack.c.bf16 %v1445_v38, %v1429_v37  ;;  %v1592_v37 = vld [vmem:[#allocation5 + $0x2f38] sm:$0xff] }
 0x1a2   :  { %v4853_v62 = vpack.c.bf16 %v1350_v56, %v1334_v55  ;;  %v1461_v55 = vld [vmem:[#allocation5 + $0x2b20] sm:$0xff]  ;;  %v1608_v38 = vld [vmem:[#allocation5 + $0x2fb8] sm:$0xff] }
 0x1a3   :  { %4836 = vmatpush1.bf16.msra.mxu0 %v4835_v51  ;;  %v1351_v51 = vld [vmem:[#allocation5 + $0x27b0] sm:$0xff]  ;;  %v1477_v56 = vld [vmem:[#allocation5 + $0x2ba0] sm:$0xff]  ;;  %v5081_v49 = vpack.c.bf16 %v1608_v38, %v1592_v37 }
 0x1a4   :  { %5032 = vmatpush1.bf16.msra.mxu1 %v5031_v2  ;;  %4838 = vmatprep.subr.bf16.mxu0 %v4837_v3  ;;  %v1366_v2 = vld [vmem:[#allocation5 + $0x2828] sm:$0xff]  ;;  %v155_v37 = vld [vmem:[#allocation5 + $0x250] sm:$0xff] }
 0x1a5   :  { %5034 = vmatprep.subr.bf16.mxu1 %v5033_v7  ;;  %v1382_v3 = vld [vmem:[#allocation5 + $0x28a8] sm:$0xff]  ;;  %v5051_v7 = vpack.c.bf16 %v1351_v51, %v1335_v1  ;;  %v4871_v1 = vpack.c.bf16 %v1477_v56, %v1461_v55  ;;  %v1624_v55 = vld [vmem:[#allocation5 + $0x3038] sm:$0xff] }
 0x1a6   :  { %v4857_v9 = vpack.c.bf16 %v1382_v3, %v1366_v2  ;;  %v1493_v2 = vld [vmem:[#allocation5 + $0x2c20] sm:$0xff]  ;;  %v1640_v56 = vld [vmem:[#allocation5 + $0x30b8] sm:$0xff] }
 0x1a7   :  { %4840 = vmatpush1.bf16.msra.mxu0 %v4839_v16  ;;  %v1383_v16 = vld [vmem:[#allocation5 + $0x28b0] sm:$0xff]  ;;  %v1509_v3 = vld [vmem:[#allocation5 + $0x2ca0] sm:$0xff]  ;;  %v5085_v63 = vpack.c.bf16 %v1640_v56, %v1624_v55 }
 0x1a8   :  { %5036 = vmatpush1.bf16.msra.mxu1 %v5035_v17  ;;  %4842 = vmatprep.subr.bf16.mxu0 %v4841_v20  ;;  %v1398_v17 = vld [vmem:[#allocation5 + $0x2928] sm:$0xff] }
 0x1a9   :  { %5038 = vmatprep.subr.bf16.mxu1 %v5037_v25  ;;  %v1414_v20 = vld [vmem:[#allocation5 + $0x29a8] sm:$0xff]  ;;  %v5055_v25 = vpack.c.bf16 %v1383_v16, %v1367_v12  ;;  %v4875_v12 = vpack.c.bf16 %v1509_v3, %v1493_v2  ;;  %v92_v3 = vld [vmem:[#allocation5 + $0x58] sm:$0xff] }
 0x1aa   :  { %v4861_v27 = vpack.c.bf16 %v1414_v20, %v1398_v17  ;;  %v1525_v17 = vld [vmem:[#allocation5 + $0x2d20] sm:$0xff] }
 0x1ab   :  { %4844 = vmatpush1.bf16.msra.mxu0 %v4843_v14  ;;  %v1415_v14 = vld [vmem:[#allocation5 + $0x29b0] sm:$0xff]  ;;  %v1541_v20 = vld [vmem:[#allocation5 + $0x2da0] sm:$0xff] }
 0x1ac   :  { %5040 = vmatpush1.bf16.msra.mxu1 %v5039_v32  ;;  %4846 = vmatprep.subr.bf16.mxu0 %v4845_v33  ;;  %v1430_v32 = vld [vmem:[#allocation5 + $0x2a28] sm:$0xff] }
 0x1ad   :  { %5042 = vmatprep.subr.bf16.mxu1 %v5041_v24  ;;  %v1446_v33 = vld [vmem:[#allocation5 + $0x2aa8] sm:$0xff]  ;;  %v5059_v24 = vpack.c.bf16 %v1415_v14, %v1399_v30  ;;  %v4879_v30 = vpack.c.bf16 %v1541_v20, %v1525_v17  ;;  %v124_v17 = vld [vmem:[#allocation5 + $0x158] sm:$0xff] }
 0x1ae   :  { %v4865_v40 = vpack.c.bf16 %v1446_v33, %v1430_v32  ;;  %v1557_v32 = vld [vmem:[#allocation5 + $0x2e20] sm:$0xff]  ;;  %v140_v20 = vld [vmem:[#allocation5 + $0x1d8] sm:$0xff] }
 0x1af   :  { %4848 = vmatpush1.bf16.msra.mxu0 %v4847_v44  ;;  %v1447_v44 = vld [vmem:[#allocation5 + $0x2ab0] sm:$0xff]  ;;  %v1573_v33 = vld [vmem:[#allocation5 + $0x2ea0] sm:$0xff]  ;;  %v5289_v29 = vpack.c.bf16 %v140_v20, %v124_v17 }
 0x1b0   :  { %5044 = vmatpush1.bf16.msra.mxu1 %v5043_v45  ;;  %4850 = vmatprep.subr.bf16.mxu0 %v4849_v46  ;;  %v1462_v45 = vld [vmem:[#allocation5 + $0x2b28] sm:$0xff]  ;;  %v235_v20 = vld [vmem:[#allocation5 + $0x4d0] sm:$0xff] }
 0x1b1   :  { %5046 = vmatprep.subr.bf16.mxu1 %v5045_v53  ;;  %v1478_v46 = vld [vmem:[#allocation5 + $0x2ba8] sm:$0xff]  ;;  %v5063_v53 = vpack.c.bf16 %v1447_v44, %v1431_v41  ;;  %v4883_v41 = vpack.c.bf16 %v1573_v33, %v1557_v32  ;;  %v156_v32 = vld [vmem:[#allocation5 + $0x258] sm:$0xff] }
 0x1b2   :  { %v4869_v54 = vpack.c.bf16 %v1478_v46, %v1462_v45  ;;  %v1589_v45 = vld [vmem:[#allocation5 + $0x2f20] sm:$0xff]  ;;  %v172_v33 = vld [vmem:[#allocation5 + $0x2d8] sm:$0xff] }
 0x1b3   :  { %4852 = vmatpush1.bf16.msra.mxu0 %v4851_v60  ;;  %v1479_v60 = vld [vmem:[#allocation5 + $0x2bb0] sm:$0xff]  ;;  %v1605_v46 = vld [vmem:[#allocation5 + $0x2fa0] sm:$0xff]  ;;  %v5293_v38 = vpack.c.bf16 %v172_v33, %v156_v32 }
 0x1b4   :  { %5048 = vmatpush1.bf16.msra.mxu1 %v5047_v61  ;;  %4854 = vmatprep.subr.bf16.mxu0 %v4853_v62  ;;  %v1494_v61 = vld [vmem:[#allocation5 + $0x2c28] sm:$0xff] }
 0x1b5   :  { %5050 = vmatprep.subr.bf16.mxu1 %v5049_v50  ;;  %v1510_v62 = vld [vmem:[#allocation5 + $0x2ca8] sm:$0xff]  ;;  %v5067_v50 = vpack.c.bf16 %v1479_v60, %v1463_v57  ;;  %v4887_v57 = vpack.c.bf16 %v1605_v46, %v1589_v45  ;;  %v188_v45 = vld [vmem:[#allocation5 + $0x358] sm:$0xff] }
 0x1b6   :  { %v4873_v51 = vpack.c.bf16 %v1510_v62, %v1494_v61  ;;  %v1621_v61 = vld [vmem:[#allocation5 + $0x3020] sm:$0xff]  ;;  %v204_v46 = vld [vmem:[#allocation5 + $0x3d8] sm:$0xff] }
 0x1b7   :  { %4856 = vmatpush1.bf16.msra.mxu0 %v4855_v6  ;;  %v1511_v6 = vld [vmem:[#allocation5 + $0x2cb0] sm:$0xff]  ;;  %v1637_v62 = vld [vmem:[#allocation5 + $0x30a0] sm:$0xff] }
 0x1b8   :  { %5052 = vmatpush1.bf16.msra.mxu1 %v5051_v7  ;;  %4858 = vmatprep.subr.bf16.mxu0 %v4857_v9  ;;  %v1526_v7 = vld [vmem:[#allocation5 + $0x2d28] sm:$0xff]  ;;  %v4891_v2 = vpack.c.bf16 %v1637_v62, %v1621_v61  ;;  %v6245_v61 = vsub.s32 3, %v6146_v8  ;;  %v5297_v62 = vpack.c.bf16 %v204_v46, %v188_v45 }
 0x1b9   :  { %5054 = vmatprep.subr.bf16.mxu1 %v5053_v15  ;;  %v1542_v9 = vld [vmem:[#allocation5 + $0x2da8] sm:$0xff]  ;;  %v5071_v15 = vpack.c.bf16 %v1511_v6, %v1495_v4  ;;  %v108_v4 = vld [vmem:[#allocation5 + $0xd8] sm:$0xff] }
 0x1ba   :  { %v4877_v16 = vpack.c.bf16 %v1542_v9, %v1526_v7  ;;  %v5285_v7 = vpack.c.bf16 %v108_v4, %v92_v3  ;;  %v89_v9 = vld [vmem:[#allocation5 + $0x40] sm:$0xff] }
 0x1bb   :  { %4860 = vmatpush1.bf16.msra.mxu0 %v4859_v23  ;;  %v1543_v23 = vld [vmem:[#allocation5 + $0x2db0] sm:$0xff] }
 0x1bc   :  { %5056 = vmatpush1.bf16.msra.mxu1 %v5055_v25  ;;  %4862 = vmatprep.subr.bf16.mxu0 %v4861_v27  ;;  %v1558_v25 = vld [vmem:[#allocation5 + $0x2e28] sm:$0xff] }
 0x1bd   :  { %5058 = vmatprep.subr.bf16.mxu1 %v5057_v31  ;;  %v1574_v27 = vld [vmem:[#allocation5 + $0x2ea8] sm:$0xff]  ;;  %v5075_v31 = vpack.c.bf16 %v1543_v23, %v1527_v21  ;;  %v5091_v21 = vpack.c.bf16 %v105_v10, %v89_v9 }
 0x1be   :  { %v4881_v14 = vpack.c.bf16 %v1574_v27, %v1558_v25  ;;  %v121_v25 = vld [vmem:[#allocation5 + $0x140] sm:$0xff] }
 0x1bf   :  { %4864 = vmatpush1.bf16.msra.mxu0 %v4863_v36  ;;  %v1575_v36 = vld [vmem:[#allocation5 + $0x2eb0] sm:$0xff]  ;;  %v137_v27 = vld [vmem:[#allocation5 + $0x1c0] sm:$0xff] }
 0x1c0   :  { %5060 = vmatpush1.bf16.msra.mxu1 %v5059_v24  ;;  %4866 = vmatprep.subr.bf16.mxu0 %v4865_v40  ;;  %v1590_v24 = vld [vmem:[#allocation5 + $0x2f28] sm:$0xff] }
 0x1c1   :  { %5062 = vmatprep.subr.bf16.mxu1 %v5061_v43  ;;  %v1606_v40 = vld [vmem:[#allocation5 + $0x2fa8] sm:$0xff]  ;;  %v5079_v43 = vpack.c.bf16 %v1575_v36, %v1559_v34  ;;  %v5095_v34 = vpack.c.bf16 %v137_v27, %v121_v25 }
 0x1c2   :  { %v4885_v44 = vpack.c.bf16 %v1606_v40, %v1590_v24  ;;  %v153_v24 = vld [vmem:[#allocation5 + $0x240] sm:$0xff] }
 0x1c3   :  { %4868 = vmatpush1.bf16.msra.mxu0 %v4867_v52  ;;  %v1607_v52 = vld [vmem:[#allocation5 + $0x2fb0] sm:$0xff]  ;;  %v169_v40 = vld [vmem:[#allocation5 + $0x2c0] sm:$0xff] }
 0x1c4   :  { %5064 = vmatpush1.bf16.msra.mxu1 %v5063_v53  ;;  %4870 = vmatprep.subr.bf16.mxu0 %v4869_v54  ;;  %v1622_v53 = vld [vmem:[#allocation5 + $0x3028] sm:$0xff] }
 0x1c5   :  { %5066 = vmatprep.subr.bf16.mxu1 %v5065_v59  ;;  %v1638_v54 = vld [vmem:[#allocation5 + $0x30a8] sm:$0xff]  ;;  %v5083_v59 = vpack.c.bf16 %v1607_v52, %v1591_v47  ;;  %v6235_v47 = vsub.s32 0, %v6146_v8  ;;  %v1649_v52 = vld [vmem:[#allocation7] sm:$0xff] }
 0x1c6   :  { %v4889_v60 = vpack.c.bf16 %v1638_v54, %v1622_v53  ;;  %v6239_v53 = vsub.s32 2, %v6146_v8  ;;  %v6242_v54 = vsub.s32 1, %v6146_v8  ;;  %v1668_v10 = vrot.slane %v1649_v52, %v6245_v61 }
 0x1c7   :  { %4872 = vmatpush1.bf16.msra.mxu0 %v4871_v1  ;;  %v1639_v1 = vld [vmem:[#allocation5 + $0x30b0] sm:$0xff] }
 0x1c8   :  { %5068 = vmatpush1.bf16.msra.mxu1 %v5067_v50  ;;  %4874 = vmatprep.subr.bf16.mxu0 %v4873_v51  ;;  %v90_v50 = vld [vmem:[#allocation5 + $0x48] sm:$0xff]  ;;  %v1664_v3 = vrot.slane %v1649_v52, %v6239_v53 }
 0x1c9   :  { %5070 = vmatprep.subr.bf16.mxu1 %v5069_v5  ;;  %v106_v51 = vld [vmem:[#allocation5 + $0xc8] sm:$0xff]  ;;  %v5087_v5 = vpack.c.bf16 %v1639_v1, %v1623_v0 }
 0x1ca   :  { %v5089_v6 = vpack.c.bf16 %v106_v51, %v90_v50  ;;  %v218_v0 = vld [vmem:[#allocation5 + $0x448] sm:$0xff]  ;;  %v1656_v50 = vrot.slane %v1649_v52, %v6235_v47  ;;  %v220_v51 = vld [vmem:[#allocation5 + $0x458] sm:$0xff] }
 0x1cb   :  { %4876 = vmatpush1.bf16.msra.mxu0 %v4875_v12  ;;  %v107_v12 = vld [vmem:[#allocation5 + $0xd0] sm:$0xff]  ;;  %v234_v1 = vld [vmem:[#allocation5 + $0x4c8] sm:$0xff] }
 0x1cc   :  { %5072 = vmatpush1.bf16.msra.mxu1 %v5071_v15  ;;  %4878 = vmatprep.subr.bf16.mxu0 %v4877_v16  ;;  %v122_v15 = vld [vmem:[#allocation5 + $0x148] sm:$0xff] }
 0x1cd   :  { %5074 = vmatprep.subr.bf16.mxu1 %v5073_v22  ;;  %v138_v16 = vld [vmem:[#allocation5 + $0x1c8] sm:$0xff]  ;;  %v5287_v22 = vpack.c.bf16 %v107_v12, %v91_v11  ;;  %v5105_v11 = vpack.c.bf16 %v234_v1, %v218_v0  ;;  %v233_v12 = vld [vmem:[#allocation5 + $0x4c0] sm:$0xff] }
 0x1ce   :  { %v5093_v23 = vpack.c.bf16 %v138_v16, %v122_v15  ;;  %v219_v15 = vld [vmem:[#allocation5 + $0x450] sm:$0xff] }
 0x1cf   :  { %4880 = vmatpush1.bf16.msra.mxu0 %v4879_v30  ;;  %v139_v30 = vld [vmem:[#allocation5 + $0x1d0] sm:$0xff] }
 0x1d0   :  { %5076 = vmatpush1.bf16.msra.mxu1 %v5075_v31  ;;  %4882 = vmatprep.subr.bf16.mxu0 %v4881_v14  ;;  %v154_v31 = vld [vmem:[#allocation5 + $0x248] sm:$0xff] }
 0x1d1   :  { %5078 = vmatprep.subr.bf16.mxu1 %v5077_v35  ;;  %v170_v14 = vld [vmem:[#allocation5 + $0x2c8] sm:$0xff]  ;;  %v5291_v35 = vpack.c.bf16 %v139_v30, %v123_v28  ;;  %v252_v28 = vld [vmem:[#allocation5 + $0x558] sm:$0xff] }
 0x1d2   :  { %v5097_v36 = vpack.c.bf16 %v170_v14, %v154_v31 }
 0x1d3   :  { %4884 = vmatpush1.bf16.msra.mxu0 %v4883_v41  ;;  %v171_v41 = vld [vmem:[#allocation5 + $0x2d0] sm:$0xff] }
 0x1d4   :  { %5080 = vmatpush1.bf16.msra.mxu1 %v5079_v43  ;;  %4886 = vmatprep.subr.bf16.mxu0 %v4885_v44  ;;  %v186_v43 = vld [vmem:[#allocation5 + $0x348] sm:$0xff]  ;;  %v5295_v55 = vpack.c.bf16 %v171_v41, %v155_v37  ;;  %v265_v37 = vld [vmem:[#allocation5 + $0x5c0] sm:$0xff]  ;;  %v267_v41 = vld [vmem:[#allocation5 + $0x5d0] sm:$0xff] }
 0x1d5   :  { %5082 = vmatprep.subr.bf16.mxu1 %v5081_v49  ;;  %v202_v44 = vld [vmem:[#allocation5 + $0x3c8] sm:$0xff]  ;;  %v5099_v49 = vpack.c.bf16 %v169_v40, %v153_v24  ;;  %v5303_v24 = vpack.c.bf16 %v235_v20, %v219_v15 }
 0x1d6   :  { %v5101_v56 = vpack.c.bf16 %v202_v44, %v186_v43  ;;  %v330_v15 = vld [vmem:[#allocation5 + $0x7c8] sm:$0xff] }
 0x1d7   :  { %4888 = vmatpush1.bf16.msra.mxu0 %v4887_v57  ;;  %v185_v57 = vld [vmem:[#allocation5 + $0x340] sm:$0xff] }
 0x1d8   :  { %5084 = vmatpush1.bf16.msra.mxu1 %v5083_v59  ;;  %4890 = vmatprep.subr.bf16.mxu0 %v4889_v60  ;;  %v201_v59 = vld [vmem:[#allocation5 + $0x3c0] sm:$0xff]  ;;  %v187_v60 = vld [vmem:[#allocation5 + $0x350] sm:$0xff] }
 0x1d9   :  { %5086 = vmatprep.subr.bf16.mxu1 %v5085_v63  ;;  %v203_v63 = vld [vmem:[#allocation5 + $0x3d0] sm:$0xff]  ;;  %v5103_v4 = vpack.c.bf16 %v201_v59, %v185_v57  ;;  %v284_v57 = vld [vmem:[#allocation5 + $0x658] sm:$0xff] }
 0x1da   :  { %2596 = vmatmul.mubr.f32.vlgmr.msra.gmra.mrb[2].mxu0 %v6201_v19  ;;  %v5299_v9 = vpack.c.bf16 %v203_v63, %v187_v60  ;;  %v300_v59 = vld [vmem:[#allocation5 + $0x6d8] sm:$0xff] }
 0x1db   :  { %2880 = vmatmul.mubr.f32.vlgmr.msra.gmra.mrb[2].mxu1 %v6201_v19  ;;  %4892 = vmatpush1.bf16.msra.mxu0 %v4891_v2  ;;  %v236_v2 = vld [vmem:[#allocation5 + $0x4d8] sm:$0xff] }
 0x1dc   :  { %5088 = vmatpush1.bf16.msra.mxu1 %v5087_v5  ;;  %2666 = vmatprep.mubr.f32.mxu0 %v6064_v13  ;;  %v1660_v5 = vrot.slane %v1649_v52, %v6242_v54  ;;  %v5301_v17 = vpack.c.bf16 %v236_v2, %v220_v51  ;;  %v298_v52 = vld [vmem:[#allocation5 + $0x6c8] sm:$0xff]  ;;  %v281_v2 = vld [vmem:[#allocation5 + $0x640] sm:$0xff] }
 0x1dd   :  { %2950 = vmatprep.mubr.f32.mxu1 %v6064_v13  ;;  %5090 = vmatprep.subr.bf16.mxu0 %v5089_v6  ;;  %v217_v6 = vld [vmem:[#allocation5 + $0x440] sm:$0xff] }
 0x1de   :  { %5286 = vmatprep.subr.bf16.mxu1 %v5285_v7  ;;  %v6250_v7 = vld [vmem:[#allocation8] sm:$0xff]  ;;  %v5107_v33 = vpack.c.bf16 %v233_v12, %v217_v6  ;;  %v314_v12 = vld [vmem:[#allocation5 + $0x748] sm:$0xff] }
 0x1df   :  { %v4132_v30 = vrot.slane %v6250_v7, %v6235_v47  ;;  %v4136_v45 = vrot.slane %v6250_v7, %v6242_v54 }
 0x1e2   :  { %4298 = vmatmul.mubr.msk.f32.vlgmr.msra.gmra.mrb[2].mxu0 %vm1818_vm0, %v6209_v39 }
 0x1e3   :  { %4299 = vmatmul.mubr.msk.f32.vlgmr.msra.gmra.mrb[2].mxu1 %vm1818_vm0, %v6209_v39  ;;  %5092 = vmatpush1.bf16.msra.mxu0 %v5091_v21  ;;  %v250_v21 = vld [vmem:[#allocation5 + $0x548] sm:$0xff] }
 0x1e4   :  { %5288 = vmatpush1.bf16.msra.mxu1 %v5287_v22  ;;  %5094 = vmatprep.subr.bf16.mxu0 %v5093_v23  ;;  %v266_v22 = vld [vmem:[#allocation5 + $0x5c8] sm:$0xff] }
 0x1e5   :  { %5290 = vmatprep.subr.bf16.mxu1 %v5289_v29  ;;  %3021 = vmatprep.mubr.f32.mxu0 %v6159_v42  ;;  %v268_v29 = vld [vmem:[#allocation5 + $0x5d8] sm:$0xff]  ;;  %v5109_v40 = vpack.c.bf16 %v266_v22, %v250_v21 }
 0x1e6   :  { %3305 = vmatprep.mubr.f32.mxu1 %v6159_v42  ;;  %v5305_v46 = vpack.c.bf16 %v268_v29, %v252_v28  ;;  %v329_v28 = vld [vmem:[#allocation5 + $0x7c0] sm:$0xff]  ;;  %v315_v29 = vld [vmem:[#allocation5 + $0x750] sm:$0xff] }
 0x1e7   :  { %5096 = vmatpush1.bf16.msra.mxu0 %v5095_v34  ;;  %v249_v34 = vld [vmem:[#allocation5 + $0x540] sm:$0xff] }
 0x1e8   :  { %5292 = vmatpush1.bf16.msra.mxu1 %v5291_v35  ;;  %5098 = vmatprep.subr.bf16.mxu0 %v5097_v36  ;;  %v5111_v0 = vpack.c.bf16 %v265_v37, %v249_v34  ;;  %v348_v34 = vld [vmem:[#allocation5 + $0x858] sm:$0xff] }
 0x1e9   :  { %5294 = vmatprep.subr.bf16.mxu1 %v5293_v38  ;;  %v251_v38 = vld [vmem:[#allocation5 + $0x550] sm:$0xff] }
 0x1eb   :  { %5100 = vmatpush1.bf16.msra.mxu0 %v5099_v49  ;;  %v282_v49 = vld [vmem:[#allocation5 + $0x648] sm:$0xff] }
 0x1ec   :  { %5296 = vmatpush1.bf16.msra.mxu1 %v5295_v55  ;;  %5102 = vmatprep.subr.bf16.mxu0 %v5101_v56  ;;  %v5113_v51 = vpack.c.bf16 %v298_v52, %v282_v49  ;;  %v394_v49 = vld [vmem:[#allocation5 + $0x9c8] sm:$0xff]  ;;  %v380_v52 = vld [vmem:[#allocation5 + $0x958] sm:$0xff] }
 0x1ed   :  { %5298 = vmatprep.subr.bf16.mxu1 %v5297_v62  ;;  %v2100_v16 = vpop.f32.mrb[0].mxu0  ;;  %v4140_v62 = vrot.slane %v6250_v7, %v6239_v53 }
 0x1ee   :  { %v5873_v23 = vadd.f32 %v2100_v16, %v1656_v50  ;;  %v2384_v25 = vpop.f32.mrb[0].mxu1  ;;  %v2102_v27 = vpop.f32.mrb[1].mxu0  ;;  %v5307_v50 = vpack.c.bf16 %v267_v41, %v251_v38  ;;  %v316_v16 = vld [vmem:[#allocation5 + $0x758] sm:$0xff]  ;;  %v345_v38 = vld [vmem:[#allocation5 + $0x840] sm:$0xff] }
 0x1ef   :  { %v5875_v31 = vadd.f32 %v2384_v25, %v1664_v3  ;;  %5104 = vmatpush1.bf16.msra.mxu0 %v5103_v4  ;;  %v5874_v14 = vadd.f32 %v2102_v27, %v1660_v5  ;;  %v2386_v32 = vpop.f32.mrb[1].mxu1  ;;  %v297_v3 = vld [vmem:[#allocation5 + $0x6c0] sm:$0xff]  ;;  %v283_v4 = vld [vmem:[#allocation5 + $0x650] sm:$0xff]  ;;  %v5117_v25 = vpack.c.bf16 %v330_v15, %v314_v12 }
 0x1f0   :  { %v4093_v35 = vmul.f32 0.01, %v5873_v23  ;;  %5300 = vmatpush1.bf16.msra.mxu1 %v5299_v9  ;;  %v5876_v36 = vadd.f32 %v2386_v32, %v1668_v10  ;;  %5106 = vmatprep.subr.bf16.mxu0 %v5105_v11  ;;  %v4144_v9 = vrot.slane %v6250_v7, %v6245_v61  ;;  %v5309_v10 = vpack.c.bf16 %v300_v59, %v284_v57  ;;  %v299_v11 = vld [vmem:[#allocation5 + $0x6d0] sm:$0xff]  ;;  %v313_v27 = vld [vmem:[#allocation5 + $0x740] sm:$0xff]  ;;  %v346_v32 = vld [vmem:[#allocation5 + $0x848] sm:$0xff] }
 0x1f1   :  { %v4095_v43 = vmul.f32 0.01, %v5875_v31  ;;  %v4094_v44 = vmul.f32 0.01, %v5874_v14  ;;  %5302 = vmatprep.subr.bf16.mxu1 %v5301_v17  ;;  %v332_v17 = vld [vmem:[#allocation5 + $0x7d8] sm:$0xff]  ;;  %v5115_v22 = vpack.c.bf16 %v297_v3, %v281_v2  ;;  %v361_v41 = vld [vmem:[#allocation5 + $0x8c0] sm:$0xff] }
 0x1f2   :  { %v4109_v55 = vmax.f32 %v5873_v23, %v4093_v35  ;;  %v4096_v56 = vmul.f32 0.01, %v5876_v36  ;;  %v5311_v23 = vpack.c.bf16 %v299_v11, %v283_v4  ;;  %v364_v35 = vld [vmem:[#allocation5 + $0x8d8] sm:$0xff]  ;;  %v411_v11 = vld [vmem:[#allocation5 + $0xa50] sm:$0xff] }
 0x1f3   :  { %v4111_v60 = vmax.f32 %v5875_v31, %v4095_v43  ;;  %v4110_v63 = vmax.f32 %v5874_v14, %v4094_v44  ;;  %5108 = vmatpush1.bf16.msra.mxu0 %v5107_v33  ;;  %v5313_v31 = vpack.c.bf16 %v332_v17, %v316_v16  ;;  %v331_v14 = vld [vmem:[#allocation5 + $0x7d0] sm:$0xff]  ;;  %v362_v33 = vld [vmem:[#allocation5 + $0x8c8] sm:$0xff]  ;;  %v5317_v44 = vpack.c.bf16 %v364_v35, %v348_v34  ;;  %v412_v2 = vld [vmem:[#allocation5 + $0xa58] sm:$0xff] }
 0x1f4   :  { %v4209_v1 = vmul.f32 %v4132_v30, %v4109_v55  ;;  %5304 = vmatpush1.bf16.msra.mxu1 %v5303_v24  ;;  %5110 = vmatprep.subr.bf16.mxu0 %v5109_v40  ;;  %v4112_v6 = vmax.f32 %v5876_v36, %v4096_v56  ;;  %v5119_v24 = vpack.c.bf16 %v329_v28, %v313_v27  ;;  %v347_v43 = vld [vmem:[#allocation5 + $0x850] sm:$0xff]  ;;  %v396_v55 = vld [vmem:[#allocation5 + $0x9d8] sm:$0xff]  ;;  %v442_v16 = vld [vmem:[#allocation5 + $0xb48] sm:$0xff] }
 0x1f5   :  { %v4210_v5 = vmul.f32 %v4136_v45, %v4110_v63  ;;  %5306 = vmatprep.subr.bf16.mxu1 %v5305_v46  ;;  %v4211_v20 = vmul.f32 %v4140_v62, %v4111_v60  ;;  %v5315_v40 = vpack.c.bf16 %v331_v14, %v315_v29  ;;  %v5121_v37 = vpack.c.bf16 %v362_v33, %v346_v32  ;;  %v363_v45 = vld [vmem:[#allocation5 + $0x8d0] sm:$0xff]  ;;  %v378_v46 = vld [vmem:[#allocation5 + $0x948] sm:$0xff]  ;;  %v377_v60 = vld [vmem:[#allocation5 + $0x940] sm:$0xff] }
 0x1f6   :  { %v4212_v30 = vmul.f32 %v4144_v9, %v4112_v6  ;;  %v5123_v56 = vpack.c.bf16 %v361_v41, %v345_v38  ;;  %v5319_v57 = vpack.c.bf16 %v363_v45, %v347_v43  ;;  %v5125_v59 = vpack.c.bf16 %v394_v49, %v378_v46  ;;  %v393_v62 = vld [vmem:[#allocation5 + $0x9c0] sm:$0xff]  ;;  %v379_v63 = vld [vmem:[#allocation5 + $0x950] sm:$0xff]  ;;  %v428_v3 = vld [vmem:[#allocation5 + $0xad8] sm:$0xff] }
 0x1f7   :  { %v4225_v21 = vadd.f32 %v4210_v5, %v4209_v1  ;;  %5112 = vmatpush1.bf16.msra.mxu0 %v5111_v0  ;;  %v5321_v0 = vpack.c.bf16 %v396_v55, %v380_v52  ;;  %v395_v1 = vld [vmem:[#allocation5 + $0x9d0] sm:$0xff]  ;;  %v5127_v4 = vpack.c.bf16 %v393_v62, %v377_v60  ;;  %v409_v9 = vld [vmem:[#allocation5 + $0xa40] sm:$0xff]  ;;  %v5325_v12 = vpack.c.bf16 %v428_v3, %v412_v2  ;;  %v458_v17 = vld [vmem:[#allocation5 + $0xbc8] sm:$0xff] }
 0x1f8   :  { %5308 = vmatpush1.bf16.msra.mxu1 %v5307_v50  ;;  %5114 = vmatprep.subr.bf16.mxu0 %v5113_v51  ;;  %v410_v50 = vld [vmem:[#allocation5 + $0xa48] sm:$0xff]  ;;  %v5323_v5 = vpack.c.bf16 %v395_v1, %v379_v63  ;;  %v427_v15 = vld [vmem:[#allocation5 + $0xad0] sm:$0xff]  ;;  %v441_v27 = vld [vmem:[#allocation5 + $0xb40] sm:$0xff] }
 0x1f9   :  { %v4226_v7 = vadd.f32 %v4225_v21, %v4211_v20  ;;  %5310 = vmatprep.subr.bf16.mxu1 %v5309_v10  ;;  %v426_v51 = vld [vmem:[#allocation5 + $0xac8] sm:$0xff]  ;;  %v425_v10 = vld [vmem:[#allocation5 + $0xac0] sm:$0xff]  ;;  %v444_v20 = vld [vmem:[#allocation5 + $0xb58] sm:$0xff] }
 0x1fa   :  { %v5129_v6 = vpack.c.bf16 %v426_v51, %v410_v50  ;;  %v460_v21 = vld [vmem:[#allocation5 + $0xbd8] sm:$0xff]  ;;  %v457_v28 = vld [vmem:[#allocation5 + $0xbc0] sm:$0xff]  ;;  %v443_v29 = vld [vmem:[#allocation5 + $0xb50] sm:$0xff] }
 0x1fb   :  { %v6261_v36 = vadd.f32 %v4226_v7, %v4212_v30  ;;  %5116 = vmatpush1.bf16.msra.mxu0 %v5115_v22  ;;  %v5131_v22 = vpack.c.bf16 %v425_v10, %v409_v9  ;;  %v5329_v30 = vpack.c.bf16 %v460_v21, %v444_v20  ;;  %v459_v7 = vld [vmem:[#allocation5 + $0xbd0] sm:$0xff]  ;;  %v490_v14 = vld [vmem:[#allocation5 + $0xcc8] sm:$0xff]  ;;  %v476_v32 = vld [vmem:[#allocation5 + $0xc58] sm:$0xff]  ;;  %v5135_v34 = vpack.c.bf16 %v457_v28, %v441_v27 }
 0x1fc   :  { %5312 = vmatpush1.bf16.msra.mxu1 %v5311_v23  ;;  %5118 = vmatprep.subr.bf16.mxu0 %v5117_v25  ;;  %v5327_v23 = vpack.c.bf16 %v427_v15, %v411_v11  ;;  %v5133_v25 = vpack.c.bf16 %v458_v17, %v442_v16  ;;  %v492_v33 = vld [vmem:[#allocation5 + $0xcd8] sm:$0xff]  ;;  %v5331_v35 = vpack.c.bf16 %v459_v7, %v443_v29  ;;  %v475_v38 = vld [vmem:[#allocation5 + $0xc50] sm:$0xff]  ;;  %v522_v45 = vld [vmem:[#allocation5 + $0xdc8] sm:$0xff] }
 0x1fd   :  { %5314 = vmatprep.subr.bf16.mxu1 %v5313_v31  ;;  %v474_v31 = vld [vmem:[#allocation5 + $0xc48] sm:$0xff]  ;;  %v5333_v41 = vpack.c.bf16 %v492_v33, %v476_v32  ;;  %v491_v43 = vld [vmem:[#allocation5 + $0xcd0] sm:$0xff]  ;;  %v508_v46 = vld [vmem:[#allocation5 + $0xd58] sm:$0xff] }
 0x1fe   :  { %v524_v49 = vld [vmem:[#allocation5 + $0xdd8] sm:$0xff]  ;;  %v5335_v55 = vpack.c.bf16 %v491_v43, %v475_v38  ;;  %v507_v60 = vld [vmem:[#allocation5 + $0xd50] sm:$0xff]  ;;  %v554_v1 = vld [vmem:[#allocation5 + $0xec8] sm:$0xff] }
 0x1ff   :  { %5120 = vmatpush1.bf16.msra.mxu0 %v5119_v24  ;;  %v5137_v24 = vpack.c.bf16 %v490_v14, %v474_v31  ;;  %v5337_v62 = vpack.c.bf16 %v524_v49, %v508_v46  ;;  %v523_v63 = vld [vmem:[#allocation5 + $0xdd0] sm:$0xff]  ;;  %v540_v50 = vld [vmem:[#allocation5 + $0xe58] sm:$0xff]  ;;  %v586_v15 = vld [vmem:[#allocation5 + $0xfc8] sm:$0xff] }
 0x200   :  { %5316 = vmatpush1.bf16.msra.mxu1 %v5315_v40  ;;  %5122 = vmatprep.subr.bf16.mxu0 %v5121_v37  ;;  %v473_v40 = vld [vmem:[#allocation5 + $0xc40] sm:$0xff]  ;;  %v556_v51 = vld [vmem:[#allocation5 + $0xed8] sm:$0xff]  ;;  %v5339_v3 = vpack.c.bf16 %v523_v63, %v507_v60  ;;  %v539_v9 = vld [vmem:[#allocation5 + $0xe50] sm:$0xff] }
 0x201   :  { %5318 = vmatprep.subr.bf16.mxu1 %v5317_v44  ;;  %v489_v37 = vld [vmem:[#allocation5 + $0xcc0] sm:$0xff]  ;;  %v506_v44 = vld [vmem:[#allocation5 + $0xd48] sm:$0xff]  ;;  %v5341_v10 = vpack.c.bf16 %v556_v51, %v540_v50  ;;  %v555_v11 = vld [vmem:[#allocation5 + $0xed0] sm:$0xff] }
 0x202   :  { %v5139_v52 = vpack.c.bf16 %v489_v37, %v473_v40  ;;  %v572_v16 = vld [vmem:[#allocation5 + $0xf58] sm:$0xff]  ;;  %v5343_v21 = vpack.c.bf16 %v555_v11, %v539_v9  ;;  %v571_v27 = vld [vmem:[#allocation5 + $0xf50] sm:$0xff]  ;;  %v618_v7 = vld [vmem:[#allocation5 + $0x10c8] sm:$0xff] }
 0x203   :  { %5124 = vmatpush1.bf16.msra.mxu0 %v5123_v56  ;;  %v5141_v56 = vpack.c.bf16 %v522_v45, %v506_v44  ;;  %v588_v17 = vld [vmem:[#allocation5 + $0xfd8] sm:$0xff]  ;;  %v587_v29 = vld [vmem:[#allocation5 + $0xfd0] sm:$0xff]  ;;  %v650_v43 = vld [vmem:[#allocation5 + $0x11c8] sm:$0xff] }
 0x204   :  { %5320 = vmatpush1.bf16.msra.mxu1 %v5319_v57  ;;  %5126 = vmatprep.subr.bf16.mxu0 %v5125_v59  ;;  %v505_v57 = vld [vmem:[#allocation5 + $0xd40] sm:$0xff]  ;;  %v5345_v28 = vpack.c.bf16 %v588_v17, %v572_v16  ;;  %v604_v31 = vld [vmem:[#allocation5 + $0x1058] sm:$0xff]  ;;  %v5347_v33 = vpack.c.bf16 %v587_v29, %v571_v27  ;;  %v603_v40 = vld [vmem:[#allocation5 + $0x1050] sm:$0xff] }
 0x205   :  { %5322 = vmatprep.subr.bf16.mxu1 %v5321_v0  ;;  %v521_v59 = vld [vmem:[#allocation5 + $0xdc0] sm:$0xff]  ;;  %v538_v0 = vld [vmem:[#allocation5 + $0xe48] sm:$0xff]  ;;  %v620_v14 = vld [vmem:[#allocation5 + $0x10d8] sm:$0xff] }
 0x206   :  { %v5143_v2 = vpack.c.bf16 %v521_v59, %v505_v57  ;;  %v5349_v37 = vpack.c.bf16 %v620_v14, %v604_v31  ;;  %v619_v38 = vld [vmem:[#allocation5 + $0x10d0] sm:$0xff]  ;;  %v636_v44 = vld [vmem:[#allocation5 + $0x1158] sm:$0xff]  ;;  %v682_v63 = vld [vmem:[#allocation5 + $0x12c8] sm:$0xff] }
 0x207   :  { %5128 = vmatpush1.bf16.msra.mxu0 %v5127_v4  ;;  %v5145_v4 = vpack.c.bf16 %v554_v1, %v538_v0  ;;  %v652_v45 = vld [vmem:[#allocation5 + $0x11d8] sm:$0xff]  ;;  %v5351_v49 = vpack.c.bf16 %v619_v38, %v603_v40  ;;  %v635_v57 = vld [vmem:[#allocation5 + $0x1150] sm:$0xff]  ;;  %v714_v11 = vld [vmem:[#allocation5 + $0x13c8] sm:$0xff] }
 0x208   :  { %5324 = vmatpush1.bf16.msra.mxu1 %v5323_v5  ;;  %5130 = vmatprep.subr.bf16.mxu0 %v5129_v6  ;;  %v537_v5 = vld [vmem:[#allocation5 + $0xe40] sm:$0xff]  ;;  %v5353_v59 = vpack.c.bf16 %v652_v45, %v636_v44  ;;  %v651_v60 = vld [vmem:[#allocation5 + $0x11d0] sm:$0xff]  ;;  %v668_v0 = vld [vmem:[#allocation5 + $0x1258] sm:$0xff] }
 0x209   :  { %5326 = vmatprep.subr.bf16.mxu1 %v5325_v12  ;;  %v553_v6 = vld [vmem:[#allocation5 + $0xec0] sm:$0xff]  ;;  %v570_v12 = vld [vmem:[#allocation5 + $0xf48] sm:$0xff]  ;;  %v684_v1 = vld [vmem:[#allocation5 + $0x12d8] sm:$0xff]  ;;  %v5355_v51 = vpack.c.bf16 %v651_v60, %v635_v57 }
 0x20a   :  { %v5147_v20 = vpack.c.bf16 %v553_v6, %v537_v5  ;;  %v667_v5 = vld [vmem:[#allocation5 + $0x1250] sm:$0xff]  ;;  %v5357_v6 = vpack.c.bf16 %v684_v1, %v668_v0  ;;  %v746_v29 = vld [vmem:[#allocation5 + $0x14c8] sm:$0xff] }
 0x20b   :  { %5132 = vmatpush1.bf16.msra.mxu0 %v5131_v22  ;;  %v5149_v22 = vpack.c.bf16 %v586_v15, %v570_v12  ;;  %v683_v9 = vld [vmem:[#allocation5 + $0x12d0] sm:$0xff]  ;;  %v700_v12 = vld [vmem:[#allocation5 + $0x1358] sm:$0xff]  ;;  %v778_v38 = vld [vmem:[#allocation5 + $0x15c8] sm:$0xff] }
 0x20c   :  { %5328 = vmatpush1.bf16.msra.mxu1 %v5327_v23  ;;  %5134 = vmatprep.subr.bf16.mxu0 %v5133_v25  ;;  %v569_v23 = vld [vmem:[#allocation5 + $0xf40] sm:$0xff]  ;;  %v716_v15 = vld [vmem:[#allocation5 + $0x13d8] sm:$0xff]  ;;  %v5359_v17 = vpack.c.bf16 %v683_v9, %v667_v5  ;;  %v715_v27 = vld [vmem:[#allocation5 + $0x13d0] sm:$0xff] }
 0x20d   :  { %5330 = vmatprep.subr.bf16.mxu1 %v5329_v30  ;;  %v585_v25 = vld [vmem:[#allocation5 + $0xfc0] sm:$0xff]  ;;  %v602_v30 = vld [vmem:[#allocation5 + $0x1048] sm:$0xff]  ;;  %v747_v40 = vld [vmem:[#allocation5 + $0x14d0] sm:$0xff] }
 0x20e   :  { %v5151_v32 = vpack.c.bf16 %v585_v25, %v569_v23  ;;  %v699_v23 = vld [vmem:[#allocation5 + $0x1350] sm:$0xff]  ;;  %v5361_v25 = vpack.c.bf16 %v716_v15, %v700_v12  ;;  %v810_v60 = vld [vmem:[#allocation5 + $0x16c8] sm:$0xff] }
 0x20f   :  { %5136 = vmatpush1.bf16.msra.mxu0 %v5135_v34  ;;  %v5153_v34 = vpack.c.bf16 %v618_v7, %v602_v30  ;;  %v732_v30 = vld [vmem:[#allocation5 + $0x1458] sm:$0xff]  ;;  %v5363_v14 = vpack.c.bf16 %v715_v27, %v699_v23  ;;  %v779_v57 = vld [vmem:[#allocation5 + $0x15d0] sm:$0xff]  ;;  %v842_v9 = vld [vmem:[#allocation5 + $0x17c8] sm:$0xff] }
 0x210   :  { %5332 = vmatpush1.bf16.msra.mxu1 %v5331_v35  ;;  %5138 = vmatprep.subr.bf16.mxu0 %v5137_v24  ;;  %v601_v35 = vld [vmem:[#allocation5 + $0x1040] sm:$0xff]  ;;  %v748_v7 = vld [vmem:[#allocation5 + $0x14d8] sm:$0xff]  ;;  %v811_v5 = vld [vmem:[#allocation5 + $0x16d0] sm:$0xff] }
 0x211   :  { %5334 = vmatprep.subr.bf16.mxu1 %v5333_v41  ;;  %v617_v24 = vld [vmem:[#allocation5 + $0x10c0] sm:$0xff]  ;;  %v634_v41 = vld [vmem:[#allocation5 + $0x1148] sm:$0xff]  ;;  %v843_v23 = vld [vmem:[#allocation5 + $0x17d0] sm:$0xff] }
 0x212   :  { %v5155_v46 = vpack.c.bf16 %v617_v24, %v601_v35  ;;  %v731_v35 = vld [vmem:[#allocation5 + $0x1450] sm:$0xff]  ;;  %v5365_v24 = vpack.c.bf16 %v748_v7, %v732_v30  ;;  %v874_v27 = vld [vmem:[#allocation5 + $0x18c8] sm:$0xff] }
 0x213   :  { %5140 = vmatpush1.bf16.msra.mxu0 %v5139_v52  ;;  %v5157_v52 = vpack.c.bf16 %v650_v43, %v634_v41  ;;  %v764_v41 = vld [vmem:[#allocation5 + $0x1558] sm:$0xff]  ;;  %v5367_v45 = vpack.c.bf16 %v747_v40, %v731_v35  ;;  %v875_v35 = vld [vmem:[#allocation5 + $0x18d0] sm:$0xff]  ;;  %v906_v40 = vld [vmem:[#allocation5 + $0x19c8] sm:$0xff] }
 0x214   :  { %5336 = vmatpush1.bf16.msra.mxu1 %v5335_v55  ;;  %5142 = vmatprep.subr.bf16.mxu0 %v5141_v56  ;;  %v633_v55 = vld [vmem:[#allocation5 + $0x1140] sm:$0xff]  ;;  %v780_v43 = vld [vmem:[#allocation5 + $0x15d8] sm:$0xff] }
 0x215   :  { %5338 = vmatprep.subr.bf16.mxu1 %v5337_v62  ;;  %v649_v56 = vld [vmem:[#allocation5 + $0x11c0] sm:$0xff]  ;;  %v666_v62 = vld [vmem:[#allocation5 + $0x1248] sm:$0xff] }
 0x216   :  { %v5159_v50 = vpack.c.bf16 %v649_v56, %v633_v55  ;;  %v763_v55 = vld [vmem:[#allocation5 + $0x1550] sm:$0xff]  ;;  %v5369_v56 = vpack.c.bf16 %v780_v43, %v764_v41 }
 0x217   :  { %5144 = vmatpush1.bf16.msra.mxu0 %v5143_v2  ;;  %v5161_v2 = vpack.c.bf16 %v682_v63, %v666_v62  ;;  %v796_v62 = vld [vmem:[#allocation5 + $0x1658] sm:$0xff]  ;;  %v5371_v1 = vpack.c.bf16 %v779_v57, %v763_v55  ;;  %v907_v55 = vld [vmem:[#allocation5 + $0x19d0] sm:$0xff]  ;;  %v938_v57 = vld [vmem:[#allocation5 + $0x1ac8] sm:$0xff] }
 0x218   :  { %5340 = vmatpush1.bf16.msra.mxu1 %v5339_v3  ;;  %5146 = vmatprep.subr.bf16.mxu0 %v5145_v4  ;;  %v665_v3 = vld [vmem:[#allocation5 + $0x1240] sm:$0xff]  ;;  %v812_v63 = vld [vmem:[#allocation5 + $0x16d8] sm:$0xff] }
 0x219   :  { %5342 = vmatprep.subr.bf16.mxu1 %v5341_v10  ;;  %v681_v4 = vld [vmem:[#allocation5 + $0x12c0] sm:$0xff]  ;;  %v698_v10 = vld [vmem:[#allocation5 + $0x1348] sm:$0xff] }
 0x21a   :  { %v5163_v16 = vpack.c.bf16 %v681_v4, %v665_v3  ;;  %v795_v3 = vld [vmem:[#allocation5 + $0x1650] sm:$0xff]  ;;  %v5373_v4 = vpack.c.bf16 %v812_v63, %v796_v62 }
 0x21b   :  { %5148 = vmatpush1.bf16.msra.mxu0 %v5147_v20  ;;  %v5165_v20 = vpack.c.bf16 %v714_v11, %v698_v10  ;;  %v828_v10 = vld [vmem:[#allocation5 + $0x1758] sm:$0xff]  ;;  %v5375_v15 = vpack.c.bf16 %v811_v5, %v795_v3  ;;  %v939_v3 = vld [vmem:[#allocation5 + $0x1ad0] sm:$0xff]  ;;  %v970_v5 = vld [vmem:[#allocation5 + $0x1bc8] sm:$0xff] }
 0x21c   :  { %5344 = vmatpush1.bf16.msra.mxu1 %v5343_v21  ;;  %5150 = vmatprep.subr.bf16.mxu0 %v5149_v22  ;;  %v697_v21 = vld [vmem:[#allocation5 + $0x1340] sm:$0xff]  ;;  %v844_v11 = vld [vmem:[#allocation5 + $0x17d8] sm:$0xff] }
 0x21d   :  { %5346 = vmatprep.subr.bf16.mxu1 %v5345_v28  ;;  %v713_v22 = vld [vmem:[#allocation5 + $0x13c0] sm:$0xff]  ;;  %v730_v28 = vld [vmem:[#allocation5 + $0x1448] sm:$0xff] }
 0x21e   :  { %v5167_v31 = vpack.c.bf16 %v713_v22, %v697_v21  ;;  %v827_v21 = vld [vmem:[#allocation5 + $0x1750] sm:$0xff]  ;;  %v5377_v22 = vpack.c.bf16 %v844_v11, %v828_v10 }
 0x21f   :  { %5152 = vmatpush1.bf16.msra.mxu0 %v5151_v32  ;;  %v5169_v32 = vpack.c.bf16 %v746_v29, %v730_v28  ;;  %v860_v28 = vld [vmem:[#allocation5 + $0x1858] sm:$0xff]  ;;  %v5379_v7 = vpack.c.bf16 %v843_v23, %v827_v21  ;;  %v971_v21 = vld [vmem:[#allocation5 + $0x1bd0] sm:$0xff]  ;;  %v1002_v23 = vld [vmem:[#allocation5 + $0x1cc8] sm:$0xff] }
 0x220   :  { %5348 = vmatpush1.bf16.msra.mxu1 %v5347_v33  ;;  %5154 = vmatprep.subr.bf16.mxu0 %v5153_v34  ;;  %v729_v33 = vld [vmem:[#allocation5 + $0x1440] sm:$0xff]  ;;  %v876_v29 = vld [vmem:[#allocation5 + $0x18d8] sm:$0xff] }
 0x221   :  { %5350 = vmatprep.subr.bf16.mxu1 %v5349_v37  ;;  %v745_v34 = vld [vmem:[#allocation5 + $0x14c0] sm:$0xff]  ;;  %v762_v37 = vld [vmem:[#allocation5 + $0x1548] sm:$0xff] }
 0x222   :  { %3022 = vmatmul.mubr.f32.vlgmr.msra.gmra.mrb[4].mxu0 %v6165_v26  ;;  %v5171_v44 = vpack.c.bf16 %v745_v34, %v729_v33  ;;  %v859_v33 = vld [vmem:[#allocation5 + $0x1850] sm:$0xff]  ;;  %v5381_v34 = vpack.c.bf16 %v876_v29, %v860_v28 }
 0x223   :  { %5156 = vmatpush1.bf16.msra.mxu0 %v5155_v46  ;;  %3306 = vmatmul.mubr.f32.vlgmr.msra.gmra.mrb[4].mxu1 %v6165_v26  ;;  %v5173_v46 = vpack.c.bf16 %v778_v38, %v762_v37  ;;  %v892_v37 = vld [vmem:[#allocation5 + $0x1958] sm:$0xff]  ;;  %v5383_v43 = vpack.c.bf16 %v875_v35, %v859_v33  ;;  %v1003_v33 = vld [vmem:[#allocation5 + $0x1cd0] sm:$0xff]  ;;  %v1034_v35 = vld [vmem:[#allocation5 + $0x1dc8] sm:$0xff] }
 0x224   :  { %5352 = vmatpush1.bf16.msra.mxu1 %v5351_v49  ;;  %5158 = vmatprep.subr.bf16.mxu0 %v5157_v52  ;;  %v761_v49 = vld [vmem:[#allocation5 + $0x1540] sm:$0xff]  ;;  %v908_v38 = vld [vmem:[#allocation5 + $0x19d8] sm:$0xff] }
 0x225   :  { %5354 = vmatprep.subr.bf16.mxu1 %v5353_v59  ;;  %3092 = vmatprep.mubr.f32.mxu0 %v6177_v58  ;;  %v777_v52 = vld [vmem:[#allocation5 + $0x15c0] sm:$0xff]  ;;  %v794_v59 = vld [vmem:[#allocation5 + $0x1648] sm:$0xff] }
 0x226   :  { %3376 = vmatprep.mubr.f32.mxu1 %v6177_v58  ;;  %v5175_v0 = vpack.c.bf16 %v777_v52, %v761_v49  ;;  %v891_v49 = vld [vmem:[#allocation5 + $0x1950] sm:$0xff]  ;;  %v5385_v52 = vpack.c.bf16 %v908_v38, %v892_v37 }
 0x227   :  { %5160 = vmatpush1.bf16.msra.mxu0 %v5159_v50  ;;  %v5177_v50 = vpack.c.bf16 %v810_v60, %v794_v59  ;;  %v924_v59 = vld [vmem:[#allocation5 + $0x1a58] sm:$0xff]  ;;  %v5387_v63 = vpack.c.bf16 %v907_v55, %v891_v49  ;;  %v1035_v49 = vld [vmem:[#allocation5 + $0x1dd0] sm:$0xff]  ;;  %v1066_v55 = vld [vmem:[#allocation5 + $0x1ec8] sm:$0xff] }
 0x228   :  { %5356 = vmatpush1.bf16.msra.mxu1 %v5355_v51  ;;  %5162 = vmatprep.subr.bf16.mxu0 %v5161_v2  ;;  %v793_v51 = vld [vmem:[#allocation5 + $0x1640] sm:$0xff]  ;;  %v940_v60 = vld [vmem:[#allocation5 + $0x1ad8] sm:$0xff] }
 0x229   :  { %5358 = vmatprep.subr.bf16.mxu1 %v5357_v6  ;;  %v809_v2 = vld [vmem:[#allocation5 + $0x16c0] sm:$0xff]  ;;  %v826_v6 = vld [vmem:[#allocation5 + $0x1748] sm:$0xff] }
 0x22a   :  { %v5179_v12 = vpack.c.bf16 %v809_v2, %v793_v51  ;;  %v923_v51 = vld [vmem:[#allocation5 + $0x1a50] sm:$0xff]  ;;  %v5389_v2 = vpack.c.bf16 %v940_v60, %v924_v59 }
 0x22b   :  { %5164 = vmatpush1.bf16.msra.mxu0 %v5163_v16  ;;  %v5181_v16 = vpack.c.bf16 %v842_v9, %v826_v6  ;;  %v956_v6 = vld [vmem:[#allocation5 + $0x1b58] sm:$0xff]  ;;  %v5391_v11 = vpack.c.bf16 %v939_v3, %v923_v51  ;;  %v1067_v51 = vld [vmem:[#allocation5 + $0x1ed0] sm:$0xff]  ;;  %v1098_v3 = vld [vmem:[#allocation5 + $0x1fc8] sm:$0xff] }
 0x22c   :  { %5360 = vmatpush1.bf16.msra.mxu1 %v5359_v17  ;;  %5166 = vmatprep.subr.bf16.mxu0 %v5165_v20  ;;  %v825_v17 = vld [vmem:[#allocation5 + $0x1740] sm:$0xff]  ;;  %v972_v9 = vld [vmem:[#allocation5 + $0x1bd8] sm:$0xff] }
 0x22d   :  { %5362 = vmatprep.subr.bf16.mxu1 %v5361_v25  ;;  %v841_v20 = vld [vmem:[#allocation5 + $0x17c0] sm:$0xff]  ;;  %v858_v25 = vld [vmem:[#allocation5 + $0x1848] sm:$0xff] }
 0x22e   :  { %v5183_v30 = vpack.c.bf16 %v841_v20, %v825_v17  ;;  %v955_v17 = vld [vmem:[#allocation5 + $0x1b50] sm:$0xff]  ;;  %v5393_v20 = vpack.c.bf16 %v972_v9, %v956_v6 }
 0x22f   :  { %5168 = vmatpush1.bf16.msra.mxu0 %v5167_v31  ;;  %v5185_v31 = vpack.c.bf16 %v874_v27, %v858_v25  ;;  %v988_v25 = vld [vmem:[#allocation5 + $0x1c58] sm:$0xff]  ;;  %v5395_v29 = vpack.c.bf16 %v971_v21, %v955_v17  ;;  %v1099_v17 = vld [vmem:[#allocation5 + $0x1fd0] sm:$0xff]  ;;  %v1130_v21 = vld [vmem:[#allocation5 + $0x20c8] sm:$0xff] }
 0x230   :  { %5364 = vmatpush1.bf16.msra.mxu1 %v5363_v14  ;;  %5170 = vmatprep.subr.bf16.mxu0 %v5169_v32  ;;  %v857_v14 = vld [vmem:[#allocation5 + $0x1840] sm:$0xff]  ;;  %v1004_v27 = vld [vmem:[#allocation5 + $0x1cd8] sm:$0xff] }
 0x231   :  { %5366 = vmatprep.subr.bf16.mxu1 %v5365_v24  ;;  %v873_v32 = vld [vmem:[#allocation5 + $0x18c0] sm:$0xff]  ;;  %v890_v24 = vld [vmem:[#allocation5 + $0x1948] sm:$0xff] }
 0x232   :  { %v5187_v41 = vpack.c.bf16 %v873_v32, %v857_v14  ;;  %v987_v14 = vld [vmem:[#allocation5 + $0x1c50] sm:$0xff]  ;;  %v5397_v32 = vpack.c.bf16 %v1004_v27, %v988_v25 }
 0x233   :  { %5172 = vmatpush1.bf16.msra.mxu0 %v5171_v44  ;;  %v5189_v44 = vpack.c.bf16 %v906_v40, %v890_v24  ;;  %v1020_v24 = vld [vmem:[#allocation5 + $0x1d58] sm:$0xff]  ;;  %v5399_v38 = vpack.c.bf16 %v1003_v33, %v987_v14  ;;  %v1131_v14 = vld [vmem:[#allocation5 + $0x20d0] sm:$0xff]  ;;  %v1162_v33 = vld [vmem:[#allocation5 + $0x21c8] sm:$0xff] }
 0x234   :  { %5368 = vmatpush1.bf16.msra.mxu1 %v5367_v45  ;;  %5174 = vmatprep.subr.bf16.mxu0 %v5173_v46  ;;  %v889_v45 = vld [vmem:[#allocation5 + $0x1940] sm:$0xff]  ;;  %v1036_v40 = vld [vmem:[#allocation5 + $0x1dd8] sm:$0xff] }
 0x235   :  { %5370 = vmatprep.subr.bf16.mxu1 %v5369_v56  ;;  %v905_v46 = vld [vmem:[#allocation5 + $0x19c0] sm:$0xff]  ;;  %v922_v56 = vld [vmem:[#allocation5 + $0x1a48] sm:$0xff] }
 0x236   :  { %v5191_v62 = vpack.c.bf16 %v905_v46, %v889_v45  ;;  %v1019_v45 = vld [vmem:[#allocation5 + $0x1d50] sm:$0xff]  ;;  %v5401_v46 = vpack.c.bf16 %v1036_v40, %v1020_v24 }
 0x237   :  { %5176 = vmatpush1.bf16.msra.mxu0 %v5175_v0  ;;  %v5193_v0 = vpack.c.bf16 %v938_v57, %v922_v56  ;;  %v1052_v56 = vld [vmem:[#allocation5 + $0x1e58] sm:$0xff]  ;;  %v5403_v60 = vpack.c.bf16 %v1035_v49, %v1019_v45  ;;  %v1163_v45 = vld [vmem:[#allocation5 + $0x21d0] sm:$0xff]  ;;  %v1194_v49 = vld [vmem:[#allocation5 + $0x22c8] sm:$0xff] }
 0x238   :  { %5372 = vmatpush1.bf16.msra.mxu1 %v5371_v1  ;;  %5178 = vmatprep.subr.bf16.mxu0 %v5177_v50  ;;  %v921_v1 = vld [vmem:[#allocation5 + $0x1a40] sm:$0xff]  ;;  %v1068_v57 = vld [vmem:[#allocation5 + $0x1ed8] sm:$0xff] }
 0x239   :  { %5374 = vmatprep.subr.bf16.mxu1 %v5373_v4  ;;  %v937_v50 = vld [vmem:[#allocation5 + $0x1ac0] sm:$0xff]  ;;  %v954_v4 = vld [vmem:[#allocation5 + $0x1b48] sm:$0xff] }
 0x23a   :  { %v5195_v10 = vpack.c.bf16 %v937_v50, %v921_v1  ;;  %v1051_v1 = vld [vmem:[#allocation5 + $0x1e50] sm:$0xff]  ;;  %v5405_v50 = vpack.c.bf16 %v1068_v57, %v1052_v56 }
 0x23b   :  { %5180 = vmatpush1.bf16.msra.mxu0 %v5179_v12  ;;  %v5197_v12 = vpack.c.bf16 %v970_v5, %v954_v4  ;;  %v1084_v4 = vld [vmem:[#allocation5 + $0x1f58] sm:$0xff]  ;;  %v5407_v9 = vpack.c.bf16 %v1067_v51, %v1051_v1  ;;  %v1195_v1 = vld [vmem:[#allocation5 + $0x22d0] sm:$0xff]  ;;  %v1226_v51 = vld [vmem:[#allocation5 + $0x23c8] sm:$0xff] }
 0x23c   :  { %5376 = vmatpush1.bf16.msra.mxu1 %v5375_v15  ;;  %5182 = vmatprep.subr.bf16.mxu0 %v5181_v16  ;;  %v953_v15 = vld [vmem:[#allocation5 + $0x1b40] sm:$0xff]  ;;  %v1100_v5 = vld [vmem:[#allocation5 + $0x1fd8] sm:$0xff] }
 0x23d   :  { %5378 = vmatprep.subr.bf16.mxu1 %v5377_v22  ;;  %v969_v16 = vld [vmem:[#allocation5 + $0x1bc0] sm:$0xff]  ;;  %v986_v22 = vld [vmem:[#allocation5 + $0x1c48] sm:$0xff] }
 0x23e   :  { %v5199_v28 = vpack.c.bf16 %v969_v16, %v953_v15  ;;  %v1083_v15 = vld [vmem:[#allocation5 + $0x1f50] sm:$0xff]  ;;  %v5409_v16 = vpack.c.bf16 %v1100_v5, %v1084_v4 }
 0x23f   :  { %5184 = vmatpush1.bf16.msra.mxu0 %v5183_v30  ;;  %v5201_v30 = vpack.c.bf16 %v1002_v23, %v986_v22  ;;  %v1116_v22 = vld [vmem:[#allocation5 + $0x2058] sm:$0xff]  ;;  %v5411_v27 = vpack.c.bf16 %v1099_v17, %v1083_v15  ;;  %v1227_v15 = vld [vmem:[#allocation5 + $0x23d0] sm:$0xff]  ;;  %v1258_v17 = vld [vmem:[#allocation5 + $0x24c8] sm:$0xff] }
 0x240   :  { %5380 = vmatpush1.bf16.msra.mxu1 %v5379_v7  ;;  %5186 = vmatprep.subr.bf16.mxu0 %v5185_v31  ;;  %v985_v7 = vld [vmem:[#allocation5 + $0x1c40] sm:$0xff]  ;;  %v1132_v23 = vld [vmem:[#allocation5 + $0x20d8] sm:$0xff] }
 0x241   :  { %5382 = vmatprep.subr.bf16.mxu1 %v5381_v34  ;;  %v1001_v31 = vld [vmem:[#allocation5 + $0x1cc0] sm:$0xff]  ;;  %v1018_v34 = vld [vmem:[#allocation5 + $0x1d48] sm:$0xff] }
 0x242   :  { %v5203_v37 = vpack.c.bf16 %v1001_v31, %v985_v7  ;;  %v1115_v7 = vld [vmem:[#allocation5 + $0x2050] sm:$0xff]  ;;  %v5413_v31 = vpack.c.bf16 %v1132_v23, %v1116_v22 }
 0x243   :  { %5188 = vmatpush1.bf16.msra.mxu0 %v5187_v41  ;;  %v5205_v41 = vpack.c.bf16 %v1034_v35, %v1018_v34  ;;  %v1148_v34 = vld [vmem:[#allocation5 + $0x2158] sm:$0xff]  ;;  %v5415_v40 = vpack.c.bf16 %v1131_v14, %v1115_v7  ;;  %v1259_v7 = vld [vmem:[#allocation5 + $0x24d0] sm:$0xff]  ;;  %v1290_v14 = vld [vmem:[#allocation5 + $0x25c8] sm:$0xff] }
 0x244   :  { %5384 = vmatpush1.bf16.msra.mxu1 %v5383_v43  ;;  %5190 = vmatprep.subr.bf16.mxu0 %v5189_v44  ;;  %v1017_v43 = vld [vmem:[#allocation5 + $0x1d40] sm:$0xff]  ;;  %v1164_v35 = vld [vmem:[#allocation5 + $0x21d8] sm:$0xff] }
 0x245   :  { %5386 = vmatprep.subr.bf16.mxu1 %v5385_v52  ;;  %v1033_v44 = vld [vmem:[#allocation5 + $0x1dc0] sm:$0xff]  ;;  %v1050_v52 = vld [vmem:[#allocation5 + $0x1e48] sm:$0xff] }
 0x246   :  { %v5207_v59 = vpack.c.bf16 %v1033_v44, %v1017_v43  ;;  %v1147_v43 = vld [vmem:[#allocation5 + $0x2150] sm:$0xff]  ;;  %v5417_v44 = vpack.c.bf16 %v1164_v35, %v1148_v34 }
 0x247   :  { %5192 = vmatpush1.bf16.msra.mxu0 %v5191_v62  ;;  %v5209_v62 = vpack.c.bf16 %v1066_v55, %v1050_v52  ;;  %v1180_v52 = vld [vmem:[#allocation5 + $0x2258] sm:$0xff]  ;;  %v5419_v57 = vpack.c.bf16 %v1163_v45, %v1147_v43  ;;  %v1291_v43 = vld [vmem:[#allocation5 + $0x25d0] sm:$0xff]  ;;  %v1322_v45 = vld [vmem:[#allocation5 + $0x26c8] sm:$0xff] }
 0x248   :  { %5388 = vmatpush1.bf16.msra.mxu1 %v5387_v63  ;;  %5194 = vmatprep.subr.bf16.mxu0 %v5193_v0  ;;  %v1049_v63 = vld [vmem:[#allocation5 + $0x1e40] sm:$0xff]  ;;  %v1196_v55 = vld [vmem:[#allocation5 + $0x22d8] sm:$0xff] }
 0x249   :  { %5390 = vmatprep.subr.bf16.mxu1 %v5389_v2  ;;  %v1065_v0 = vld [vmem:[#allocation5 + $0x1ec0] sm:$0xff]  ;;  %v1082_v2 = vld [vmem:[#allocation5 + $0x1f48] sm:$0xff] }
 0x24a   :  { %v5211_v6 = vpack.c.bf16 %v1065_v0, %v1049_v63  ;;  %v1179_v63 = vld [vmem:[#allocation5 + $0x2250] sm:$0xff]  ;;  %v5421_v0 = vpack.c.bf16 %v1196_v55, %v1180_v52 }
 0x24b   :  { %5196 = vmatpush1.bf16.msra.mxu0 %v5195_v10  ;;  %v5213_v10 = vpack.c.bf16 %v1098_v3, %v1082_v2  ;;  %v1212_v2 = vld [vmem:[#allocation5 + $0x2358] sm:$0xff]  ;;  %v5423_v5 = vpack.c.bf16 %v1195_v1, %v1179_v63  ;;  %v1323_v63 = vld [vmem:[#allocation5 + $0x26d0] sm:$0xff]  ;;  %v1354_v1 = vld [vmem:[#allocation5 + $0x27c8] sm:$0xff] }
 0x24c   :  { %5392 = vmatpush1.bf16.msra.mxu1 %v5391_v11  ;;  %5198 = vmatprep.subr.bf16.mxu0 %v5197_v12  ;;  %v1081_v11 = vld [vmem:[#allocation5 + $0x1f40] sm:$0xff]  ;;  %v1228_v3 = vld [vmem:[#allocation5 + $0x23d8] sm:$0xff] }
 0x24d   :  { %5394 = vmatprep.subr.bf16.mxu1 %v5393_v20  ;;  %v1097_v12 = vld [vmem:[#allocation5 + $0x1fc0] sm:$0xff]  ;;  %v1114_v20 = vld [vmem:[#allocation5 + $0x2048] sm:$0xff] }
 0x24e   :  { %v5215_v25 = vpack.c.bf16 %v1097_v12, %v1081_v11  ;;  %v1211_v11 = vld [vmem:[#allocation5 + $0x2350] sm:$0xff]  ;;  %v5425_v12 = vpack.c.bf16 %v1228_v3, %v1212_v2 }
 0x24f   :  { %5200 = vmatpush1.bf16.msra.mxu0 %v5199_v28  ;;  %v5217_v28 = vpack.c.bf16 %v1130_v21, %v1114_v20  ;;  %v1244_v20 = vld [vmem:[#allocation5 + $0x2458] sm:$0xff]  ;;  %v5427_v23 = vpack.c.bf16 %v1227_v15, %v1211_v11  ;;  %v1355_v11 = vld [vmem:[#allocation5 + $0x27d0] sm:$0xff]  ;;  %v1386_v15 = vld [vmem:[#allocation5 + $0x28c8] sm:$0xff] }
 0x250   :  { %5396 = vmatpush1.bf16.msra.mxu1 %v5395_v29  ;;  %5202 = vmatprep.subr.bf16.mxu0 %v5201_v30  ;;  %v1113_v29 = vld [vmem:[#allocation5 + $0x2040] sm:$0xff]  ;;  %v1260_v21 = vld [vmem:[#allocation5 + $0x24d8] sm:$0xff] }
 0x251   :  { %5398 = vmatprep.subr.bf16.mxu1 %v5397_v32  ;;  %v1129_v30 = vld [vmem:[#allocation5 + $0x20c0] sm:$0xff]  ;;  %v1146_v32 = vld [vmem:[#allocation5 + $0x2148] sm:$0xff] }
 0x252   :  { %v5219_v24 = vpack.c.bf16 %v1129_v30, %v1113_v29  ;;  %v1243_v29 = vld [vmem:[#allocation5 + $0x2450] sm:$0xff]  ;;  %v5429_v30 = vpack.c.bf16 %v1260_v21, %v1244_v20 }
 0x253   :  { %5204 = vmatpush1.bf16.msra.mxu0 %v5203_v37  ;;  %v5221_v37 = vpack.c.bf16 %v1162_v33, %v1146_v32  ;;  %v1276_v32 = vld [vmem:[#allocation5 + $0x2558] sm:$0xff]  ;;  %v5431_v35 = vpack.c.bf16 %v1259_v7, %v1243_v29  ;;  %v1387_v29 = vld [vmem:[#allocation5 + $0x28d0] sm:$0xff]  ;;  %v1418_v7 = vld [vmem:[#allocation5 + $0x29c8] sm:$0xff] }
 0x254   :  { %5400 = vmatpush1.bf16.msra.mxu1 %v5399_v38  ;;  %5206 = vmatprep.subr.bf16.mxu0 %v5205_v41  ;;  %v1145_v38 = vld [vmem:[#allocation5 + $0x2140] sm:$0xff]  ;;  %v1292_v33 = vld [vmem:[#allocation5 + $0x25d8] sm:$0xff] }
 0x255   :  { %5402 = vmatprep.subr.bf16.mxu1 %v5401_v46  ;;  %v1161_v41 = vld [vmem:[#allocation5 + $0x21c0] sm:$0xff]  ;;  %v1178_v46 = vld [vmem:[#allocation5 + $0x2248] sm:$0xff] }
 0x256   :  { %v5223_v56 = vpack.c.bf16 %v1161_v41, %v1145_v38  ;;  %v1275_v38 = vld [vmem:[#allocation5 + $0x2550] sm:$0xff]  ;;  %v5433_v41 = vpack.c.bf16 %v1292_v33, %v1276_v32 }
 0x257   :  { %5208 = vmatpush1.bf16.msra.mxu0 %v5207_v59  ;;  %v5225_v59 = vpack.c.bf16 %v1194_v49, %v1178_v46  ;;  %v1308_v46 = vld [vmem:[#allocation5 + $0x2658] sm:$0xff]  ;;  %v5435_v55 = vpack.c.bf16 %v1291_v43, %v1275_v38  ;;  %v1419_v38 = vld [vmem:[#allocation5 + $0x29d0] sm:$0xff]  ;;  %v1450_v43 = vld [vmem:[#allocation5 + $0x2ac8] sm:$0xff] }
 0x258   :  { %5404 = vmatpush1.bf16.msra.mxu1 %v5403_v60  ;;  %5210 = vmatprep.subr.bf16.mxu0 %v5209_v62  ;;  %v1177_v60 = vld [vmem:[#allocation5 + $0x2240] sm:$0xff]  ;;  %v1324_v49 = vld [vmem:[#allocation5 + $0x26d8] sm:$0xff] }
 0x259   :  { %5406 = vmatprep.subr.bf16.mxu1 %v5405_v50  ;;  %v1193_v62 = vld [vmem:[#allocation5 + $0x22c0] sm:$0xff]  ;;  %v1210_v50 = vld [vmem:[#allocation5 + $0x2348] sm:$0xff] }
 0x25a   :  { %v5227_v4 = vpack.c.bf16 %v1193_v62, %v1177_v60  ;;  %v1307_v60 = vld [vmem:[#allocation5 + $0x2650] sm:$0xff]  ;;  %v5437_v62 = vpack.c.bf16 %v1324_v49, %v1308_v46 }
 0x25b   :  { %5212 = vmatpush1.bf16.msra.mxu0 %v5211_v6  ;;  %v5229_v6 = vpack.c.bf16 %v1226_v51, %v1210_v50  ;;  %v1340_v50 = vld [vmem:[#allocation5 + $0x2758] sm:$0xff]  ;;  %v5439_v3 = vpack.c.bf16 %v1323_v63, %v1307_v60  ;;  %v1451_v60 = vld [vmem:[#allocation5 + $0x2ad0] sm:$0xff]  ;;  %v1482_v63 = vld [vmem:[#allocation5 + $0x2bc8] sm:$0xff] }
 0x25c   :  { %5408 = vmatpush1.bf16.msra.mxu1 %v5407_v9  ;;  %5214 = vmatprep.subr.bf16.mxu0 %v5213_v10  ;;  %v1209_v9 = vld [vmem:[#allocation5 + $0x2340] sm:$0xff]  ;;  %v1356_v51 = vld [vmem:[#allocation5 + $0x27d8] sm:$0xff] }
 0x25d   :  { %5410 = vmatprep.subr.bf16.mxu1 %v5409_v16  ;;  %v1225_v10 = vld [vmem:[#allocation5 + $0x23c0] sm:$0xff]  ;;  %v1242_v16 = vld [vmem:[#allocation5 + $0x2448] sm:$0xff] }
 0x25e   :  { %v5231_v22 = vpack.c.bf16 %v1225_v10, %v1209_v9  ;;  %v1339_v9 = vld [vmem:[#allocation5 + $0x2750] sm:$0xff]  ;;  %v5441_v10 = vpack.c.bf16 %v1356_v51, %v1340_v50 }
 0x25f   :  { %5216 = vmatpush1.bf16.msra.mxu0 %v5215_v25  ;;  %v5233_v25 = vpack.c.bf16 %v1258_v17, %v1242_v16  ;;  %v1372_v16 = vld [vmem:[#allocation5 + $0x2858] sm:$0xff]  ;;  %v5443_v21 = vpack.c.bf16 %v1355_v11, %v1339_v9  ;;  %v1483_v9 = vld [vmem:[#allocation5 + $0x2bd0] sm:$0xff]  ;;  %v1514_v11 = vld [vmem:[#allocation5 + $0x2cc8] sm:$0xff] }
 0x260   :  { %5412 = vmatpush1.bf16.msra.mxu1 %v5411_v27  ;;  %5218 = vmatprep.subr.bf16.mxu0 %v5217_v28  ;;  %v1241_v27 = vld [vmem:[#allocation5 + $0x2440] sm:$0xff]  ;;  %v1388_v17 = vld [vmem:[#allocation5 + $0x28d8] sm:$0xff] }
 0x261   :  { %5414 = vmatprep.subr.bf16.mxu1 %v5413_v31  ;;  %v1257_v28 = vld [vmem:[#allocation5 + $0x24c0] sm:$0xff]  ;;  %v1274_v31 = vld [vmem:[#allocation5 + $0x2548] sm:$0xff] }
 0x262   :  { %3093 = vmatmul.mubr.f32.vlgmr.msra.gmra.mrb[4].mxu0 %v6183_v48  ;;  %v5235_v34 = vpack.c.bf16 %v1257_v28, %v1241_v27  ;;  %v1371_v27 = vld [vmem:[#allocation5 + $0x2850] sm:$0xff]  ;;  %v5445_v28 = vpack.c.bf16 %v1388_v17, %v1372_v16 }
 0x263   :  { %5220 = vmatpush1.bf16.msra.mxu0 %v5219_v24  ;;  %3377 = vmatmul.mubr.f32.vlgmr.msra.gmra.mrb[4].mxu1 %v6183_v48  ;;  %v5237_v24 = vpack.c.bf16 %v1290_v14, %v1274_v31  ;;  %v1404_v31 = vld [vmem:[#allocation5 + $0x2958] sm:$0xff]  ;;  %v5447_v33 = vpack.c.bf16 %v1387_v29, %v1371_v27  ;;  %v1515_v27 = vld [vmem:[#allocation5 + $0x2cd0] sm:$0xff]  ;;  %v1546_v29 = vld [vmem:[#allocation5 + $0x2dc8] sm:$0xff] }
 0x264   :  { %5416 = vmatpush1.bf16.msra.mxu1 %v5415_v40  ;;  %5222 = vmatprep.subr.bf16.mxu0 %v5221_v37  ;;  %v1273_v40 = vld [vmem:[#allocation5 + $0x2540] sm:$0xff]  ;;  %v1420_v14 = vld [vmem:[#allocation5 + $0x29d8] sm:$0xff] }
 0x265   :  { %5418 = vmatprep.subr.bf16.mxu1 %v5417_v44  ;;  %3163 = vmatprep.mubr.f32.mxu0 %v6195_v18  ;;  %v1289_v37 = vld [vmem:[#allocation5 + $0x25c0] sm:$0xff]  ;;  %v1306_v44 = vld [vmem:[#allocation5 + $0x2648] sm:$0xff] }
 0x266   :  { %3447 = vmatprep.mubr.f32.mxu1 %v6195_v18  ;;  %v5239_v52 = vpack.c.bf16 %v1289_v37, %v1273_v40  ;;  %v1403_v40 = vld [vmem:[#allocation5 + $0x2950] sm:$0xff]  ;;  %v5449_v37 = vpack.c.bf16 %v1420_v14, %v1404_v31 }
 0x267   :  { %5224 = vmatpush1.bf16.msra.mxu0 %v5223_v56  ;;  %v5241_v56 = vpack.c.bf16 %v1322_v45, %v1306_v44  ;;  %v1436_v44 = vld [vmem:[#allocation5 + $0x2a58] sm:$0xff]  ;;  %v5451_v49 = vpack.c.bf16 %v1419_v38, %v1403_v40  ;;  %v1547_v40 = vld [vmem:[#allocation5 + $0x2dd0] sm:$0xff]  ;;  %v1578_v38 = vld [vmem:[#allocation5 + $0x2ec8] sm:$0xff] }
 0x268   :  { %5420 = vmatpush1.bf16.msra.mxu1 %v5419_v57  ;;  %5226 = vmatprep.subr.bf16.mxu0 %v5225_v59  ;;  %v1305_v57 = vld [vmem:[#allocation5 + $0x2640] sm:$0xff]  ;;  %v1452_v45 = vld [vmem:[#allocation5 + $0x2ad8] sm:$0xff] }
 0x269   :  { %5422 = vmatprep.subr.bf16.mxu1 %v5421_v0  ;;  %v1321_v59 = vld [vmem:[#allocation5 + $0x26c0] sm:$0xff]  ;;  %v1338_v0 = vld [vmem:[#allocation5 + $0x2748] sm:$0xff] }
 0x26a   :  { %v5243_v2 = vpack.c.bf16 %v1321_v59, %v1305_v57  ;;  %v1435_v57 = vld [vmem:[#allocation5 + $0x2a50] sm:$0xff]  ;;  %v5453_v59 = vpack.c.bf16 %v1452_v45, %v1436_v44 }
 0x26b   :  { %5228 = vmatpush1.bf16.msra.mxu0 %v5227_v4  ;;  %v5245_v4 = vpack.c.bf16 %v1354_v1, %v1338_v0  ;;  %v1468_v0 = vld [vmem:[#allocation5 + $0x2b58] sm:$0xff]  ;;  %v5455_v51 = vpack.c.bf16 %v1451_v60, %v1435_v57  ;;  %v1579_v57 = vld [vmem:[#allocation5 + $0x2ed0] sm:$0xff]  ;;  %v1610_v60 = vld [vmem:[#allocation5 + $0x2fc8] sm:$0xff] }
 0x26c   :  { %5424 = vmatpush1.bf16.msra.mxu1 %v5423_v5  ;;  %5230 = vmatprep.subr.bf16.mxu0 %v5229_v6  ;;  %v1337_v5 = vld [vmem:[#allocation5 + $0x2740] sm:$0xff]  ;;  %v1484_v1 = vld [vmem:[#allocation5 + $0x2bd8] sm:$0xff] }
 0x26d   :  { %5426 = vmatprep.subr.bf16.mxu1 %v5425_v12  ;;  %v1353_v6 = vld [vmem:[#allocation5 + $0x27c0] sm:$0xff]  ;;  %v1370_v12 = vld [vmem:[#allocation5 + $0x2848] sm:$0xff] }
 0x26e   :  { %v5247_v20 = vpack.c.bf16 %v1353_v6, %v1337_v5  ;;  %v1467_v5 = vld [vmem:[#allocation5 + $0x2b50] sm:$0xff]  ;;  %v5457_v6 = vpack.c.bf16 %v1484_v1, %v1468_v0 }
 0x26f   :  { %5232 = vmatpush1.bf16.msra.mxu0 %v5231_v22  ;;  %v5249_v22 = vpack.c.bf16 %v1386_v15, %v1370_v12  ;;  %v1500_v12 = vld [vmem:[#allocation5 + $0x2c58] sm:$0xff]  ;;  %v5459_v17 = vpack.c.bf16 %v1483_v9, %v1467_v5  ;;  %v1611_v5 = vld [vmem:[#allocation5 + $0x2fd0] sm:$0xff]  ;;  %v1642_v9 = vld [vmem:[#allocation5 + $0x30c8] sm:$0xff] }
 0x270   :  { %5428 = vmatpush1.bf16.msra.mxu1 %v5427_v23  ;;  %5234 = vmatprep.subr.bf16.mxu0 %v5233_v25  ;;  %v1369_v23 = vld [vmem:[#allocation5 + $0x2840] sm:$0xff]  ;;  %v1516_v15 = vld [vmem:[#allocation5 + $0x2cd8] sm:$0xff] }
 0x271   :  { %5430 = vmatprep.subr.bf16.mxu1 %v5429_v30  ;;  %v1385_v25 = vld [vmem:[#allocation5 + $0x28c0] sm:$0xff]  ;;  %v1402_v30 = vld [vmem:[#allocation5 + $0x2948] sm:$0xff] }
 0x272   :  { %v5251_v32 = vpack.c.bf16 %v1385_v25, %v1369_v23  ;;  %v1499_v23 = vld [vmem:[#allocation5 + $0x2c50] sm:$0xff]  ;;  %v5461_v25 = vpack.c.bf16 %v1516_v15, %v1500_v12 }
 0x273   :  { %5236 = vmatpush1.bf16.msra.mxu0 %v5235_v34  ;;  %v5253_v34 = vpack.c.bf16 %v1418_v7, %v1402_v30  ;;  %v1532_v30 = vld [vmem:[#allocation5 + $0x2d58] sm:$0xff]  ;;  %v5463_v14 = vpack.c.bf16 %v1515_v27, %v1499_v23  ;;  %v1643_v23 = vld [vmem:[#allocation5 + $0x30d0] sm:$0xff]  ;;  %v110_v27 = vld [vmem:[#allocation5 + $0xe8] sm:$0xff] }
 0x274   :  { %5432 = vmatpush1.bf16.msra.mxu1 %v5431_v35  ;;  %5238 = vmatprep.subr.bf16.mxu0 %v5237_v24  ;;  %v1401_v35 = vld [vmem:[#allocation5 + $0x2940] sm:$0xff]  ;;  %v1548_v7 = vld [vmem:[#allocation5 + $0x2dd8] sm:$0xff] }
 0x275   :  { %5434 = vmatprep.subr.bf16.mxu1 %v5433_v41  ;;  %v1417_v24 = vld [vmem:[#allocation5 + $0x29c0] sm:$0xff]  ;;  %v1434_v41 = vld [vmem:[#allocation5 + $0x2a48] sm:$0xff] }
 0x276   :  { %v5255_v46 = vpack.c.bf16 %v1417_v24, %v1401_v35  ;;  %v1531_v35 = vld [vmem:[#allocation5 + $0x2d50] sm:$0xff]  ;;  %v5465_v24 = vpack.c.bf16 %v1548_v7, %v1532_v30  ;;  %v112_v30 = vld [vmem:[#allocation5 + $0xf8] sm:$0xff] }
 0x277   :  { %5240 = vmatpush1.bf16.msra.mxu0 %v5239_v52  ;;  %v5257_v52 = vpack.c.bf16 %v1450_v43, %v1434_v41  ;;  %v1564_v41 = vld [vmem:[#allocation5 + $0x2e58] sm:$0xff]  ;;  %v5467_v45 = vpack.c.bf16 %v1547_v40, %v1531_v35  ;;  %v111_v35 = vld [vmem:[#allocation5 + $0xf0] sm:$0xff]  ;;  %v142_v40 = vld [vmem:[#allocation5 + $0x1e8] sm:$0xff] }
 0x278   :  { %5436 = vmatpush1.bf16.msra.mxu1 %v5435_v55  ;;  %5242 = vmatprep.subr.bf16.mxu0 %v5241_v56  ;;  %v1433_v55 = vld [vmem:[#allocation5 + $0x2a40] sm:$0xff]  ;;  %v1580_v43 = vld [vmem:[#allocation5 + $0x2ed8] sm:$0xff] }
 0x279   :  { %5438 = vmatprep.subr.bf16.mxu1 %v5437_v62  ;;  %v1449_v56 = vld [vmem:[#allocation5 + $0x2ac0] sm:$0xff]  ;;  %v1466_v62 = vld [vmem:[#allocation5 + $0x2b48] sm:$0xff] }
 0x27a   :  { %v5259_v50 = vpack.c.bf16 %v1449_v56, %v1433_v55  ;;  %v1563_v55 = vld [vmem:[#allocation5 + $0x2e50] sm:$0xff]  ;;  %v5469_v56 = vpack.c.bf16 %v1580_v43, %v1564_v41 }
 0x27b   :  { %5244 = vmatpush1.bf16.msra.mxu0 %v5243_v2  ;;  %v5261_v2 = vpack.c.bf16 %v1482_v63, %v1466_v62  ;;  %v1596_v62 = vld [vmem:[#allocation5 + $0x2f58] sm:$0xff]  ;;  %v5471_v1 = vpack.c.bf16 %v1579_v57, %v1563_v55  ;;  %v143_v55 = vld [vmem:[#allocation5 + $0x1f0] sm:$0xff]  ;;  %v174_v57 = vld [vmem:[#allocation5 + $0x2e8] sm:$0xff] }
 0x27c   :  { %5440 = vmatpush1.bf16.msra.mxu1 %v5439_v3  ;;  %5246 = vmatprep.subr.bf16.mxu0 %v5245_v4  ;;  %v1465_v3 = vld [vmem:[#allocation5 + $0x2b40] sm:$0xff]  ;;  %v1612_v63 = vld [vmem:[#allocation5 + $0x2fd8] sm:$0xff] }
 0x27d   :  { %5442 = vmatprep.subr.bf16.mxu1 %v5441_v10  ;;  %v1481_v4 = vld [vmem:[#allocation5 + $0x2bc0] sm:$0xff]  ;;  %v1498_v10 = vld [vmem:[#allocation5 + $0x2c48] sm:$0xff] }
 0x27e   :  { %v5263_v16 = vpack.c.bf16 %v1481_v4, %v1465_v3  ;;  %v1595_v3 = vld [vmem:[#allocation5 + $0x2f50] sm:$0xff]  ;;  %v5473_v4 = vpack.c.bf16 %v1612_v63, %v1596_v62 }
 0x27f   :  { %5248 = vmatpush1.bf16.msra.mxu0 %v5247_v20  ;;  %v5265_v20 = vpack.c.bf16 %v1514_v11, %v1498_v10  ;;  %v1628_v10 = vld [vmem:[#allocation5 + $0x3058] sm:$0xff]  ;;  %v5475_v15 = vpack.c.bf16 %v1611_v5, %v1595_v3  ;;  %v175_v3 = vld [vmem:[#allocation5 + $0x2f0] sm:$0xff]  ;;  %v206_v5 = vld [vmem:[#allocation5 + $0x3e8] sm:$0xff] }
 0x280   :  { %5444 = vmatpush1.bf16.msra.mxu1 %v5443_v21  ;;  %5250 = vmatprep.subr.bf16.mxu0 %v5249_v22  ;;  %v1497_v21 = vld [vmem:[#allocation5 + $0x2c40] sm:$0xff]  ;;  %v1644_v11 = vld [vmem:[#allocation5 + $0x30d8] sm:$0xff] }
 0x281   :  { %5446 = vmatprep.subr.bf16.mxu1 %v5445_v28  ;;  %v1513_v22 = vld [vmem:[#allocation5 + $0x2cc0] sm:$0xff]  ;;  %v1530_v28 = vld [vmem:[#allocation5 + $0x2d48] sm:$0xff] }
 0x282   :  { %v5267_v31 = vpack.c.bf16 %v1513_v22, %v1497_v21  ;;  %v5477_v21 = vpack.c.bf16 %v1644_v11, %v1628_v10  ;;  %v1627_v22 = vld [vmem:[#allocation5 + $0x3050] sm:$0xff]  ;;  %v6281_v10 = vsub.s32 4, %v6146_v8 }
 0x283   :  { %5252 = vmatpush1.bf16.msra.mxu0 %v5251_v32  ;;  %v5269_v32 = vpack.c.bf16 %v1546_v29, %v1530_v28  ;;  %v96_v29 = vld [vmem:[#allocation5 + $0x78] sm:$0xff]  ;;  %v5479_v7 = vpack.c.bf16 %v1643_v23, %v1627_v22  ;;  %v191_v22 = vld [vmem:[#allocation5 + $0x370] sm:$0xff]  ;;  %v6291_v23 = vsub.s32 7, %v6146_v8 }
 0x284   :  { %5448 = vmatpush1.bf16.msra.mxu1 %v5447_v33  ;;  %5254 = vmatprep.subr.bf16.mxu0 %v5253_v34  ;;  %v1529_v33 = vld [vmem:[#allocation5 + $0x2d40] sm:$0xff] }
 0x285   :  { %5450 = vmatprep.subr.bf16.mxu1 %v5449_v37  ;;  %v1545_v34 = vld [vmem:[#allocation5 + $0x2dc0] sm:$0xff]  ;;  %v1562_v37 = vld [vmem:[#allocation5 + $0x2e48] sm:$0xff] }
 0x286   :  { %v5271_v44 = vpack.c.bf16 %v1545_v34, %v1529_v33  ;;  %v109_v33 = vld [vmem:[#allocation5 + $0xe0] sm:$0xff]  ;;  %v95_v34 = vld [vmem:[#allocation5 + $0x70] sm:$0xff] }
 0x287   :  { %5256 = vmatpush1.bf16.msra.mxu0 %v5255_v46  ;;  %v5273_v46 = vpack.c.bf16 %v1578_v38, %v1562_v37  ;;  %v128_v37 = vld [vmem:[#allocation5 + $0x178] sm:$0xff]  ;;  %v5679_v43 = vpack.c.bf16 %v111_v35, %v95_v34 }
 0x288   :  { %5452 = vmatpush1.bf16.msra.mxu1 %v5451_v49  ;;  %5258 = vmatprep.subr.bf16.mxu0 %v5257_v52  ;;  %v1561_v49 = vld [vmem:[#allocation5 + $0x2e40] sm:$0xff]  ;;  %v144_v38 = vld [vmem:[#allocation5 + $0x1f8] sm:$0xff] }
 0x289   :  { %5454 = vmatprep.subr.bf16.mxu1 %v5453_v59  ;;  %v1577_v52 = vld [vmem:[#allocation5 + $0x2ec0] sm:$0xff]  ;;  %v1594_v59 = vld [vmem:[#allocation5 + $0x2f48] sm:$0xff] }
 0x28a   :  { %v5275_v0 = vpack.c.bf16 %v1577_v52, %v1561_v49  ;;  %v127_v49 = vld [vmem:[#allocation5 + $0x170] sm:$0xff]  ;;  %v5681_v52 = vpack.c.bf16 %v144_v38, %v128_v37 }
 0x28b   :  { %5260 = vmatpush1.bf16.msra.mxu0 %v5259_v50  ;;  %v5277_v50 = vpack.c.bf16 %v1610_v60, %v1594_v59  ;;  %v160_v59 = vld [vmem:[#allocation5 + $0x278] sm:$0xff]  ;;  %v5683_v63 = vpack.c.bf16 %v143_v55, %v127_v49  ;;  %v223_v37 = vld [vmem:[#allocation5 + $0x470] sm:$0xff] }
 0x28c   :  { %5456 = vmatpush1.bf16.msra.mxu1 %v5455_v51  ;;  %5262 = vmatprep.subr.bf16.mxu0 %v5261_v2  ;;  %v1593_v51 = vld [vmem:[#allocation5 + $0x2f40] sm:$0xff]  ;;  %v176_v60 = vld [vmem:[#allocation5 + $0x2f8] sm:$0xff] }
 0x28d   :  { %5458 = vmatprep.subr.bf16.mxu1 %v5457_v6  ;;  %v1609_v2 = vld [vmem:[#allocation5 + $0x2fc0] sm:$0xff]  ;;  %v1626_v6 = vld [vmem:[#allocation5 + $0x3048] sm:$0xff]  ;;  %v256_v55 = vld [vmem:[#allocation5 + $0x578] sm:$0xff] }
 0x28e   :  { %v5279_v12 = vpack.c.bf16 %v1609_v2, %v1593_v51  ;;  %v159_v51 = vld [vmem:[#allocation5 + $0x270] sm:$0xff]  ;;  %v5685_v2 = vpack.c.bf16 %v176_v60, %v160_v59 }
 0x28f   :  { %5264 = vmatpush1.bf16.msra.mxu0 %v5263_v16  ;;  %v5281_v16 = vpack.c.bf16 %v1642_v9, %v1626_v6  ;;  %v192_v6 = vld [vmem:[#allocation5 + $0x378] sm:$0xff] }
 0x290   :  { %5460 = vmatpush1.bf16.msra.mxu1 %v5459_v17  ;;  %5266 = vmatprep.subr.bf16.mxu0 %v5265_v20  ;;  %v1625_v17 = vld [vmem:[#allocation5 + $0x3040] sm:$0xff]  ;;  %v208_v9 = vld [vmem:[#allocation5 + $0x3f8] sm:$0xff] }
 0x291   :  { %5462 = vmatprep.subr.bf16.mxu1 %v5461_v25  ;;  %v1641_v20 = vld [vmem:[#allocation5 + $0x30c0] sm:$0xff]  ;;  %v94_v25 = vld [vmem:[#allocation5 + $0x68] sm:$0xff] }
 0x292   :  { %v5283_v28 = vpack.c.bf16 %v1641_v20, %v1625_v17  ;;  %v189_v20 = vld [vmem:[#allocation5 + $0x360] sm:$0xff] }
 0x293   :  { %5268 = vmatpush1.bf16.msra.mxu0 %v5267_v31  ;;  %v5481_v31 = vpack.c.bf16 %v110_v27, %v94_v25  ;;  %v207_v25 = vld [vmem:[#allocation5 + $0x3f0] sm:$0xff]  ;;  %v222_v27 = vld [vmem:[#allocation5 + $0x468] sm:$0xff] }
 0x294   :  { %5464 = vmatpush1.bf16.msra.mxu1 %v5463_v14  ;;  %5270 = vmatprep.subr.bf16.mxu0 %v5269_v32  ;;  %v5677_v14 = vpack.c.bf16 %v112_v30, %v96_v29  ;;  %v93_v32 = vld [vmem:[#allocation5 + $0x60] sm:$0xff] }
 0x295   :  { %5466 = vmatprep.subr.bf16.mxu1 %v5465_v24  ;;  %v126_v24 = vld [vmem:[#allocation5 + $0x168] sm:$0xff]  ;;  %v5483_v41 = vpack.c.bf16 %v109_v33, %v93_v32  ;;  %v5959_v29 = vld [vmem:[#allocation7] sm:$0xff] }
 0x296   :  { %v1672_v30 = vrot.slane %v5959_v29, %v6281_v10  ;;  %v1684_v34 = vrot.slane %v5959_v29, %v6291_v23 }
 0x297   :  { %5272 = vmatpush1.bf16.msra.mxu0 %v5271_v44  ;;  %v5485_v44 = vpack.c.bf16 %v142_v40, %v126_v24  ;;  %v221_v24 = vld [vmem:[#allocation5 + $0x460] sm:$0xff] }
 0x298   :  { %5468 = vmatpush1.bf16.msra.mxu1 %v5467_v45  ;;  %5274 = vmatprep.subr.bf16.mxu0 %v5273_v46  ;;  %v125_v45 = vld [vmem:[#allocation5 + $0x160] sm:$0xff] }
 0x299   :  { %5470 = vmatprep.subr.bf16.mxu1 %v5469_v56  ;;  %v141_v46 = vld [vmem:[#allocation5 + $0x1e0] sm:$0xff]  ;;  %v158_v56 = vld [vmem:[#allocation5 + $0x268] sm:$0xff] }
 0x29a   :  { %v5487_v62 = vpack.c.bf16 %v141_v46, %v125_v45  ;;  %v237_v40 = vld [vmem:[#allocation5 + $0x4e0] sm:$0xff]  ;;  %v270_v45 = vld [vmem:[#allocation5 + $0x5e8] sm:$0xff] }
 0x29b   :  { %5276 = vmatpush1.bf16.msra.mxu0 %v5275_v0  ;;  %v5489_v0 = vpack.c.bf16 %v174_v57, %v158_v56  ;;  %v272_v56 = vld [vmem:[#allocation5 + $0x5f8] sm:$0xff]  ;;  %v6297_v57 = vld [vmem:[#allocation8] sm:$0xff] }
 0x29c   :  { %5472 = vmatpush1.bf16.msra.mxu1 %v5471_v1  ;;  %5278 = vmatprep.subr.bf16.mxu0 %v5277_v50  ;;  %v157_v1 = vld [vmem:[#allocation5 + $0x260] sm:$0xff]  ;;  %v4148_v59 = vrot.slane %v6297_v57, %v6281_v10 }
 0x29d   :  { %5474 = vmatprep.subr.bf16.mxu1 %v5473_v4  ;;  %v173_v50 = vld [vmem:[#allocation5 + $0x2e0] sm:$0xff]  ;;  %v190_v4 = vld [vmem:[#allocation5 + $0x368] sm:$0xff] }
 0x29e   :  { %v5491_v11 = vpack.c.bf16 %v173_v50, %v157_v1  ;;  %v5493_v17 = vpack.c.bf16 %v206_v5, %v190_v4  ;;  %v253_v1 = vld [vmem:[#allocation5 + $0x560] sm:$0xff]  ;;  %v255_v5 = vld [vmem:[#allocation5 + $0x570] sm:$0xff] }
 0x29f   :  { %5280 = vmatpush1.bf16.msra.mxu0 %v5279_v12  ;;  %v6285_v12 = vsub.s32 6, %v6146_v8  ;;  %v269_v4 = vld [vmem:[#allocation5 + $0x5e0] sm:$0xff] }
 0x2a0   :  { %5476 = vmatpush1.bf16.msra.mxu1 %v5475_v15  ;;  %5282 = vmatprep.subr.bf16.mxu0 %v5281_v16  ;;  %v6288_v15 = vsub.s32 5, %v6146_v8  ;;  %v5687_v16 = vpack.c.bf16 %v175_v3, %v159_v51  ;;  %v5691_v8 = vpack.c.bf16 %v207_v25, %v191_v22  ;;  %v288_v25 = vld [vmem:[#allocation5 + $0x678] sm:$0xff] }
 0x2a1   :  { %5478 = vmatprep.subr.bf16.mxu1 %v5477_v21  ;;  %v205_v21 = vld [vmem:[#allocation5 + $0x3e0] sm:$0xff] }
 0x2a2   :  { %3164 = vmatmul.mubr.f32.vlgmr.msra.gmra.mrb[4].mxu0 %v6201_v19  ;;  %v5495_v32 = vpack.c.bf16 %v205_v21, %v189_v20  ;;  %v1676_v33 = vrot.slane %v5959_v29, %v6288_v15  ;;  %v286_v20 = vld [vmem:[#allocation5 + $0x668] sm:$0xff] }
 0x2a3   :  { %3448 = vmatmul.mubr.f32.vlgmr.msra.gmra.mrb[4].mxu1 %v6201_v19  ;;  %5284 = vmatpush1.bf16.msra.mxu0 %v5283_v28  ;;  %v238_v28 = vld [vmem:[#allocation5 + $0x4e8] sm:$0xff] }
 0x2a4   :  { %5480 = vmatpush1.bf16.msra.mxu1 %v5479_v7  ;;  %3234 = vmatprep.mubr.f32.mxu0 %v6064_v13  ;;  %v224_v7 = vld [vmem:[#allocation5 + $0x478] sm:$0xff]  ;;  %v5497_v35 = vpack.c.bf16 %v238_v28, %v222_v27  ;;  %v302_v21 = vld [vmem:[#allocation5 + $0x6e8] sm:$0xff]  ;;  %v4156_v28 = vrot.slane %v6297_v57, %v6285_v12 }
 0x2a5   :  { %3518 = vmatprep.mubr.f32.mxu1 %v6064_v13  ;;  %5482 = vmatprep.subr.bf16.mxu0 %v5481_v31  ;;  %v240_v31 = vld [vmem:[#allocation5 + $0x4f8] sm:$0xff] }
 0x2a6   :  { %5678 = vmatprep.subr.bf16.mxu1 %v5677_v14  ;;  %v1680_v14 = vrot.slane %v5959_v29, %v6285_v12  ;;  %v304_v27 = vld [vmem:[#allocation5 + $0x6f8] sm:$0xff] }
 0x2aa   :  { %4300 = vmatmul.mubr.msk.f32.vlgmr.msra.gmra.mrb[4].mxu0 %vm1818_vm0, %v6209_v39 }
 0x2ab   :  { %4301 = vmatmul.mubr.msk.f32.vlgmr.msra.gmra.mrb[4].mxu1 %vm1818_vm0, %v6209_v39  ;;  %5484 = vmatpush1.bf16.msra.mxu0 %v5483_v41  ;;  %v5693_v41 = vpack.c.bf16 %v240_v31, %v224_v7  ;;  %v285_v31 = vld [vmem:[#allocation5 + $0x660] sm:$0xff] }
 0x2ac   :  { %5680 = vmatpush1.bf16.msra.mxu1 %v5679_v43  ;;  %5486 = vmatprep.subr.bf16.mxu0 %v5485_v44  ;;  %v239_v43 = vld [vmem:[#allocation5 + $0x4f0] sm:$0xff]  ;;  %v254_v44 = vld [vmem:[#allocation5 + $0x568] sm:$0xff] }
 0x2ad   :  { %5682 = vmatprep.subr.bf16.mxu1 %v5681_v52  ;;  %3589 = vmatprep.mubr.f32.mxu0 %v6159_v42  ;;  %v5501_v3 = vpack.c.bf16 %v270_v45, %v254_v44  ;;  %v4160_v44 = vrot.slane %v6297_v57, %v6291_v23  ;;  %v320_v45 = vld [vmem:[#allocation5 + $0x778] sm:$0xff] }
 0x2ae   :  { %3873 = vmatprep.mubr.f32.mxu1 %v6159_v42  ;;  %v5689_v42 = vpack.c.bf16 %v208_v9, %v192_v6  ;;  %v271_v6 = vld [vmem:[#allocation5 + $0x5f0] sm:$0xff] }
 0x2af   :  { %5488 = vmatpush1.bf16.msra.mxu0 %v5487_v62  ;;  %v5699_v7 = vpack.c.bf16 %v271_v6, %v255_v5 }
 0x2b0   :  { %5684 = vmatpush1.bf16.msra.mxu1 %v5683_v63  ;;  %5490 = vmatprep.subr.bf16.mxu0 %v5489_v0  ;;  %v5499_v0 = vpack.c.bf16 %v237_v40, %v221_v24  ;;  %v5701_v40 = vpack.c.bf16 %v304_v27, %v288_v25  ;;  %v384_v25 = vld [vmem:[#allocation5 + $0x978] sm:$0xff] }
 0x2b1   :  { %5686 = vmatprep.subr.bf16.mxu1 %v5685_v2  ;;  %v5695_v2 = vpack.c.bf16 %v239_v43, %v223_v37  ;;  %v318_v37 = vld [vmem:[#allocation5 + $0x768] sm:$0xff]  ;;  %v400_v27 = vld [vmem:[#allocation5 + $0x9f8] sm:$0xff] }
 0x2b3   :  { %5492 = vmatpush1.bf16.msra.mxu0 %v5491_v11 }
 0x2b4   :  { %5688 = vmatpush1.bf16.msra.mxu1 %v5687_v16  ;;  %5494 = vmatprep.subr.bf16.mxu0 %v5493_v17  ;;  %v4152_v16 = vrot.slane %v6297_v57, %v6288_v15  ;;  %v5697_v17 = vpack.c.bf16 %v272_v56, %v256_v55 }
 0x2b5   :  { %5690 = vmatprep.subr.bf16.mxu1 %v5689_v42  ;;  %v2668_v38 = vpop.f32.mrb[2].mxu0 }
 0x2b6   :  { %v5877_v46 = vadd.f32 %v2668_v38, %v1672_v30  ;;  %v2952_v49 = vpop.f32.mrb[2].mxu1  ;;  %v2670_v52 = vpop.f32.mrb[3].mxu0  ;;  %v5503_v30 = vpack.c.bf16 %v269_v4, %v253_v1  ;;  %v334_v38 = vld [vmem:[#allocation5 + $0x7e8] sm:$0xff] }
 0x2b7   :  { %v5879_v60 = vadd.f32 %v2952_v49, %v1680_v14  ;;  %5496 = vmatpush1.bf16.msra.mxu0 %v5495_v32  ;;  %v5878_v62 = vadd.f32 %v2670_v52, %v1676_v33  ;;  %v2954_v63 = vpop.f32.mrb[3].mxu1  ;;  %v5505_v33 = vpack.c.bf16 %v302_v21, %v286_v20  ;;  %v350_v1 = vld [vmem:[#allocation5 + $0x868] sm:$0xff]  ;;  %v367_v21 = vld [vmem:[#allocation5 + $0x8f0] sm:$0xff] }
 0x2b8   :  { %v4097_v50 = vmul.f32 0.01, %v5877_v46  ;;  %5692 = vmatpush1.bf16.msra.mxu1 %v5691_v8  ;;  %v5880_v51 = vadd.f32 %v2954_v63, %v1684_v34  ;;  %5498 = vmatprep.subr.bf16.mxu0 %v5497_v35  ;;  %v301_v8 = vld [vmem:[#allocation5 + $0x6e0] sm:$0xff]  ;;  %v287_v34 = vld [vmem:[#allocation5 + $0x670] sm:$0xff] }
 0x2b9   :  { %v4099_v9 = vmul.f32 0.01, %v5879_v60  ;;  %v4098_v11 = vmul.f32 0.01, %v5878_v62  ;;  %5694 = vmatprep.subr.bf16.mxu1 %v5693_v41  ;;  %v303_v35 = vld [vmem:[#allocation5 + $0x6f0] sm:$0xff]  ;;  %v5507_v49 = vpack.c.bf16 %v301_v8, %v285_v31  ;;  %v397_v31 = vld [vmem:[#allocation5 + $0x9e0] sm:$0xff] }
 0x2ba   :  { %v4113_v22 = vmax.f32 %v5877_v46, %v4097_v50  ;;  %v4100_v42 = vmul.f32 0.01, %v5880_v51  ;;  %v336_v46 = vld [vmem:[#allocation5 + $0x7f8] sm:$0xff]  ;;  %v5703_v52 = vpack.c.bf16 %v303_v35, %v287_v34  ;;  %v319_v63 = vld [vmem:[#allocation5 + $0x770] sm:$0xff]  ;;  %v366_v50 = vld [vmem:[#allocation5 + $0x8e8] sm:$0xff] }
 0x2bb   :  { %v4114_v29 = vmax.f32 %v5878_v62, %v4098_v11  ;;  %5500 = vmatpush1.bf16.msra.mxu0 %v5499_v0  ;;  %v4115_v32 = vmax.f32 %v5879_v60, %v4099_v9  ;;  %v317_v60 = vld [vmem:[#allocation5 + $0x760] sm:$0xff]  ;;  %v5705_v0 = vpack.c.bf16 %v336_v46, %v320_v45  ;;  %v5513_v9 = vpack.c.bf16 %v366_v50, %v350_v1  ;;  %v414_v8 = vld [vmem:[#allocation5 + $0xa68] sm:$0xff]  ;;  %v416_v35 = vld [vmem:[#allocation5 + $0xa78] sm:$0xff] }
 0x2bc   :  { %v4213_v14 = vmul.f32 %v4148_v59, %v4113_v22  ;;  %5696 = vmatpush1.bf16.msra.mxu1 %v5695_v2  ;;  %5502 = vmatprep.subr.bf16.mxu0 %v5501_v3  ;;  %v4116_v43 = vmax.f32 %v5880_v51, %v4100_v42  ;;  %v5509_v59 = vpack.c.bf16 %v334_v38, %v318_v37  ;;  %v333_v62 = vld [vmem:[#allocation5 + $0x7e0] sm:$0xff]  ;;  %v352_v2 = vld [vmem:[#allocation5 + $0x878] sm:$0xff]  ;;  %v382_v22 = vld [vmem:[#allocation5 + $0x968] sm:$0xff] }
 0x2bd   :  { %v4214_v24 = vmul.f32 %v4152_v16, %v4114_v29  ;;  %5698 = vmatprep.subr.bf16.mxu1 %v5697_v17  ;;  %v4215_v55 = vmul.f32 %v4156_v28, %v4115_v32  ;;  %v368_v3 = vld [vmem:[#allocation5 + $0x8f8] sm:$0xff]  ;;  %v5511_v4 = vpack.c.bf16 %v333_v62, %v317_v60  ;;  %v349_v11 = vld [vmem:[#allocation5 + $0x860] sm:$0xff]  ;;  %v351_v17 = vld [vmem:[#allocation5 + $0x870] sm:$0xff]  ;;  %v5713_v32 = vpack.c.bf16 %v400_v27, %v384_v25 }
 0x2be   :  { %v4228_v41 = vadd.f32 %v6261_v36, %v4213_v14  ;;  %v335_v36 = vld [vmem:[#allocation5 + $0x7f0] sm:$0xff]  ;;  %v4216_v51 = vmul.f32 %v4160_v44, %v4116_v43  ;;  %v365_v16 = vld [vmem:[#allocation5 + $0x8e0] sm:$0xff]  ;;  %v5709_v20 = vpack.c.bf16 %v368_v3, %v352_v2  ;;  %v398_v42 = vld [vmem:[#allocation5 + $0x9e8] sm:$0xff]  ;;  %v5711_v29 = vpack.c.bf16 %v367_v21, %v351_v17 }
 0x2bf   :  { %5504 = vmatpush1.bf16.msra.mxu0 %v5503_v30  ;;  %v5707_v6 = vpack.c.bf16 %v335_v36, %v319_v63  ;;  %v5515_v28 = vpack.c.bf16 %v365_v16, %v349_v11  ;;  %v5517_v30 = vpack.c.bf16 %v398_v42, %v382_v22  ;;  %v383_v14 = vld [vmem:[#allocation5 + $0x970] sm:$0xff]  ;;  %v430_v34 = vld [vmem:[#allocation5 + $0xae8] sm:$0xff]  ;;  %v429_v43 = vld [vmem:[#allocation5 + $0xae0] sm:$0xff] }
 0x2c0   :  { %v4229_v56 = vadd.f32 %v4228_v41, %v4214_v24  ;;  %5700 = vmatpush1.bf16.msra.mxu1 %v5699_v7  ;;  %5506 = vmatprep.subr.bf16.mxu0 %v5505_v33  ;;  %v381_v7 = vld [vmem:[#allocation5 + $0x960] sm:$0xff]  ;;  %v399_v33 = vld [vmem:[#allocation5 + $0x9f0] sm:$0xff]  ;;  %v432_v24 = vld [vmem:[#allocation5 + $0xaf8] sm:$0xff]  ;;  %v5521_v38 = vpack.c.bf16 %v430_v34, %v414_v8 }
 0x2c1   :  { %5702 = vmatprep.subr.bf16.mxu1 %v5701_v40  ;;  %v5519_v40 = vpack.c.bf16 %v397_v31, %v381_v7  ;;  %v5715_v37 = vpack.c.bf16 %v399_v33, %v383_v14  ;;  %v413_v41 = vld [vmem:[#allocation5 + $0xa60] sm:$0xff]  ;;  %v415_v44 = vld [vmem:[#allocation5 + $0xa70] sm:$0xff]  ;;  %v5717_v45 = vpack.c.bf16 %v432_v24, %v416_v35  ;;  %v480_v2 = vld [vmem:[#allocation5 + $0xc78] sm:$0xff] }
 0x2c2   :  { %v4230_v57 = vadd.f32 %v4229_v56, %v4215_v55  ;;  %v431_v46 = vld [vmem:[#allocation5 + $0xaf0] sm:$0xff]  ;;  %v448_v55 = vld [vmem:[#allocation5 + $0xb78] sm:$0xff]  ;;  %v445_v63 = vld [vmem:[#allocation5 + $0xb60] sm:$0xff] }
 0x2c3   :  { %5508 = vmatpush1.bf16.msra.mxu0 %v5507_v49  ;;  %v446_v49 = vld [vmem:[#allocation5 + $0xb68] sm:$0xff]  ;;  %v464_v56 = vld [vmem:[#allocation5 + $0xbf8] sm:$0xff]  ;;  %v5719_v60 = vpack.c.bf16 %v431_v46, %v415_v44  ;;  %v447_v36 = vld [vmem:[#allocation5 + $0xb70] sm:$0xff] }
 0x2c4   :  { %v6308_v5 = vadd.f32 %v4230_v57, %v4216_v51  ;;  %5704 = vmatpush1.bf16.msra.mxu1 %v5703_v52  ;;  %5510 = vmatprep.subr.bf16.mxu0 %v5509_v59  ;;  %v462_v52 = vld [vmem:[#allocation5 + $0xbe8] sm:$0xff]  ;;  %v5523_v59 = vpack.c.bf16 %v429_v43, %v413_v41  ;;  %v5721_v1 = vpack.c.bf16 %v464_v56, %v448_v55  ;;  %v463_v50 = vld [vmem:[#allocation5 + $0xbf0] sm:$0xff]  ;;  %v496_v3 = vld [vmem:[#allocation5 + $0xcf8] sm:$0xff] }
 0x2c5   :  { %5706 = vmatprep.subr.bf16.mxu1 %v5705_v0  ;;  %v5525_v62 = vpack.c.bf16 %v462_v52, %v446_v49  ;;  %v461_v0 = vld [vmem:[#allocation5 + $0xbe0] sm:$0xff]  ;;  %v478_v51 = vld [vmem:[#allocation5 + $0xc68] sm:$0xff]  ;;  %v479_v17 = vld [vmem:[#allocation5 + $0xc70] sm:$0xff] }
 0x2c6   :  { %v494_v57 = vld [vmem:[#allocation5 + $0xce8] sm:$0xff]  ;;  %v477_v11 = vld [vmem:[#allocation5 + $0xc60] sm:$0xff]  ;;  %v495_v21 = vld [vmem:[#allocation5 + $0xcf0] sm:$0xff] }
 0x2c7   :  { %5512 = vmatpush1.bf16.msra.mxu0 %v5511_v4  ;;  %v5527_v4 = vpack.c.bf16 %v461_v0, %v445_v63  ;;  %v493_v16 = vld [vmem:[#allocation5 + $0xce0] sm:$0xff]  ;;  %v510_v22 = vld [vmem:[#allocation5 + $0xd68] sm:$0xff]  ;;  %v512_v25 = vld [vmem:[#allocation5 + $0xd78] sm:$0xff] }
 0x2c8   :  { %5708 = vmatpush1.bf16.msra.mxu1 %v5707_v6  ;;  %5514 = vmatprep.subr.bf16.mxu0 %v5513_v9  ;;  %v5723_v6 = vpack.c.bf16 %v463_v50, %v447_v36  ;;  %v5529_v9 = vpack.c.bf16 %v494_v57, %v478_v51  ;;  %v526_v42 = vld [vmem:[#allocation5 + $0xde8] sm:$0xff]  ;;  %v528_v27 = vld [vmem:[#allocation5 + $0xdf8] sm:$0xff]  ;;  %v509_v7 = vld [vmem:[#allocation5 + $0xd60] sm:$0xff] }
 0x2c9   :  { %5710 = vmatprep.subr.bf16.mxu1 %v5709_v20  ;;  %v5725_v20 = vpack.c.bf16 %v496_v3, %v480_v2  ;;  %v525_v31 = vld [vmem:[#allocation5 + $0xde0] sm:$0xff]  ;;  %v511_v14 = vld [vmem:[#allocation5 + $0xd70] sm:$0xff]  ;;  %v542_v8 = vld [vmem:[#allocation5 + $0xe68] sm:$0xff] }
 0x2ca   :  { %v527_v33 = vld [vmem:[#allocation5 + $0xdf0] sm:$0xff]  ;;  %v558_v34 = vld [vmem:[#allocation5 + $0xee8] sm:$0xff]  ;;  %v544_v35 = vld [vmem:[#allocation5 + $0xe78] sm:$0xff] }
 0x2cb   :  { %5516 = vmatpush1.bf16.msra.mxu0 %v5515_v28  ;;  %v5531_v28 = vpack.c.bf16 %v493_v16, %v477_v11  ;;  %v560_v24 = vld [vmem:[#allocation5 + $0xef8] sm:$0xff]  ;;  %v541_v41 = vld [vmem:[#allocation5 + $0xe60] sm:$0xff]  ;;  %v543_v44 = vld [vmem:[#allocation5 + $0xe70] sm:$0xff] }
 0x2cc   :  { %5712 = vmatpush1.bf16.msra.mxu1 %v5711_v29  ;;  %5518 = vmatprep.subr.bf16.mxu0 %v5517_v30  ;;  %v5727_v29 = vpack.c.bf16 %v495_v21, %v479_v17  ;;  %v5533_v30 = vpack.c.bf16 %v526_v42, %v510_v22  ;;  %v557_v43 = vld [vmem:[#allocation5 + $0xee0] sm:$0xff]  ;;  %v559_v46 = vld [vmem:[#allocation5 + $0xef0] sm:$0xff]  ;;  %v574_v49 = vld [vmem:[#allocation5 + $0xf68] sm:$0xff] }
 0x2cd   :  { %5714 = vmatprep.subr.bf16.mxu1 %v5713_v32  ;;  %v5729_v32 = vpack.c.bf16 %v528_v27, %v512_v25  ;;  %v590_v52 = vld [vmem:[#allocation5 + $0xfe8] sm:$0xff]  ;;  %v576_v55 = vld [vmem:[#allocation5 + $0xf78] sm:$0xff]  ;;  %v573_v63 = vld [vmem:[#allocation5 + $0xf60] sm:$0xff] }
 0x2ce   :  { %v592_v56 = vld [vmem:[#allocation5 + $0xff8] sm:$0xff]  ;;  %v589_v0 = vld [vmem:[#allocation5 + $0xfe0] sm:$0xff]  ;;  %v575_v36 = vld [vmem:[#allocation5 + $0xf70] sm:$0xff] }
 0x2cf   :  { %5520 = vmatpush1.bf16.msra.mxu0 %v5519_v40  ;;  %v5535_v40 = vpack.c.bf16 %v525_v31, %v509_v7  ;;  %v591_v50 = vld [vmem:[#allocation5 + $0xff0] sm:$0xff]  ;;  %v606_v51 = vld [vmem:[#allocation5 + $0x1068] sm:$0xff]  ;;  %v608_v2 = vld [vmem:[#allocation5 + $0x1078] sm:$0xff] }
 0x2d0   :  { %5716 = vmatpush1.bf16.msra.mxu1 %v5715_v37  ;;  %5522 = vmatprep.subr.bf16.mxu0 %v5521_v38  ;;  %v5731_v37 = vpack.c.bf16 %v527_v33, %v511_v14  ;;  %v5537_v38 = vpack.c.bf16 %v558_v34, %v542_v8  ;;  %v622_v57 = vld [vmem:[#allocation5 + $0x10e8] sm:$0xff]  ;;  %v624_v3 = vld [vmem:[#allocation5 + $0x10f8] sm:$0xff]  ;;  %v605_v11 = vld [vmem:[#allocation5 + $0x1060] sm:$0xff] }
 0x2d1   :  { %5718 = vmatprep.subr.bf16.mxu1 %v5717_v45  ;;  %v5733_v45 = vpack.c.bf16 %v560_v24, %v544_v35  ;;  %v621_v16 = vld [vmem:[#allocation5 + $0x10e0] sm:$0xff]  ;;  %v607_v17 = vld [vmem:[#allocation5 + $0x1070] sm:$0xff]  ;;  %v638_v22 = vld [vmem:[#allocation5 + $0x1168] sm:$0xff] }
 0x2d2   :  { %v623_v21 = vld [vmem:[#allocation5 + $0x10f0] sm:$0xff]  ;;  %v654_v42 = vld [vmem:[#allocation5 + $0x11e8] sm:$0xff]  ;;  %v640_v25 = vld [vmem:[#allocation5 + $0x1178] sm:$0xff] }
 0x2d3   :  { %5524 = vmatpush1.bf16.msra.mxu0 %v5523_v59  ;;  %v5539_v59 = vpack.c.bf16 %v557_v43, %v541_v41  ;;  %v656_v27 = vld [vmem:[#allocation5 + $0x11f8] sm:$0xff]  ;;  %v637_v7 = vld [vmem:[#allocation5 + $0x1160] sm:$0xff]  ;;  %v639_v14 = vld [vmem:[#allocation5 + $0x1170] sm:$0xff] }
 0x2d4   :  { %5720 = vmatpush1.bf16.msra.mxu1 %v5719_v60  ;;  %5526 = vmatprep.subr.bf16.mxu0 %v5525_v62  ;;  %v5735_v60 = vpack.c.bf16 %v559_v46, %v543_v44  ;;  %v5541_v62 = vpack.c.bf16 %v590_v52, %v574_v49  ;;  %v653_v31 = vld [vmem:[#allocation5 + $0x11e0] sm:$0xff]  ;;  %v655_v33 = vld [vmem:[#allocation5 + $0x11f0] sm:$0xff]  ;;  %v670_v8 = vld [vmem:[#allocation5 + $0x1268] sm:$0xff] }
 0x2d5   :  { %5722 = vmatprep.subr.bf16.mxu1 %v5721_v1  ;;  %v5737_v1 = vpack.c.bf16 %v592_v56, %v576_v55  ;;  %v686_v34 = vld [vmem:[#allocation5 + $0x12e8] sm:$0xff]  ;;  %v672_v35 = vld [vmem:[#allocation5 + $0x1278] sm:$0xff]  ;;  %v669_v41 = vld [vmem:[#allocation5 + $0x1260] sm:$0xff] }
 0x2d6   :  { %v688_v24 = vld [vmem:[#allocation5 + $0x12f8] sm:$0xff]  ;;  %v685_v43 = vld [vmem:[#allocation5 + $0x12e0] sm:$0xff]  ;;  %v671_v44 = vld [vmem:[#allocation5 + $0x1270] sm:$0xff] }
 0x2d7   :  { %5528 = vmatpush1.bf16.msra.mxu0 %v5527_v4  ;;  %v5543_v4 = vpack.c.bf16 %v589_v0, %v573_v63  ;;  %v687_v46 = vld [vmem:[#allocation5 + $0x12f0] sm:$0xff]  ;;  %v702_v49 = vld [vmem:[#allocation5 + $0x1368] sm:$0xff]  ;;  %v704_v55 = vld [vmem:[#allocation5 + $0x1378] sm:$0xff] }
 0x2d8   :  { %5724 = vmatpush1.bf16.msra.mxu1 %v5723_v6  ;;  %5530 = vmatprep.subr.bf16.mxu0 %v5529_v9  ;;  %v5739_v6 = vpack.c.bf16 %v591_v50, %v575_v36  ;;  %v5545_v9 = vpack.c.bf16 %v622_v57, %v606_v51  ;;  %v718_v52 = vld [vmem:[#allocation5 + $0x13e8] sm:$0xff]  ;;  %v720_v56 = vld [vmem:[#allocation5 + $0x13f8] sm:$0xff]  ;;  %v717_v63 = vld [vmem:[#allocation5 + $0x13e0] sm:$0xff] }
 0x2d9   :  { %5726 = vmatprep.subr.bf16.mxu1 %v5725_v20  ;;  %v5741_v20 = vpack.c.bf16 %v624_v3, %v608_v2  ;;  %v703_v0 = vld [vmem:[#allocation5 + $0x1370] sm:$0xff]  ;;  %v5753_v36 = vpack.c.bf16 %v720_v56, %v704_v55  ;;  %v734_v50 = vld [vmem:[#allocation5 + $0x1468] sm:$0xff]  ;;  %v736_v57 = vld [vmem:[#allocation5 + $0x1478] sm:$0xff] }
 0x2da   :  { %v750_v51 = vld [vmem:[#allocation5 + $0x14e8] sm:$0xff]  ;;  %v752_v2 = vld [vmem:[#allocation5 + $0x14f8] sm:$0xff] }
 0x2db   :  { %5532 = vmatpush1.bf16.msra.mxu0 %v5531_v28  ;;  %v5547_v28 = vpack.c.bf16 %v621_v16, %v605_v11  ;;  %v735_v11 = vld [vmem:[#allocation5 + $0x1470] sm:$0xff]  ;;  %v5757_v16 = vpack.c.bf16 %v752_v2, %v736_v57 }
 0x2dc   :  { %5728 = vmatpush1.bf16.msra.mxu1 %v5727_v29  ;;  %5534 = vmatprep.subr.bf16.mxu0 %v5533_v30  ;;  %v5743_v29 = vpack.c.bf16 %v623_v21, %v607_v17  ;;  %v5549_v30 = vpack.c.bf16 %v654_v42, %v638_v22  ;;  %v751_v17 = vld [vmem:[#allocation5 + $0x14f0] sm:$0xff]  ;;  %v782_v21 = vld [vmem:[#allocation5 + $0x15e8] sm:$0xff]  ;;  %v768_v22 = vld [vmem:[#allocation5 + $0x1578] sm:$0xff] }
 0x2dd   :  { %5730 = vmatprep.subr.bf16.mxu1 %v5729_v32  ;;  %v5745_v32 = vpack.c.bf16 %v656_v27, %v640_v25  ;;  %v784_v42 = vld [vmem:[#allocation5 + $0x15f8] sm:$0xff]  ;;  %v5759_v27 = vpack.c.bf16 %v751_v17, %v735_v11  ;;  %v879_v11 = vld [vmem:[#allocation5 + $0x18f0] sm:$0xff]  ;;  %v910_v17 = vld [vmem:[#allocation5 + $0x19e8] sm:$0xff] }
 0x2df   :  { %5536 = vmatpush1.bf16.msra.mxu0 %v5535_v40  ;;  %v5551_v40 = vpack.c.bf16 %v653_v31, %v637_v7  ;;  %v767_v7 = vld [vmem:[#allocation5 + $0x1570] sm:$0xff]  ;;  %v5761_v31 = vpack.c.bf16 %v784_v42, %v768_v22 }
 0x2e0   :  { %5732 = vmatpush1.bf16.msra.mxu1 %v5731_v37  ;;  %5538 = vmatprep.subr.bf16.mxu0 %v5537_v38  ;;  %v5747_v37 = vpack.c.bf16 %v655_v33, %v639_v14  ;;  %v5553_v38 = vpack.c.bf16 %v686_v34, %v670_v8  ;;  %v783_v14 = vld [vmem:[#allocation5 + $0x15f0] sm:$0xff]  ;;  %v814_v33 = vld [vmem:[#allocation5 + $0x16e8] sm:$0xff]  ;;  %v800_v8 = vld [vmem:[#allocation5 + $0x1678] sm:$0xff] }
 0x2e1   :  { %5734 = vmatprep.subr.bf16.mxu1 %v5733_v45  ;;  %v5749_v45 = vpack.c.bf16 %v688_v24, %v672_v35  ;;  %v816_v34 = vld [vmem:[#allocation5 + $0x16f8] sm:$0xff]  ;;  %v5763_v24 = vpack.c.bf16 %v783_v14, %v767_v7  ;;  %v911_v7 = vld [vmem:[#allocation5 + $0x19f0] sm:$0xff]  ;;  %v942_v14 = vld [vmem:[#allocation5 + $0x1ae8] sm:$0xff] }
 0x2e3   :  { %5540 = vmatpush1.bf16.msra.mxu0 %v5539_v59  ;;  %v5751_v59 = vpack.c.bf16 %v687_v46, %v671_v44  ;;  %v815_v44 = vld [vmem:[#allocation5 + $0x16f0] sm:$0xff]  ;;  %v846_v46 = vld [vmem:[#allocation5 + $0x17e8] sm:$0xff] }
 0x2e4   :  { %5736 = vmatpush1.bf16.msra.mxu1 %v5735_v60  ;;  %5542 = vmatprep.subr.bf16.mxu0 %v5541_v62  ;;  %v5557_v60 = vpack.c.bf16 %v718_v52, %v702_v49  ;;  %v701_v62 = vld [vmem:[#allocation5 + $0x1360] sm:$0xff]  ;;  %v832_v49 = vld [vmem:[#allocation5 + $0x1778] sm:$0xff] }
 0x2e5   :  { %5738 = vmatprep.subr.bf16.mxu1 %v5737_v1  ;;  %v719_v1 = vld [vmem:[#allocation5 + $0x13f0] sm:$0xff]  ;;  %v5559_v3 = vpack.c.bf16 %v717_v63, %v701_v62  ;;  %v848_v52 = vld [vmem:[#allocation5 + $0x17f8] sm:$0xff] }
 0x2e6   :  { %v831_v62 = vld [vmem:[#allocation5 + $0x1770] sm:$0xff]  ;;  %v5769_v63 = vpack.c.bf16 %v848_v52, %v832_v49 }
 0x2e7   :  { %5544 = vmatpush1.bf16.msra.mxu0 %v5543_v4  ;;  %v5561_v4 = vpack.c.bf16 %v750_v51, %v734_v50  ;;  %v864_v50 = vld [vmem:[#allocation5 + $0x1878] sm:$0xff] }
 0x2e8   :  { %5740 = vmatpush1.bf16.msra.mxu1 %v5739_v6  ;;  %5546 = vmatprep.subr.bf16.mxu0 %v5545_v9  ;;  %v733_v6 = vld [vmem:[#allocation5 + $0x1460] sm:$0xff]  ;;  %v880_v51 = vld [vmem:[#allocation5 + $0x18f8] sm:$0xff] }
 0x2e9   :  { %5742 = vmatprep.subr.bf16.mxu1 %v5741_v20  ;;  %v749_v9 = vld [vmem:[#allocation5 + $0x14e0] sm:$0xff]  ;;  %v766_v20 = vld [vmem:[#allocation5 + $0x1568] sm:$0xff] }
 0x2ea   :  { %3590 = vmatmul.mubr.f32.vlgmr.msra.gmra.mrb[6].mxu0 %v6165_v26  ;;  %v5563_v25 = vpack.c.bf16 %v749_v9, %v733_v6  ;;  %v863_v6 = vld [vmem:[#allocation5 + $0x1870] sm:$0xff]  ;;  %v5773_v9 = vpack.c.bf16 %v880_v51, %v864_v50 }
 0x2eb   :  { %5548 = vmatpush1.bf16.msra.mxu0 %v5547_v28  ;;  %3874 = vmatmul.mubr.f32.vlgmr.msra.gmra.mrb[6].mxu1 %v6165_v26  ;;  %v5555_v26 = vpack.c.bf16 %v685_v43, %v669_v41  ;;  %v5565_v28 = vpack.c.bf16 %v782_v21, %v766_v20  ;;  %v799_v41 = vld [vmem:[#allocation5 + $0x1670] sm:$0xff]  ;;  %v5765_v43 = vpack.c.bf16 %v816_v34, %v800_v8  ;;  %v896_v20 = vld [vmem:[#allocation5 + $0x1978] sm:$0xff] }
 0x2ec   :  { %5744 = vmatpush1.bf16.msra.mxu1 %v5743_v29  ;;  %5550 = vmatprep.subr.bf16.mxu0 %v5549_v30  ;;  %v765_v29 = vld [vmem:[#allocation5 + $0x1560] sm:$0xff]  ;;  %v5767_v56 = vpack.c.bf16 %v815_v44, %v799_v41  ;;  %v912_v21 = vld [vmem:[#allocation5 + $0x19f8] sm:$0xff]  ;;  %v5775_v42 = vpack.c.bf16 %v879_v11, %v863_v6  ;;  %v943_v41 = vld [vmem:[#allocation5 + $0x1af0] sm:$0xff] }
 0x2ed   :  { %5746 = vmatprep.subr.bf16.mxu1 %v5745_v32  ;;  %3660 = vmatprep.mubr.f32.mxu0 %v6177_v58  ;;  %v781_v30 = vld [vmem:[#allocation5 + $0x15e0] sm:$0xff]  ;;  %v798_v32 = vld [vmem:[#allocation5 + $0x1668] sm:$0xff]  ;;  %v1007_v6 = vld [vmem:[#allocation5 + $0x1cf0] sm:$0xff] }
 0x2ee   :  { %3944 = vmatprep.mubr.f32.mxu1 %v6177_v58  ;;  %v5755_v58 = vpack.c.bf16 %v719_v1, %v703_v0  ;;  %v5567_v35 = vpack.c.bf16 %v781_v30, %v765_v29  ;;  %v847_v0 = vld [vmem:[#allocation5 + $0x17f0] sm:$0xff]  ;;  %v878_v1 = vld [vmem:[#allocation5 + $0x18e8] sm:$0xff]  ;;  %v5777_v30 = vpack.c.bf16 %v912_v21, %v896_v20 }
 0x2ef   :  { %5552 = vmatpush1.bf16.msra.mxu0 %v5551_v40  ;;  %v5569_v40 = vpack.c.bf16 %v814_v33, %v798_v32  ;;  %v5771_v2 = vpack.c.bf16 %v847_v0, %v831_v62  ;;  %v895_v29 = vld [vmem:[#allocation5 + $0x1970] sm:$0xff]  ;;  %v928_v32 = vld [vmem:[#allocation5 + $0x1a78] sm:$0xff]  ;;  %v974_v44 = vld [vmem:[#allocation5 + $0x1be8] sm:$0xff] }
 0x2f0   :  { %5748 = vmatpush1.bf16.msra.mxu1 %v5747_v37  ;;  %5554 = vmatprep.subr.bf16.mxu0 %v5553_v38  ;;  %v797_v37 = vld [vmem:[#allocation5 + $0x1660] sm:$0xff]  ;;  %v944_v33 = vld [vmem:[#allocation5 + $0x1af8] sm:$0xff]  ;;  %v5779_v34 = vpack.c.bf16 %v911_v7, %v895_v29  ;;  %v975_v62 = vld [vmem:[#allocation5 + $0x1bf0] sm:$0xff] }
 0x2f1   :  { %5750 = vmatprep.subr.bf16.mxu1 %v5749_v45  ;;  %v813_v38 = vld [vmem:[#allocation5 + $0x16e0] sm:$0xff]  ;;  %v830_v45 = vld [vmem:[#allocation5 + $0x1768] sm:$0xff]  ;;  %v1039_v29 = vld [vmem:[#allocation5 + $0x1df0] sm:$0xff] }
 0x2f2   :  { %v5571_v55 = vpack.c.bf16 %v813_v38, %v797_v37  ;;  %v927_v37 = vld [vmem:[#allocation5 + $0x1a70] sm:$0xff]  ;;  %v5781_v38 = vpack.c.bf16 %v944_v33, %v928_v32  ;;  %v1006_v0 = vld [vmem:[#allocation5 + $0x1ce8] sm:$0xff] }
 0x2f3   :  { %5556 = vmatpush1.bf16.msra.mxu0 %v5555_v26  ;;  %v5573_v26 = vpack.c.bf16 %v846_v46, %v830_v45  ;;  %v960_v45 = vld [vmem:[#allocation5 + $0x1b78] sm:$0xff]  ;;  %v5783_v52 = vpack.c.bf16 %v943_v41, %v927_v37  ;;  %v1038_v11 = vld [vmem:[#allocation5 + $0x1de8] sm:$0xff]  ;;  %v1071_v37 = vld [vmem:[#allocation5 + $0x1ef0] sm:$0xff] }
 0x2f4   :  { %5752 = vmatpush1.bf16.msra.mxu1 %v5751_v59  ;;  %5558 = vmatprep.subr.bf16.mxu0 %v5557_v60  ;;  %v829_v59 = vld [vmem:[#allocation5 + $0x1760] sm:$0xff]  ;;  %v976_v46 = vld [vmem:[#allocation5 + $0x1bf8] sm:$0xff]  ;;  %v1070_v7 = vld [vmem:[#allocation5 + $0x1ee8] sm:$0xff] }
 0x2f5   :  { %5754 = vmatprep.subr.bf16.mxu1 %v5753_v36  ;;  %v845_v60 = vld [vmem:[#allocation5 + $0x17e0] sm:$0xff]  ;;  %v862_v36 = vld [vmem:[#allocation5 + $0x1868] sm:$0xff] }
 0x2f6   :  { %v5575_v57 = vpack.c.bf16 %v845_v60, %v829_v59  ;;  %v959_v59 = vld [vmem:[#allocation5 + $0x1b70] sm:$0xff]  ;;  %v5785_v60 = vpack.c.bf16 %v976_v46, %v960_v45  ;;  %v1102_v41 = vld [vmem:[#allocation5 + $0x1fe8] sm:$0xff] }
 0x2f7   :  { %5560 = vmatpush1.bf16.msra.mxu0 %v5559_v3  ;;  %v5577_v3 = vpack.c.bf16 %v878_v1, %v862_v36  ;;  %v992_v36 = vld [vmem:[#allocation5 + $0x1c78] sm:$0xff]  ;;  %v5787_v51 = vpack.c.bf16 %v975_v62, %v959_v59  ;;  %v1103_v59 = vld [vmem:[#allocation5 + $0x1ff0] sm:$0xff]  ;;  %v1134_v62 = vld [vmem:[#allocation5 + $0x20e8] sm:$0xff] }
 0x2f8   :  { %5756 = vmatpush1.bf16.msra.mxu1 %v5755_v58  ;;  %5562 = vmatprep.subr.bf16.mxu0 %v5561_v4  ;;  %v861_v58 = vld [vmem:[#allocation5 + $0x1860] sm:$0xff]  ;;  %v1008_v1 = vld [vmem:[#allocation5 + $0x1cf8] sm:$0xff] }
 0x2f9   :  { %5758 = vmatprep.subr.bf16.mxu1 %v5757_v16  ;;  %v877_v4 = vld [vmem:[#allocation5 + $0x18e0] sm:$0xff]  ;;  %v894_v16 = vld [vmem:[#allocation5 + $0x1968] sm:$0xff] }
 0x2fa   :  { %v5579_v22 = vpack.c.bf16 %v877_v4, %v861_v58  ;;  %v991_v58 = vld [vmem:[#allocation5 + $0x1c70] sm:$0xff]  ;;  %v5789_v4 = vpack.c.bf16 %v1008_v1, %v992_v36 }
 0x2fb   :  { %5564 = vmatpush1.bf16.msra.mxu0 %v5563_v25  ;;  %v5581_v25 = vpack.c.bf16 %v910_v17, %v894_v16  ;;  %v1024_v16 = vld [vmem:[#allocation5 + $0x1d78] sm:$0xff]  ;;  %v5791_v21 = vpack.c.bf16 %v1007_v6, %v991_v58  ;;  %v1135_v58 = vld [vmem:[#allocation5 + $0x20f0] sm:$0xff]  ;;  %v1166_v6 = vld [vmem:[#allocation5 + $0x21e8] sm:$0xff] }
 0x2fc   :  { %5760 = vmatpush1.bf16.msra.mxu1 %v5759_v27  ;;  %5566 = vmatprep.subr.bf16.mxu0 %v5565_v28  ;;  %v893_v27 = vld [vmem:[#allocation5 + $0x1960] sm:$0xff]  ;;  %v1040_v17 = vld [vmem:[#allocation5 + $0x1df8] sm:$0xff] }
 0x2fd   :  { %5762 = vmatprep.subr.bf16.mxu1 %v5761_v31  ;;  %v909_v28 = vld [vmem:[#allocation5 + $0x19e0] sm:$0xff]  ;;  %v926_v31 = vld [vmem:[#allocation5 + $0x1a68] sm:$0xff] }
 0x2fe   :  { %v5583_v8 = vpack.c.bf16 %v909_v28, %v893_v27  ;;  %v1023_v27 = vld [vmem:[#allocation5 + $0x1d70] sm:$0xff]  ;;  %v5793_v28 = vpack.c.bf16 %v1040_v17, %v1024_v16 }
 0x2ff   :  { %5568 = vmatpush1.bf16.msra.mxu0 %v5567_v35  ;;  %v5585_v35 = vpack.c.bf16 %v942_v14, %v926_v31  ;;  %v1056_v31 = vld [vmem:[#allocation5 + $0x1e78] sm:$0xff]  ;;  %v5795_v33 = vpack.c.bf16 %v1039_v29, %v1023_v27  ;;  %v1167_v27 = vld [vmem:[#allocation5 + $0x21f0] sm:$0xff]  ;;  %v1198_v29 = vld [vmem:[#allocation5 + $0x22e8] sm:$0xff] }
 0x300   :  { %5764 = vmatpush1.bf16.msra.mxu1 %v5763_v24  ;;  %5570 = vmatprep.subr.bf16.mxu0 %v5569_v40  ;;  %v925_v24 = vld [vmem:[#allocation5 + $0x1a60] sm:$0xff]  ;;  %v1072_v14 = vld [vmem:[#allocation5 + $0x1ef8] sm:$0xff] }
 0x301   :  { %5766 = vmatprep.subr.bf16.mxu1 %v5765_v43  ;;  %v941_v40 = vld [vmem:[#allocation5 + $0x1ae0] sm:$0xff]  ;;  %v958_v43 = vld [vmem:[#allocation5 + $0x1b68] sm:$0xff] }
 0x302   :  { %v5587_v49 = vpack.c.bf16 %v941_v40, %v925_v24  ;;  %v1055_v24 = vld [vmem:[#allocation5 + $0x1e70] sm:$0xff]  ;;  %v5797_v40 = vpack.c.bf16 %v1072_v14, %v1056_v31 }
 0x303   :  { %5572 = vmatpush1.bf16.msra.mxu0 %v5571_v55  ;;  %v5589_v55 = vpack.c.bf16 %v974_v44, %v958_v43  ;;  %v1088_v43 = vld [vmem:[#allocation5 + $0x1f78] sm:$0xff]  ;;  %v5799_v46 = vpack.c.bf16 %v1071_v37, %v1055_v24  ;;  %v1199_v24 = vld [vmem:[#allocation5 + $0x22f0] sm:$0xff]  ;;  %v1230_v37 = vld [vmem:[#allocation5 + $0x23e8] sm:$0xff] }
 0x304   :  { %5768 = vmatpush1.bf16.msra.mxu1 %v5767_v56  ;;  %5574 = vmatprep.subr.bf16.mxu0 %v5573_v26  ;;  %v957_v56 = vld [vmem:[#allocation5 + $0x1b60] sm:$0xff]  ;;  %v1104_v44 = vld [vmem:[#allocation5 + $0x1ff8] sm:$0xff] }
 0x305   :  { %5770 = vmatprep.subr.bf16.mxu1 %v5769_v63  ;;  %v973_v26 = vld [vmem:[#allocation5 + $0x1be0] sm:$0xff]  ;;  %v990_v63 = vld [vmem:[#allocation5 + $0x1c68] sm:$0xff] }
 0x306   :  { %v5591_v50 = vpack.c.bf16 %v973_v26, %v957_v56  ;;  %v1087_v56 = vld [vmem:[#allocation5 + $0x1f70] sm:$0xff]  ;;  %v5801_v26 = vpack.c.bf16 %v1104_v44, %v1088_v43 }
 0x307   :  { %5576 = vmatpush1.bf16.msra.mxu0 %v5575_v57  ;;  %v5593_v57 = vpack.c.bf16 %v1006_v0, %v990_v63  ;;  %v1120_v63 = vld [vmem:[#allocation5 + $0x2078] sm:$0xff]  ;;  %v5803_v1 = vpack.c.bf16 %v1103_v59, %v1087_v56  ;;  %v1246_v56 = vld [vmem:[#allocation5 + $0x2468] sm:$0xff] }
 0x308   :  { %5772 = vmatpush1.bf16.msra.mxu1 %v5771_v2  ;;  %5578 = vmatprep.subr.bf16.mxu0 %v5577_v3  ;;  %v989_v2 = vld [vmem:[#allocation5 + $0x1c60] sm:$0xff]  ;;  %v1136_v0 = vld [vmem:[#allocation5 + $0x20f8] sm:$0xff] }
 0x309   :  { %5774 = vmatprep.subr.bf16.mxu1 %v5773_v9  ;;  %v1005_v3 = vld [vmem:[#allocation5 + $0x1ce0] sm:$0xff]  ;;  %v1022_v9 = vld [vmem:[#allocation5 + $0x1d68] sm:$0xff]  ;;  %v1248_v59 = vld [vmem:[#allocation5 + $0x2478] sm:$0xff] }
 0x30a   :  { %v5595_v20 = vpack.c.bf16 %v1005_v3, %v989_v2  ;;  %v1119_v2 = vld [vmem:[#allocation5 + $0x2070] sm:$0xff]  ;;  %v5805_v3 = vpack.c.bf16 %v1136_v0, %v1120_v63  ;;  %v1245_v0 = vld [vmem:[#allocation5 + $0x2460] sm:$0xff] }
 0x30b   :  { %5580 = vmatpush1.bf16.msra.mxu0 %v5579_v22  ;;  %v5597_v22 = vpack.c.bf16 %v1038_v11, %v1022_v9  ;;  %v1152_v9 = vld [vmem:[#allocation5 + $0x2178] sm:$0xff]  ;;  %v5807_v17 = vpack.c.bf16 %v1135_v58, %v1119_v2  ;;  %v1294_v2 = vld [vmem:[#allocation5 + $0x25e8] sm:$0xff] }
 0x30c   :  { %5776 = vmatpush1.bf16.msra.mxu1 %v5775_v42  ;;  %5582 = vmatprep.subr.bf16.mxu0 %v5581_v25  ;;  %v1021_v42 = vld [vmem:[#allocation5 + $0x1d60] sm:$0xff]  ;;  %v1168_v11 = vld [vmem:[#allocation5 + $0x21f8] sm:$0xff] }
 0x30d   :  { %5778 = vmatprep.subr.bf16.mxu1 %v5777_v30  ;;  %v1037_v25 = vld [vmem:[#allocation5 + $0x1de0] sm:$0xff]  ;;  %v1054_v30 = vld [vmem:[#allocation5 + $0x1e68] sm:$0xff]  ;;  %v1296_v58 = vld [vmem:[#allocation5 + $0x25f8] sm:$0xff] }
 0x30e   :  { %v5599_v32 = vpack.c.bf16 %v1037_v25, %v1021_v42  ;;  %v1151_v42 = vld [vmem:[#allocation5 + $0x2170] sm:$0xff]  ;;  %v5809_v25 = vpack.c.bf16 %v1168_v11, %v1152_v9  ;;  %v1277_v11 = vld [vmem:[#allocation5 + $0x2560] sm:$0xff] }
 0x30f   :  { %5584 = vmatpush1.bf16.msra.mxu0 %v5583_v8  ;;  %v5601_v8 = vpack.c.bf16 %v1070_v7, %v1054_v30  ;;  %v1184_v30 = vld [vmem:[#allocation5 + $0x2278] sm:$0xff]  ;;  %v5811_v14 = vpack.c.bf16 %v1167_v27, %v1151_v42  ;;  %v1326_v42 = vld [vmem:[#allocation5 + $0x26e8] sm:$0xff] }
 0x310   :  { %5780 = vmatpush1.bf16.msra.mxu1 %v5779_v34  ;;  %5586 = vmatprep.subr.bf16.mxu0 %v5585_v35  ;;  %v1053_v34 = vld [vmem:[#allocation5 + $0x1e60] sm:$0xff]  ;;  %v1200_v7 = vld [vmem:[#allocation5 + $0x22f8] sm:$0xff] }
 0x311   :  { %5782 = vmatprep.subr.bf16.mxu1 %v5781_v38  ;;  %v1069_v35 = vld [vmem:[#allocation5 + $0x1ee0] sm:$0xff]  ;;  %v1086_v38 = vld [vmem:[#allocation5 + $0x1f68] sm:$0xff]  ;;  %v1328_v27 = vld [vmem:[#allocation5 + $0x26f8] sm:$0xff] }
 0x312   :  { %v5603_v45 = vpack.c.bf16 %v1069_v35, %v1053_v34  ;;  %v1183_v34 = vld [vmem:[#allocation5 + $0x2270] sm:$0xff]  ;;  %v5813_v35 = vpack.c.bf16 %v1200_v7, %v1184_v30  ;;  %v1309_v7 = vld [vmem:[#allocation5 + $0x2660] sm:$0xff] }
 0x313   :  { %5588 = vmatpush1.bf16.msra.mxu0 %v5587_v49  ;;  %v5605_v49 = vpack.c.bf16 %v1102_v41, %v1086_v38  ;;  %v1216_v38 = vld [vmem:[#allocation5 + $0x2378] sm:$0xff]  ;;  %v5815_v43 = vpack.c.bf16 %v1199_v24, %v1183_v34  ;;  %v1358_v34 = vld [vmem:[#allocation5 + $0x27e8] sm:$0xff] }
 0x314   :  { %5784 = vmatpush1.bf16.msra.mxu1 %v5783_v52  ;;  %5590 = vmatprep.subr.bf16.mxu0 %v5589_v55  ;;  %v1085_v52 = vld [vmem:[#allocation5 + $0x1f60] sm:$0xff]  ;;  %v1232_v41 = vld [vmem:[#allocation5 + $0x23f8] sm:$0xff] }
 0x315   :  { %5786 = vmatprep.subr.bf16.mxu1 %v5785_v60  ;;  %v1101_v55 = vld [vmem:[#allocation5 + $0x1fe0] sm:$0xff]  ;;  %v1118_v60 = vld [vmem:[#allocation5 + $0x2068] sm:$0xff]  ;;  %v1360_v24 = vld [vmem:[#allocation5 + $0x27f8] sm:$0xff] }
 0x316   :  { %v5607_v36 = vpack.c.bf16 %v1101_v55, %v1085_v52  ;;  %v5817_v52 = vpack.c.bf16 %v1232_v41, %v1216_v38  ;;  %v1231_v55 = vld [vmem:[#allocation5 + $0x23f0] sm:$0xff]  ;;  %v1341_v41 = vld [vmem:[#allocation5 + $0x2760] sm:$0xff] }
 0x317   :  { %5592 = vmatpush1.bf16.msra.mxu0 %v5591_v50  ;;  %v5609_v50 = vpack.c.bf16 %v1134_v62, %v1118_v60  ;;  %v1264_v60 = vld [vmem:[#allocation5 + $0x24f8] sm:$0xff] }
 0x318   :  { %5788 = vmatpush1.bf16.msra.mxu1 %v5787_v51  ;;  %5594 = vmatprep.subr.bf16.mxu0 %v5593_v57  ;;  %v1117_v51 = vld [vmem:[#allocation5 + $0x2060] sm:$0xff] }
 0x319   :  { %5790 = vmatprep.subr.bf16.mxu1 %v5789_v4  ;;  %v1133_v57 = vld [vmem:[#allocation5 + $0x20e0] sm:$0xff]  ;;  %v1150_v4 = vld [vmem:[#allocation5 + $0x2168] sm:$0xff] }
 0x31a   :  { %v5611_v16 = vpack.c.bf16 %v1133_v57, %v1117_v51  ;;  %v1263_v51 = vld [vmem:[#allocation5 + $0x24f0] sm:$0xff]  ;;  %v1278_v57 = vld [vmem:[#allocation5 + $0x2568] sm:$0xff] }
 0x31b   :  { %5596 = vmatpush1.bf16.msra.mxu0 %v5595_v20  ;;  %v5613_v20 = vpack.c.bf16 %v1166_v6, %v1150_v4  ;;  %v5629_v9 = vpack.c.bf16 %v1294_v2, %v1278_v57 }
 0x31c   :  { %5792 = vmatpush1.bf16.msra.mxu1 %v5791_v21  ;;  %5598 = vmatprep.subr.bf16.mxu0 %v5597_v22  ;;  %v1149_v21 = vld [vmem:[#allocation5 + $0x2160] sm:$0xff] }
 0x31d   :  { %5794 = vmatprep.subr.bf16.mxu1 %v5793_v28  ;;  %v1165_v22 = vld [vmem:[#allocation5 + $0x21e0] sm:$0xff]  ;;  %v1182_v28 = vld [vmem:[#allocation5 + $0x2268] sm:$0xff] }
 0x31e   :  { %v5615_v31 = vpack.c.bf16 %v1165_v22, %v1149_v21  ;;  %v1295_v21 = vld [vmem:[#allocation5 + $0x25f0] sm:$0xff]  ;;  %v1310_v22 = vld [vmem:[#allocation5 + $0x2668] sm:$0xff] }
 0x31f   :  { %5600 = vmatpush1.bf16.msra.mxu0 %v5599_v32  ;;  %v5617_v32 = vpack.c.bf16 %v1198_v29, %v1182_v28  ;;  %v5633_v30 = vpack.c.bf16 %v1326_v42, %v1310_v22 }
 0x320   :  { %5796 = vmatpush1.bf16.msra.mxu1 %v5795_v33  ;;  %5602 = vmatprep.subr.bf16.mxu0 %v5601_v8  ;;  %v1181_v33 = vld [vmem:[#allocation5 + $0x2260] sm:$0xff] }
 0x321   :  { %5798 = vmatprep.subr.bf16.mxu1 %v5797_v40  ;;  %v1197_v8 = vld [vmem:[#allocation5 + $0x22e0] sm:$0xff]  ;;  %v1214_v40 = vld [vmem:[#allocation5 + $0x2368] sm:$0xff] }
 0x322   :  { %v5621_v44 = vpack.c.bf16 %v1230_v37, %v1214_v40 }
 0x323   :  { %5604 = vmatpush1.bf16.msra.mxu0 %v5603_v45  ;;  %v1213_v45 = vld [vmem:[#allocation5 + $0x2360] sm:$0xff] }
 0x324   :  { %5800 = vmatpush1.bf16.msra.mxu1 %v5799_v46  ;;  %5606 = vmatprep.subr.bf16.mxu0 %v5605_v49  ;;  %v1229_v46 = vld [vmem:[#allocation5 + $0x23e0] sm:$0xff]  ;;  %v1215_v49 = vld [vmem:[#allocation5 + $0x2370] sm:$0xff] }
 0x325   :  { %5802 = vmatprep.subr.bf16.mxu1 %v5801_v26  ;;  %v1262_v26 = vld [vmem:[#allocation5 + $0x24e8] sm:$0xff]  ;;  %v5623_v62 = vpack.c.bf16 %v1229_v46, %v1213_v45  ;;  %v1359_v45 = vld [vmem:[#allocation5 + $0x27f0] sm:$0xff] }
 0x326   :  { %v5625_v63 = vpack.c.bf16 %v1262_v26, %v1246_v56  ;;  %v1374_v46 = vld [vmem:[#allocation5 + $0x2868] sm:$0xff] }
 0x327   :  { %5608 = vmatpush1.bf16.msra.mxu0 %v5607_v36  ;;  %v1261_v36 = vld [vmem:[#allocation5 + $0x24e0] sm:$0xff] }
 0x328   :  { %5804 = vmatpush1.bf16.msra.mxu1 %v5803_v1  ;;  %5610 = vmatprep.subr.bf16.mxu0 %v5609_v50  ;;  %v1247_v1 = vld [vmem:[#allocation5 + $0x2470] sm:$0xff]  ;;  %v5821_v50 = vpack.c.bf16 %v1264_v60, %v1248_v59  ;;  %v5627_v4 = vpack.c.bf16 %v1261_v36, %v1245_v0  ;;  %v1373_v60 = vld [vmem:[#allocation5 + $0x2860] sm:$0xff]  ;;  %v1406_v36 = vld [vmem:[#allocation5 + $0x2968] sm:$0xff] }
 0x329   :  { %5806 = vmatprep.subr.bf16.mxu1 %v5805_v3  ;;  %v1280_v3 = vld [vmem:[#allocation5 + $0x2578] sm:$0xff]  ;;  %v5823_v6 = vpack.c.bf16 %v1263_v51, %v1247_v1  ;;  %v1391_v0 = vld [vmem:[#allocation5 + $0x28f0] sm:$0xff]  ;;  %v1422_v1 = vld [vmem:[#allocation5 + $0x29e8] sm:$0xff] }
 0x32a   :  { %3661 = vmatmul.mubr.f32.vlgmr.msra.gmra.mrb[6].mxu0 %v6183_v48  ;;  %v1424_v51 = vld [vmem:[#allocation5 + $0x29f8] sm:$0xff] }
 0x32b   :  { %5612 = vmatpush1.bf16.msra.mxu0 %v5611_v16  ;;  %3945 = vmatmul.mubr.f32.vlgmr.msra.gmra.mrb[6].mxu1 %v6183_v48  ;;  %v5619_v48 = vpack.c.bf16 %v1197_v8, %v1181_v33  ;;  %v1293_v16 = vld [vmem:[#allocation5 + $0x25e0] sm:$0xff]  ;;  %v1327_v33 = vld [vmem:[#allocation5 + $0x26f0] sm:$0xff]  ;;  %v1342_v8 = vld [vmem:[#allocation5 + $0x2768] sm:$0xff] }
 0x32c   :  { %5808 = vmatpush1.bf16.msra.mxu1 %v5807_v17  ;;  %5614 = vmatprep.subr.bf16.mxu0 %v5613_v20  ;;  %v1279_v17 = vld [vmem:[#allocation5 + $0x2570] sm:$0xff]  ;;  %v5825_v20 = vpack.c.bf16 %v1296_v58, %v1280_v3  ;;  %v5631_v28 = vpack.c.bf16 %v1293_v16, %v1277_v11  ;;  %v5637_v38 = vpack.c.bf16 %v1358_v34, %v1342_v8  ;;  %v1405_v58 = vld [vmem:[#allocation5 + $0x2960] sm:$0xff]  ;;  %v1438_v16 = vld [vmem:[#allocation5 + $0x2a68] sm:$0xff] }
 0x32d   :  { %5810 = vmatprep.subr.bf16.mxu1 %v5809_v25  ;;  %3731 = vmatprep.mubr.f32.mxu0 %v6195_v18  ;;  %v1312_v25 = vld [vmem:[#allocation5 + $0x2678] sm:$0xff]  ;;  %v5827_v29 = vpack.c.bf16 %v1295_v21, %v1279_v17  ;;  %v5645_v3 = vpack.c.bf16 %v1422_v1, %v1406_v36  ;;  %v1423_v11 = vld [vmem:[#allocation5 + $0x29f0] sm:$0xff]  ;;  %v1454_v17 = vld [vmem:[#allocation5 + $0x2ae8] sm:$0xff] }
 0x32e   :  { %4015 = vmatprep.mubr.f32.mxu1 %v6195_v18  ;;  %v5819_v18 = vpack.c.bf16 %v1231_v55, %v1215_v49  ;;  %v1390_v49 = vld [vmem:[#allocation5 + $0x28e8] sm:$0xff]  ;;  %v1392_v55 = vld [vmem:[#allocation5 + $0x28f8] sm:$0xff] }
 0x32f   :  { %5616 = vmatpush1.bf16.msra.mxu0 %v5615_v31  ;;  %v1325_v31 = vld [vmem:[#allocation5 + $0x26e0] sm:$0xff]  ;;  %v5641_v59 = vpack.c.bf16 %v1390_v49, %v1374_v46  ;;  %v1456_v21 = vld [vmem:[#allocation5 + $0x2af8] sm:$0xff] }
 0x330   :  { %5812 = vmatpush1.bf16.msra.mxu1 %v5811_v14  ;;  %5618 = vmatprep.subr.bf16.mxu0 %v5617_v32  ;;  %v1311_v14 = vld [vmem:[#allocation5 + $0x2670] sm:$0xff]  ;;  %v5829_v32 = vpack.c.bf16 %v1328_v27, %v1312_v25  ;;  %v5635_v40 = vpack.c.bf16 %v1325_v31, %v1309_v7  ;;  %v5649_v25 = vpack.c.bf16 %v1454_v17, %v1438_v16  ;;  %v1437_v27 = vld [vmem:[#allocation5 + $0x2a60] sm:$0xff]  ;;  %v1470_v31 = vld [vmem:[#allocation5 + $0x2b68] sm:$0xff] }
 0x331   :  { %5814 = vmatprep.subr.bf16.mxu1 %v5813_v35  ;;  %v1344_v35 = vld [vmem:[#allocation5 + $0x2778] sm:$0xff]  ;;  %v5831_v37 = vpack.c.bf16 %v1327_v33, %v1311_v14  ;;  %v1455_v7 = vld [vmem:[#allocation5 + $0x2af0] sm:$0xff]  ;;  %v1486_v14 = vld [vmem:[#allocation5 + $0x2be8] sm:$0xff] }
 0x332   :  { %v1488_v33 = vld [vmem:[#allocation5 + $0x2bf8] sm:$0xff] }
 0x333   :  { %5620 = vmatpush1.bf16.msra.mxu0 %v5619_v48  ;;  %v1357_v48 = vld [vmem:[#allocation5 + $0x27e0] sm:$0xff] }
 0x334   :  { %5816 = vmatpush1.bf16.msra.mxu1 %v5815_v43  ;;  %5622 = vmatprep.subr.bf16.mxu0 %v5621_v44  ;;  %v1343_v43 = vld [vmem:[#allocation5 + $0x2770] sm:$0xff]  ;;  %v5833_v44 = vpack.c.bf16 %v1360_v24, %v1344_v35  ;;  %v5639_v56 = vpack.c.bf16 %v1357_v48, %v1341_v41  ;;  %v5653_v35 = vpack.c.bf16 %v1486_v14, %v1470_v31  ;;  %v1469_v24 = vld [vmem:[#allocation5 + $0x2b60] sm:$0xff]  ;;  %v1502_v48 = vld [vmem:[#allocation5 + $0x2c68] sm:$0xff] }
 0x335   :  { %5818 = vmatprep.subr.bf16.mxu1 %v5817_v52  ;;  %v1376_v52 = vld [vmem:[#allocation5 + $0x2878] sm:$0xff]  ;;  %v5835_v26 = vpack.c.bf16 %v1359_v45, %v1343_v43  ;;  %v1487_v41 = vld [vmem:[#allocation5 + $0x2bf0] sm:$0xff]  ;;  %v1518_v43 = vld [vmem:[#allocation5 + $0x2ce8] sm:$0xff] }
 0x336   :  { %v1520_v45 = vld [vmem:[#allocation5 + $0x2cf8] sm:$0xff] }
 0x337   :  { %5624 = vmatpush1.bf16.msra.mxu0 %v5623_v62  ;;  %v1389_v62 = vld [vmem:[#allocation5 + $0x28e0] sm:$0xff] }
 0x338   :  { %5820 = vmatpush1.bf16.msra.mxu1 %v5819_v18  ;;  %5626 = vmatprep.subr.bf16.mxu0 %v5625_v63  ;;  %v1375_v18 = vld [vmem:[#allocation5 + $0x2870] sm:$0xff]  ;;  %v5837_v63 = vpack.c.bf16 %v1392_v55, %v1376_v52  ;;  %v5643_v57 = vpack.c.bf16 %v1389_v62, %v1373_v60  ;;  %v5657_v52 = vpack.c.bf16 %v1518_v43, %v1502_v48  ;;  %v1501_v55 = vld [vmem:[#allocation5 + $0x2c60] sm:$0xff]  ;;  %v1534_v62 = vld [vmem:[#allocation5 + $0x2d68] sm:$0xff] }
 0x339   :  { %5822 = vmatprep.subr.bf16.mxu1 %v5821_v50  ;;  %v1408_v50 = vld [vmem:[#allocation5 + $0x2978] sm:$0xff]  ;;  %v5839_v2 = vpack.c.bf16 %v1391_v0, %v1375_v18  ;;  %v1519_v60 = vld [vmem:[#allocation5 + $0x2cf0] sm:$0xff]  ;;  %v1550_v18 = vld [vmem:[#allocation5 + $0x2de8] sm:$0xff] }
 0x33a   :  { %v1552_v0 = vld [vmem:[#allocation5 + $0x2df8] sm:$0xff] }
 0x33b   :  { %5628 = vmatpush1.bf16.msra.mxu0 %v5627_v4  ;;  %v1421_v4 = vld [vmem:[#allocation5 + $0x29e0] sm:$0xff] }
 0x33c   :  { %5824 = vmatpush1.bf16.msra.mxu1 %v5823_v6  ;;  %5630 = vmatprep.subr.bf16.mxu0 %v5629_v9  ;;  %v1407_v6 = vld [vmem:[#allocation5 + $0x2970] sm:$0xff]  ;;  %v5841_v9 = vpack.c.bf16 %v1424_v51, %v1408_v50  ;;  %v5647_v22 = vpack.c.bf16 %v1421_v4, %v1405_v58  ;;  %v5661_v50 = vpack.c.bf16 %v1550_v18, %v1534_v62  ;;  %v1533_v51 = vld [vmem:[#allocation5 + $0x2d60] sm:$0xff]  ;;  %v1566_v4 = vld [vmem:[#allocation5 + $0x2e68] sm:$0xff] }
 0x33d   :  { %5826 = vmatprep.subr.bf16.mxu1 %v5825_v20  ;;  %v1440_v20 = vld [vmem:[#allocation5 + $0x2a78] sm:$0xff]  ;;  %v5843_v42 = vpack.c.bf16 %v1423_v11, %v1407_v6  ;;  %v1551_v58 = vld [vmem:[#allocation5 + $0x2df0] sm:$0xff]  ;;  %v1582_v6 = vld [vmem:[#allocation5 + $0x2ee8] sm:$0xff] }
 0x33e   :  { %v1584_v11 = vld [vmem:[#allocation5 + $0x2ef8] sm:$0xff] }
 0x33f   :  { %5632 = vmatpush1.bf16.msra.mxu0 %v5631_v28  ;;  %v1453_v28 = vld [vmem:[#allocation5 + $0x2ae0] sm:$0xff] }
 0x340   :  { %5828 = vmatpush1.bf16.msra.mxu1 %v5827_v29  ;;  %5634 = vmatprep.subr.bf16.mxu0 %v5633_v30  ;;  %v1439_v29 = vld [vmem:[#allocation5 + $0x2a70] sm:$0xff]  ;;  %v5845_v30 = vpack.c.bf16 %v1456_v21, %v1440_v20  ;;  %v5651_v8 = vpack.c.bf16 %v1453_v28, %v1437_v27  ;;  %v5665_v20 = vpack.c.bf16 %v1582_v6, %v1566_v4  ;;  %v1565_v21 = vld [vmem:[#allocation5 + $0x2e60] sm:$0xff]  ;;  %v1598_v28 = vld [vmem:[#allocation5 + $0x2f68] sm:$0xff] }
 0x341   :  { %5830 = vmatprep.subr.bf16.mxu1 %v5829_v32  ;;  %v1472_v32 = vld [vmem:[#allocation5 + $0x2b78] sm:$0xff]  ;;  %v5847_v34 = vpack.c.bf16 %v1455_v7, %v1439_v29  ;;  %v1583_v27 = vld [vmem:[#allocation5 + $0x2ef0] sm:$0xff]  ;;  %v1614_v29 = vld [vmem:[#allocation5 + $0x2fe8] sm:$0xff] }
 0x342   :  { %v1616_v7 = vld [vmem:[#allocation5 + $0x2ff8] sm:$0xff] }
 0x343   :  { %5636 = vmatpush1.bf16.msra.mxu0 %v5635_v40  ;;  %v1485_v40 = vld [vmem:[#allocation5 + $0x2be0] sm:$0xff] }
 0x344   :  { %5832 = vmatpush1.bf16.msra.mxu1 %v5831_v37  ;;  %5638 = vmatprep.subr.bf16.mxu0 %v5637_v38  ;;  %v1471_v37 = vld [vmem:[#allocation5 + $0x2b70] sm:$0xff]  ;;  %v5849_v38 = vpack.c.bf16 %v1488_v33, %v1472_v32  ;;  %v5655_v46 = vpack.c.bf16 %v1485_v40, %v1469_v24  ;;  %v5669_v32 = vpack.c.bf16 %v1614_v29, %v1598_v28  ;;  %v1597_v33 = vld [vmem:[#allocation5 + $0x2f60] sm:$0xff]  ;;  %v1630_v40 = vld [vmem:[#allocation5 + $0x3068] sm:$0xff] }
 0x345   :  { %5834 = vmatprep.subr.bf16.mxu1 %v5833_v44  ;;  %v1504_v44 = vld [vmem:[#allocation5 + $0x2c78] sm:$0xff]  ;;  %v5851_v49 = vpack.c.bf16 %v1487_v41, %v1471_v37  ;;  %v1615_v24 = vld [vmem:[#allocation5 + $0x2ff0] sm:$0xff]  ;;  %v1646_v37 = vld [vmem:[#allocation5 + $0x30e8] sm:$0xff] }
 0x346   :  { %v1648_v41 = vld [vmem:[#allocation5 + $0x30f8] sm:$0xff] }
 0x347   :  { %5640 = vmatpush1.bf16.msra.mxu0 %v5639_v56  ;;  %v1517_v56 = vld [vmem:[#allocation5 + $0x2ce0] sm:$0xff] }
 0x348   :  { %5836 = vmatpush1.bf16.msra.mxu1 %v5835_v26  ;;  %5642 = vmatprep.subr.bf16.mxu0 %v5641_v59  ;;  %v1503_v26 = vld [vmem:[#allocation5 + $0x2c70] sm:$0xff]  ;;  %v5853_v59 = vpack.c.bf16 %v1520_v45, %v1504_v44  ;;  %v5659_v36 = vpack.c.bf16 %v1517_v56, %v1501_v55  ;;  %v5673_v44 = vpack.c.bf16 %v1646_v37, %v1630_v40  ;;  %v1629_v45 = vld [vmem:[#allocation5 + $0x3060] sm:$0xff] }
 0x349   :  { %5838 = vmatprep.subr.bf16.mxu1 %v5837_v63  ;;  %v1536_v63 = vld [vmem:[#allocation5 + $0x2d78] sm:$0xff]  ;;  %v5855_v1 = vpack.c.bf16 %v1519_v60, %v1503_v26  ;;  %v1647_v55 = vld [vmem:[#allocation5 + $0x30f0] sm:$0xff] }
 0x34b   :  { %5644 = vmatpush1.bf16.msra.mxu0 %v5643_v57  ;;  %v1549_v57 = vld [vmem:[#allocation5 + $0x2de0] sm:$0xff] }
 0x34c   :  { %5840 = vmatpush1.bf16.msra.mxu1 %v5839_v2  ;;  %5646 = vmatprep.subr.bf16.mxu0 %v5645_v3  ;;  %v1535_v2 = vld [vmem:[#allocation5 + $0x2d70] sm:$0xff]  ;;  %v5857_v3 = vpack.c.bf16 %v1552_v0, %v1536_v63  ;;  %v5663_v16 = vpack.c.bf16 %v1549_v57, %v1533_v51  ;;  %v4126_v0 = vld [vmem:[#allocation8 + $0x8] sm:$0xff] }
 0x34d   :  { %5842 = vmatprep.subr.bf16.mxu1 %v5841_v9  ;;  %v1568_v9 = vld [vmem:[#allocation5 + $0x2e78] sm:$0xff]  ;;  %v5859_v17 = vpack.c.bf16 %v1551_v58, %v1535_v2  ;;  %v4168_v6 = vrot.slane %v4126_v0, %v6242_v54  ;;  %v4180_v40 = vrot.slane %v4126_v0, %v6281_v10 }
 0x34f   :  { %5648 = vmatpush1.bf16.msra.mxu0 %v5647_v22  ;;  %v1581_v22 = vld [vmem:[#allocation5 + $0x2ee0] sm:$0xff] }
 0x350   :  { %5844 = vmatpush1.bf16.msra.mxu1 %v5843_v42  ;;  %5650 = vmatprep.subr.bf16.mxu0 %v5649_v25  ;;  %v1567_v42 = vld [vmem:[#allocation5 + $0x2e70] sm:$0xff]  ;;  %v5861_v25 = vpack.c.bf16 %v1584_v11, %v1568_v9  ;;  %v5667_v31 = vpack.c.bf16 %v1581_v22, %v1565_v21  ;;  %v4172_v21 = vrot.slane %v4126_v0, %v6239_v53 }
 0x351   :  { %5846 = vmatprep.subr.bf16.mxu1 %v5845_v30  ;;  %v1600_v30 = vld [vmem:[#allocation5 + $0x2f78] sm:$0xff]  ;;  %v5863_v14 = vpack.c.bf16 %v1583_v27, %v1567_v42  ;;  %v4176_v27 = vrot.slane %v4126_v0, %v6245_v61 }
 0x353   :  { %5652 = vmatpush1.bf16.msra.mxu0 %v5651_v8  ;;  %v1613_v8 = vld [vmem:[#allocation5 + $0x2fe0] sm:$0xff] }
 0x354   :  { %5848 = vmatpush1.bf16.msra.mxu1 %v5847_v34  ;;  %5654 = vmatprep.subr.bf16.mxu0 %v5653_v35  ;;  %v1599_v34 = vld [vmem:[#allocation5 + $0x2f70] sm:$0xff]  ;;  %v5865_v35 = vpack.c.bf16 %v1616_v7, %v1600_v30  ;;  %v5671_v48 = vpack.c.bf16 %v1613_v8, %v1597_v33 }
 0x355   :  { %5850 = vmatprep.subr.bf16.mxu1 %v5849_v38  ;;  %v1632_v38 = vld [vmem:[#allocation5 + $0x3078] sm:$0xff]  ;;  %v5867_v43 = vpack.c.bf16 %v1615_v24, %v1599_v34 }
 0x357   :  { %5656 = vmatpush1.bf16.msra.mxu0 %v5655_v46  ;;  %v1645_v46 = vld [vmem:[#allocation5 + $0x30e0] sm:$0xff] }
 0x358   :  { %5852 = vmatpush1.bf16.msra.mxu1 %v5851_v49  ;;  %5658 = vmatprep.subr.bf16.mxu0 %v5657_v52  ;;  %v5869_v49 = vpack.c.bf16 %v1648_v41, %v1632_v38  ;;  %v1631_v52 = vld [vmem:[#allocation5 + $0x3070] sm:$0xff]  ;;  %v5675_v56 = vpack.c.bf16 %v1645_v46, %v1629_v45  ;;  %v4192_v46 = vrot.slane %v4126_v0, %v6291_v23 }
 0x359   :  { %5854 = vmatprep.subr.bf16.mxu1 %v5853_v59  ;;  %v5871_v26 = vpack.c.bf16 %v1647_v55, %v1631_v52  ;;  %v1650_v59 = vld [vmem:[#allocation7 + $0x8] sm:$0xff] }
 0x35a   :  { %v1688_v60 = vrot.slane %v1650_v59, %v6235_v47  ;;  %v1696_v62 = vrot.slane %v1650_v59, %v6239_v53  ;;  %v1692_v18 = vrot.slane %v1650_v59, %v6242_v54  ;;  %v1704_v54 = vrot.slane %v1650_v59, %v6281_v10 }
 0x35b   :  { %5660 = vmatpush1.bf16.msra.mxu0 %v5659_v36 }
 0x35c   :  { %5856 = vmatpush1.bf16.msra.mxu1 %v5855_v1  ;;  %5662 = vmatprep.subr.bf16.mxu0 %v5661_v50 }
 0x35d   :  { %5858 = vmatprep.subr.bf16.mxu1 %v5857_v3 }
 0x35f   :  { %5664 = vmatpush1.bf16.msra.mxu0 %v5663_v16 }
 0x360   :  { %5860 = vmatpush1.bf16.msra.mxu1 %v5859_v17  ;;  %5666 = vmatprep.subr.bf16.mxu0 %v5665_v20 }
 0x361   :  { %5862 = vmatprep.subr.bf16.mxu1 %v5861_v25 }
 0x363   :  { %5668 = vmatpush1.bf16.msra.mxu0 %v5667_v31  ;;  %v1712_v31 = vrot.slane %v1650_v59, %v6285_v12 }
 0x364   :  { %5864 = vmatpush1.bf16.msra.mxu1 %v5863_v14  ;;  %5670 = vmatprep.subr.bf16.mxu0 %v5669_v32  ;;  %v1708_v14 = vrot.slane %v1650_v59, %v6288_v15  ;;  %v1716_v32 = vrot.slane %v1650_v59, %v6291_v23 }
 0x365   :  { %5866 = vmatprep.subr.bf16.mxu1 %v5865_v35 }
 0x367   :  { %5672 = vmatpush1.bf16.msra.mxu0 %v5671_v48  ;;  %v4184_v48 = vrot.slane %v4126_v0, %v6288_v15  ;;  %v4304_v15 = vld [vmem:[#allocation2] ss:$0 sm:$0xff] }
 0x368   :  { %5868 = vmatpush1.bf16.msra.mxu1 %v5867_v43  ;;  %5674 = vmatprep.subr.bf16.mxu0 %v5673_v44 }
 0x369   :  { %5870 = vmatprep.subr.bf16.mxu1 %v5869_v49 }
 0x36a   :  { %3732 = vmatmul.mubr.f32.vlgmr.msra.gmra.mrb[6].mxu0 %v6201_v19 }
 0x36b   :  { %4016 = vmatmul.mubr.f32.vlgmr.msra.gmra.mrb[6].mxu1 %v6201_v19  ;;  %5676 = vmatpush1.bf16.msra.mxu0 %v5675_v56  ;;  %v1700_v19 = vrot.slane %v1650_v59, %v6245_v61  ;;  %v4188_v56 = vrot.slane %v4126_v0, %v6285_v12 }
 0x36c   :  { %5872 = vmatpush1.bf16.msra.mxu1 %v5871_v26  ;;  %3802 = vmatprep.mubr.f32.mxu0 %v6064_v13 }
 0x36d   :  { %4086 = vmatprep.mubr.f32.mxu1 %v6064_v13 }
 0x372   :  { %4302 = vmatmul.mubr.msk.f32.vlgmr.msra.gmra.mrb[6].mxu0 %vm1818_vm0, %v6209_v39 }
 0x373   :  { %4303 = vmatmul.mubr.msk.f32.vlgmr.msra.gmra.mrb[6].mxu1 %vm1818_vm0, %v6209_v39  ;;  %v4164_v39 = vrot.slane %v4126_v0, %v6235_v47 }
 0x37d   :  { %v3236_v63 = vpop.f32.mrb[4].mxu0 }
 0x37e   :  { %v5881_v36 = vadd.f32 %v3236_v63, %v1688_v60  ;;  %v3520_v1 = vpop.f32.mrb[4].mxu1  ;;  %v3238_v13 = vpop.f32.mrb[5].mxu0 }
 0x37f   :  { %v5883_v50 = vadd.f32 %v3520_v1, %v1696_v62  ;;  %v5882_v51 = vadd.f32 %v3238_v13, %v1692_v18  ;;  %v3522_v57 = vpop.f32.mrb[5].mxu1 }
 0x380   :  { %v4101_v2 = vmul.f32 0.01, %v5881_v36  ;;  %v5884_v3 = vadd.f32 %v3522_v57, %v1700_v19 }
 0x381   :  { %v4103_v58 = vmul.f32 0.01, %v5883_v50  ;;  %v4102_v4 = vmul.f32 0.01, %v5882_v51 }
 0x382   :  { %v4117_v9 = vmax.f32 %v5881_v36, %v4101_v2  ;;  %v4104_v11 = vmul.f32 0.01, %v5884_v3 }
 0x383   :  { %v4118_v16 = vmax.f32 %v5882_v51, %v4102_v4  ;;  %v4119_v20 = vmax.f32 %v5883_v50, %v4103_v58 }
 0x384   :  { %v4217_v17 = vmul.f32 %v4164_v39, %v4117_v9  ;;  %v4120_v25 = vmax.f32 %v5884_v3, %v4104_v11 }
 0x385   :  { %v4218_v22 = vmul.f32 %v4168_v6, %v4118_v16  ;;  %v4219_v28 = vmul.f32 %v4172_v21, %v4119_v20 }
 0x386   :  { %v4232_v42 = vadd.f32 %v6308_v5, %v4217_v17  ;;  %v4220_v29 = vmul.f32 %v4176_v27, %v4120_v25 }
 0x388   :  { %v4233_v47 = vadd.f32 %v4232_v42, %v4218_v22 }
 0x38a   :  { %v4234_v30 = vadd.f32 %v4233_v47, %v4219_v28 }
 0x38c   :  { %v4235_v7 = vadd.f32 %v4234_v30, %v4220_v29 }
 0x445   :  { %v3804_v53 = vpop.f32.mrb[6].mxu0 }
 0x446   :  { %v5885_v33 = vadd.f32 %v3804_v53, %v1704_v54  ;;  %v4088_v8 = vpop.f32.mrb[6].mxu1  ;;  %v3806_v5 = vpop.f32.mrb[7].mxu0 }
 0x447   :  { %v5887_v34 = vadd.f32 %v4088_v8, %v1712_v31  ;;  %v5886_v35 = vadd.f32 %v3806_v5, %v1708_v14  ;;  %v4090_v61 = vpop.f32.mrb[7].mxu1 }
 0x448   :  { %v4105_v24 = vmul.f32 0.01, %v5885_v33  ;;  %v5888_v37 = vadd.f32 %v4090_v61, %v1716_v32 }
 0x449   :  { %v4107_v38 = vmul.f32 0.01, %v5887_v34  ;;  %v4106_v41 = vmul.f32 0.01, %v5886_v35 }
 0x44a   :  { %v4121_v43 = vmax.f32 %v5885_v33, %v4105_v24  ;;  %v4108_v44 = vmul.f32 0.01, %v5888_v37 }
 0x44b   :  { %v4122_v45 = vmax.f32 %v5886_v35, %v4106_v41  ;;  %v4123_v52 = vmax.f32 %v5887_v34, %v4107_v38 }
 0x44c   :  { %v4221_v49 = vmul.f32 %v4180_v40, %v4121_v43  ;;  %v4124_v55 = vmax.f32 %v5888_v37, %v4108_v44 }
 0x44d   :  { %v4222_v26 = vmul.f32 %v4184_v48, %v4122_v45  ;;  %v4223_v62 = vmul.f32 %v4188_v56, %v4123_v52 }
 0x44e   :  { %v4236_v59 = vadd.f32 %v4235_v7, %v4221_v49  ;;  %v4224_v60 = vmul.f32 %v4192_v46, %v4124_v55 }
 0x450   :  { %v4237_v10 = vadd.f32 %v4236_v59, %v4222_v26  ;;  %v4240_v19 = vsel %vm4239_vm1, %v4224_v60, 0.0 }
 0x452   :  { %v4238_v18 = vadd.f32 %v4237_v10, %v4223_v62 }
 0x454   :  { %v4241_v63 = vadd.f32 %v4240_v19, %v4238_v18 }
 0x456   :  { %4242 = vadd.xlane.f32.xlu0 %v4241_v63 }
 0x4e3   :  { %v4243_v36 = vpop.xlane.xlu0 %4242 }
 0x4e4   :  { %v4251_v1 = vadd.f32 %v4304_v15, %v4243_v36 }
 0x4e6   :  { %4253 = vst.msk [vmem:[#allocation10] sm:$0xff] %vm4252_vm2, %v4251_v1 }
 0x4ed   :  { %v4271_v23 = vld [vmem:[#allocation10] sm:$0x3] }
 0x4ee   :  { %4272 = vst [vmem:[%s6351_s5] sm:$0x3] %v4271_v23 }
 0x4ef   :  { %4289 = vsyncpa [#allocation4], 1 }
 0x4f0   :  { %4290 = vsyncpa [#allocation6], 1 }
 0x4f1   :  { %4291 = vsyncpa [#allocation9], 1 }

</bundles_post_ra>
